<compile_context>
chip_gen: v6e
topology: v6e:2x2x1
jax: 0.10.0
libtpu: 0.0.40
codegen_flags: <defaults>
</compile_context>

<pallas_src>
import jax
import jax.numpy as jnp
from jax.experimental import pallas as pl
from jax.experimental.pallas import tpu as pltpu


# ---------------------------------------------------------------------------
# Kernel
# ---------------------------------------------------------------------------
def _nerf_kernel(pos_ref, view_ref,
                 w0, w_body, w4h, w4p, wheadh, wheadv,
                 b_body, b_head, w_out, b_out,
                 out_ref):
    f32 = jnp.float32
    bf16 = jnp.bfloat16
    feat = w0.shape[1]            # 64
    fh = w_out.shape[0] - 1       # feat // 2

    # bf16 cast in-kernel (VPU has large slack); inputs arrive as f32 streams.
    pos = pos_ref[...].astype(bf16)     # (tm, pos_dim)
    view = view_ref[...].astype(bf16)   # (tm, view_dim)

    def mm(a, w):
        return jnp.dot(a, w, preferred_element_type=f32)

    def act(z):
        return jnp.maximum(z, 0.0).astype(bf16)

    # Body layer 0 (pos only).
    h = act(mm(pos, w0[...]) + b_body[0:1, :])
    # Body layers 1-3 (stacked weights, tile-aligned static row slices).
    for j, li in enumerate((1, 2, 3)):
        h = act(mm(h, w_body[j * feat:(j + 1) * feat, :]) + b_body[li:li + 1, :])
    # Layer 4 skip: cat([h, pos]) @ W4 == h @ W4_h + pos @ W4_p.
    h = act(mm(h, w4h[...]) + mm(pos, w4p[...]) + b_body[4:5, :])
    # Body layers 5-7.
    for j, li in enumerate((5, 6, 7)):
        h = act(mm(h, w_body[(j + 3) * feat:(j + 4) * feat, :]) + b_body[li:li + 1, :])

    # Fused head: cols [0:fh] -> rgb hidden pre-activation, col [fh] -> sigma.
    z = mm(h, wheadh[...]) + mm(view, wheadv[...]) + b_head[...]   # (tm, fh+1)
    lane = jax.lax.broadcasted_iota(jnp.int32, z.shape, dimension=1)
    r = jnp.where(lane < fh, jnp.maximum(z, 0.0), z).astype(bf16)  # ReLU rgb lanes only

    # One tiny matmul ([rgb | sigma] via identity column) + one full-block store.
    out_ref[...] = mm(r, w_out[...]) + b_out[...]                  # (tm, 4) f32


# ---------------------------------------------------------------------------
# Parameter preparation (wrapper-side, plain XLA; runs once per param set)
# ---------------------------------------------------------------------------
_WEIGHT_NAMES = ("w0", "w_body", "w4h", "w4p", "wheadh", "wheadv",
                 "b_body", "b_head", "w_out", "b_out")


def prepare_kernel_params(p, pos_dim, view_dim):
    """Convert torch-layout params into packed/fused bf16 kernel params."""
    f32, bf16 = jnp.float32, jnp.bfloat16
    feat = p["w1"].shape[0]
    fh = feat // 2

    kp = {}
    kp["w0"] = p["w0"].astype(bf16)                                     # (pos, feat)
    kp["w_body"] = jnp.concatenate(
        [p[f"w{i}"] for i in (1, 2, 3, 5, 6, 7)], axis=0).astype(bf16)  # (6*feat, feat)

    w4 = p["w4"]                                                        # (feat+pos, feat)
    kp["w4h"] = w4[:feat].astype(bf16)                                  # (feat, feat)
    kp["w4p"] = w4[feat:].astype(bf16)                                  # (pos, feat)

    wr1 = p["wr1"]                                                      # (feat+view, fh)
    kp["wheadh"] = jnp.concatenate([wr1[:feat], p["ws"]], axis=1).astype(bf16)   # (feat, fh+1)
    kp["wheadv"] = jnp.concatenate(
        [wr1[feat:], jnp.zeros((view_dim, 1), f32)], axis=1).astype(bf16)        # (view, fh+1)

    kp["b_body"] = jnp.concatenate(
        [p[f"b{i}"] for i in range(8)], axis=0).astype(f32)             # (8, feat)
    kp["b_head"] = jnp.concatenate([p["br1"], p["bs"]], axis=1).astype(f32)      # (1, fh+1)

    w_out = jnp.zeros((fh + 1, 4), f32)
    w_out = w_out.at[:fh, :3].set(p["wr2"])
    w_out = w_out.at[fh, 3].set(1.0)                                    # sigma passthrough
    kp["w_out"] = w_out.astype(bf16)                                    # (fh+1, 4)
    kp["b_out"] = jnp.concatenate(
        [p["br2"], jnp.zeros((1, 1), f32)], axis=1).astype(f32)         # (1, 4)
    return kp


# ---------------------------------------------------------------------------
# Wrapper
# ---------------------------------------------------------------------------
def _choose_tm(n, desired=2048, align=256):
    """Largest row tile up to `desired`, keeping >= 2 grid steps when n allows
    (so the parallel grid axis can shard over v7x's two TensorCores)."""
    if n <= align:
        return max(8, -(-n // 8) * 8)
    half = -(-n // 2)
    tm = -(-half // align) * align
    return max(align, min(desired, tm))


def nerf_forward(pos, view_dir, params, tm=None):
    """Pallas NeRF forward. pos: (N, pos_dim) f32, view_dir: (N, view_dim) f32."""
    N, pos_dim = pos.shape
    _, view_dim = view_dir.shape

    kp = prepare_kernel_params(params, pos_dim, view_dim)
    weight_args = tuple(kp[n] for n in _WEIGHT_NAMES)
    feat = kp["w0"].shape[1]
    fh = feat // 2

    if tm is None:
        tm = _choose_tm(N)
    grid = (pl.cdiv(N, tm),)   # remainder handled by Pallas partial-block clipping

    in_specs = [pl.BlockSpec((tm, pos_dim), lambda i: (i, 0)),
                pl.BlockSpec((tm, view_dim), lambda i: (i, 0))]
    for w in weight_args:
        # Grid-invariant full-array blocks; constant index map => fetched once.
        in_specs.append(pl.BlockSpec(w.shape, lambda i: (0, 0)))

    out_spec = pl.BlockSpec((tm, 4), lambda i: (i, 0))
    out_shape = jax.ShapeDtypeStruct((N, 4), jnp.float32)

    macs_per_row = (pos_dim * feat                       # layer 0
                    + 6 * feat * feat                    # layers 1-3, 5-7
                    + feat * feat + pos_dim * feat       # layer 4 (split skip)
                    + feat * (fh + 1) + view_dim * (fh + 1)  # fused head
                    + (fh + 1) * 4)                      # output matmul
    weight_bytes = sum(int(w.size) * w.dtype.itemsize for w in weight_args)
    cost = pl.CostEstimate(
        flops=int(2 * N * macs_per_row),
        transcendentals=0,
        bytes_accessed=int(N * ((pos_dim + view_dim) * 4 + 4 * 4) + weight_bytes))

    out = pl.pallas_call(
        _nerf_kernel,
        out_shape=out_shape,
        grid_spec=pltpu.PrefetchScalarGridSpec(
            num_scalar_prefetch=0,
            grid=grid,
            in_specs=in_specs,
            out_specs=out_spec,
        ),
        compiler_params=pltpu.CompilerParams(
            dimension_semantics=("parallel",)),
        cost_estimate=cost,
    )(pos, view_dir, *weight_args)

    rgb = out[:, 0:3]
    sigma = out[:, 3:4]
    return sigma, rgb


# ---------------------------------------------------------------------------
# Init + references
# ---------------------------------------------------------------------------
def init_params(key, pos_dim, view_dim, feat):
    """Deterministic init mimicking nn.Linear defaults (U(-1/sqrt(fan_in), .))."""
    def linear(k, fan_in, fan_out):
        kw, kb = jax.random.split(k)
        bound = 1.0 / (fan_in ** 0.5)
        w = jax.random.uniform(kw, (fan_in, fan_out), jnp.float32, -bound, bound)
        b = jax.random.uniform(kb, (1, fan_out), jnp.float32, -bound, bound)
        return w, b

    keys = jax.random.split(key, 11)
    p = {}
    p["w0"], p["b0"] = linear(keys[0], pos_dim, feat)
    for i in (1, 2, 3):
        p[f"w{i}"], p[f"b{i}"] = linear(keys[i], feat, feat)
    p["w4"], p["b4"] = linear(keys[4], feat + pos_dim, feat)
    for i in (5, 6, 7):
        p[f"w{i}"], p[f"b{i}"] = linear(keys[i], feat, feat)
    p["wr1"], p["br1"] = linear(keys[8], feat + view_dim, feat // 2)
    p["wr2"], p["br2"] = linear(keys[9], feat // 2, 3)
    p["ws"], p["bs"] = linear(keys[10], feat, 1)
    return p


def nerf_ref_f32(pos, view_dir, p):
    """Pure-JAX f32 reference replicating the PyTorch forward exactly."""
    relu = lambda v: jnp.maximum(v, 0.0)
    h = relu(pos @ p["w0"] + p["b0"])
    for i in (1, 2, 3):
        h = relu(h @ p[f"w{i}"] + p[f"b{i}"])
    h = relu(jnp.concatenate([h, pos], axis=-1) @ p["w4"] + p["b4"])
    for i in (5, 6, 7):
        h = relu(h @ p[f"w{i}"] + p[f"b{i}"])
    r = relu(jnp.concatenate([h, view_dir], axis=-1) @ p["wr1"] + p["br1"])
    rgb = r @ p["wr2"] + p["br2"]
    sigma = h @ p["ws"] + p["bs"]
    return sigma, rgb


def nerf_ref_matched(pos, view_dir, kp):
    """Pure-JAX reference with the same bf16-matmul / f32-accumulate numerics."""
    f32, bf16 = jnp.float32, jnp.bfloat16
    feat = kp["w0"].shape[1]
    fh = kp["w_out"].shape[0] - 1
    p_b = pos.astype(bf16)
    v_b = view_dir.astype(bf16)

    def mm(a, w):
        return jnp.dot(a, w, preferred_element_type=f32)

    def act(z):
        return jnp.maximum(z, 0.0).astype(bf16)

    h = act(mm(p_b, kp["w0"]) + kp["b_body"][0:1])
    for j, li in enumerate((1, 2, 3)):
        h = act(mm(h, kp["w_body"][j * feat:(j + 1) * feat]) + kp["b_body"][li:li + 1])
    h = act(mm(h, kp["w4h"]) + mm(p_b, kp["w4p"]) + kp["b_body"][4:5])
    for j, li in enumerate((5, 6, 7)):
        h = act(mm(h, kp["w_body"][(j + 3) * feat:(j + 4) * feat]) + kp["b_body"][li:li + 1])
    z = mm(h, kp["wheadh"]) + mm(v_b, kp["wheadv"]) + kp["b_head"]
    r = jnp.concatenate([jnp.maximum(z[:, :fh], 0.0), z[:, fh:]], axis=-1).astype(bf16)
    out = mm(r, kp["w_out"]) + kp["b_out"]
    return out[:, 3:4], out[:, 0:3]


# ---------------------------------------------------------------------------
if __name__ == "__main__":
    # Small shapes consistent with the module's forward signature.
    num_sample = 1000        # not a tile multiple -> exercises partial last block
    pos_dim = 48             # positional-encoding dim of sample coordinates
    view_dir_dim = 24        # positional-encoding dim of view directions
    feat_dim = 64

    key = jax.random.PRNGKey(0)
    k_pos, k_view, k_par = jax.random.split(key, 3)
    pos = jax.random.normal(k_pos, (num_sample, pos_dim), jnp.float32)
    view_dir = jax.random.normal(k_view, (num_sample, view_dir_dim), jnp.float32)
    params = init_params(k_par, pos_dim, view_dir_dim, feat_dim)

    sigma, rgb = nerf_forward(pos, view_dir, params)   # auto tm (>=2 grid steps)
    jax.block_until_ready((sigma, rgb))

    assert sigma.shape == (num_sample, 1) and rgb.shape == (num_sample, 3)

    # Tight check vs. a numerics-matched (bf16 matmul, f32 accumulate) reference.
    kp = prepare_kernel_params(params, pos_dim, view_dir_dim)
    sigma_m, rgb_m = nerf_ref_matched(pos, view_dir, kp)
    assert jnp.allclose(sigma, sigma_m, atol=2e-3, rtol=2e-3)
    assert jnp.allclose(rgb, rgb_m, atol=2e-3, rtol=2e-3)

    # Loose check vs. the exact f32 PyTorch-equivalent forward (bf16 rounding).
    sigma_f, rgb_f = nerf_ref_f32(pos, view_dir, params)
    assert jnp.allclose(sigma, sigma_f, atol=5e-2, rtol=5e-2)
    assert jnp.allclose(rgb, rgb_f, atol=5e-2, rtol=5e-2)

    print("KERNEL_OK")
</pallas_src>

<mosaic_0001>
module attributes {stable_mosaic.version = 11 : i64} {
  func.func @_nerf_kernel(%arg0: i32, %arg1: memref<512x48xf32, #tpu.memory_space<vmem>>, %arg2: memref<512x24xf32, #tpu.memory_space<vmem>>, %arg3: memref<48x64xbf16, #tpu.memory_space<vmem>>, %arg4: memref<384x64xbf16, #tpu.memory_space<vmem>>, %arg5: memref<64x64xbf16, #tpu.memory_space<vmem>>, %arg6: memref<48x64xbf16, #tpu.memory_space<vmem>>, %arg7: memref<64x33xbf16, #tpu.memory_space<vmem>>, %arg8: memref<24x33xbf16, #tpu.memory_space<vmem>>, %arg9: memref<8x64xf32, #tpu.memory_space<vmem>>, %arg10: memref<1x33xf32, #tpu.memory_space<vmem>>, %arg11: memref<33x4xbf16, #tpu.memory_space<vmem>>, %arg12: memref<1x4xf32, #tpu.memory_space<vmem>>, %arg13: memref<512x4xf32, #tpu.memory_space<vmem>>) attributes {dimension_semantics = [#tpu.dimension_semantics<parallel>], iteration_bounds = array<i64: 2>, scalar_prefetch = 0 : i64, scratch_operands = 0 : i64, tpu.core_type = #tpu.core_type<tc>, window_params = [{transform_indices = @transform_0, window_bounds = array<i64: 512, 48>}, {transform_indices = @transform_1, window_bounds = array<i64: 512, 24>}, {pipeline_mode = #tpu.pipeline_mode<synchronous>, transform_indices = @transform_2, window_bounds = array<i64: 48, 64>}, {pipeline_mode = #tpu.pipeline_mode<synchronous>, transform_indices = @transform_3, window_bounds = array<i64: 384, 64>}, {pipeline_mode = #tpu.pipeline_mode<synchronous>, transform_indices = @transform_4, window_bounds = array<i64: 64, 64>}, {pipeline_mode = #tpu.pipeline_mode<synchronous>, transform_indices = @transform_5, window_bounds = array<i64: 48, 64>}, {pipeline_mode = #tpu.pipeline_mode<synchronous>, transform_indices = @transform_6, window_bounds = array<i64: 64, 33>}, {pipeline_mode = #tpu.pipeline_mode<synchronous>, transform_indices = @transform_7, window_bounds = array<i64: 24, 33>}, {pipeline_mode = #tpu.pipeline_mode<synchronous>, transform_indices = @transform_8, window_bounds = array<i64: 8, 64>}, {pipeline_mode = #tpu.pipeline_mode<synchronous>, transform_indices = @transform_9, window_bounds = array<i64: 1, 33>}, {pipeline_mode = #tpu.pipeline_mode<synchronous>, transform_indices = @transform_10, window_bounds = array<i64: 33, 4>}, {pipeline_mode = #tpu.pipeline_mode<synchronous>, transform_indices = @transform_11, window_bounds = array<i64: 1, 4>}, {transform_indices = @transform_12, window_bounds = array<i64: 512, 4>}]} {
    %c0 = arith.constant 0 : index
    %c0_0 = arith.constant 0 : index
    %0 = vector.load %arg1[%c0, %c0_0] : memref<512x48xf32, #tpu.memory_space<vmem>>, vector<512x48xf32>
    %1 = arith.truncf %0 : vector<512x48xf32> to vector<512x48xbf16>
    %c0_1 = arith.constant 0 : index
    %c0_2 = arith.constant 0 : index
    %2 = vector.load %arg2[%c0_1, %c0_2] : memref<512x24xf32, #tpu.memory_space<vmem>>, vector<512x24xf32>
    %3 = arith.truncf %2 : vector<512x24xf32> to vector<512x24xbf16>
    %c0_3 = arith.constant 0 : index
    %c0_4 = arith.constant 0 : index
    %4 = vector.load %arg3[%c0_3, %c0_4] : memref<48x64xbf16, #tpu.memory_space<vmem>>, vector<48x64xbf16>
    %cst = arith.constant dense<0.000000e+00> : vector<512x64xf32>
    %5 = tpu.matmul %1, %4, %cst {dimension_numbers = #tpu.dot_dimension_numbers<[1], [0], [0], [1], [0, 0, 1, 1], [], []>} : vector<512x48xbf16>, vector<48x64xbf16>, vector<512x64xf32> -> vector<512x64xf32>
    %c0_5 = arith.constant 0 : index
    %c0_6 = arith.constant 0 : index
    %6 = vector.load %arg9[%c0_5, %c0_6] : memref<8x64xf32, #tpu.memory_space<vmem>>, vector<1x64xf32>
    %7 = vector.broadcast %6 : vector<1x64xf32> to vector<512x64xf32>
    %8 = arith.addf %5, %7 : vector<512x64xf32>
    %cst_7 = arith.constant 0.000000e+00 : f32
    %9 = vector.broadcast %cst_7 : f32 to vector<512x64xf32>
    %10 = arith.maximumf %8, %9 : vector<512x64xf32>
    %11 = arith.truncf %10 : vector<512x64xf32> to vector<512x64xbf16>
    %c0_8 = arith.constant 0 : index
    %c0_9 = arith.constant 0 : index
    %12 = vector.load %arg4[%c0_8, %c0_9] : memref<384x64xbf16, #tpu.memory_space<vmem>>, vector<64x64xbf16>
    %cst_10 = arith.constant dense<0.000000e+00> : vector<512x64xf32>
    %13 = tpu.matmul %11, %12, %cst_10 {dimension_numbers = #tpu.dot_dimension_numbers<[1], [0], [0], [1], [0, 0, 1, 1], [], []>} : vector<512x64xbf16>, vector<64x64xbf16>, vector<512x64xf32> -> vector<512x64xf32>
    %c1 = arith.constant 1 : index
    %c0_11 = arith.constant 0 : index
    %14 = vector.load %arg9[%c1, %c0_11] : memref<8x64xf32, #tpu.memory_space<vmem>>, vector<1x64xf32>
    %15 = vector.broadcast %14 : vector<1x64xf32> to vector<512x64xf32>
    %16 = arith.addf %13, %15 : vector<512x64xf32>
    %cst_12 = arith.constant 0.000000e+00 : f32
    %17 = vector.broadcast %cst_12 : f32 to vector<512x64xf32>
    %18 = arith.maximumf %16, %17 : vector<512x64xf32>
    %19 = arith.truncf %18 : vector<512x64xf32> to vector<512x64xbf16>
    %c64 = arith.constant 64 : index
    %c0_13 = arith.constant 0 : index
    %20 = vector.load %arg4[%c64, %c0_13] : memref<384x64xbf16, #tpu.memory_space<vmem>>, vector<64x64xbf16>
    %cst_14 = arith.constant dense<0.000000e+00> : vector<512x64xf32>
    %21 = tpu.matmul %19, %20, %cst_14 {dimension_numbers = #tpu.dot_dimension_numbers<[1], [0], [0], [1], [0, 0, 1, 1], [], []>} : vector<512x64xbf16>, vector<64x64xbf16>, vector<512x64xf32> -> vector<512x64xf32>
    %c2 = arith.constant 2 : index
    %c0_15 = arith.constant 0 : index
    %22 = vector.load %arg9[%c2, %c0_15] : memref<8x64xf32, #tpu.memory_space<vmem>>, vector<1x64xf32>
    %23 = vector.broadcast %22 : vector<1x64xf32> to vector<512x64xf32>
    %24 = arith.addf %21, %23 : vector<512x64xf32>
    %cst_16 = arith.constant 0.000000e+00 : f32
    %25 = vector.broadcast %cst_16 : f32 to vector<512x64xf32>
    %26 = arith.maximumf %24, %25 : vector<512x64xf32>
    %27 = arith.truncf %26 : vector<512x64xf32> to vector<512x64xbf16>
    %c128 = arith.constant 128 : index
    %c0_17 = arith.constant 0 : index
    %28 = vector.load %arg4[%c128, %c0_17] : memref<384x64xbf16, #tpu.memory_space<vmem>>, vector<64x64xbf16>
    %cst_18 = arith.constant dense<0.000000e+00> : vector<512x64xf32>
    %29 = tpu.matmul %27, %28, %cst_18 {dimension_numbers = #tpu.dot_dimension_numbers<[1], [0], [0], [1], [0, 0, 1, 1], [], []>} : vector<512x64xbf16>, vector<64x64xbf16>, vector<512x64xf32> -> vector<512x64xf32>
    %c3 = arith.constant 3 : index
    %c0_19 = arith.constant 0 : index
    %30 = vector.load %arg9[%c3, %c0_19] : memref<8x64xf32, #tpu.memory_space<vmem>>, vector<1x64xf32>
    %31 = vector.broadcast %30 : vector<1x64xf32> to vector<512x64xf32>
    %32 = arith.addf %29, %31 : vector<512x64xf32>
    %cst_20 = arith.constant 0.000000e+00 : f32
    %33 = vector.broadcast %cst_20 : f32 to vector<512x64xf32>
    %34 = arith.maximumf %32, %33 : vector<512x64xf32>
    %35 = arith.truncf %34 : vector<512x64xf32> to vector<512x64xbf16>
    %c0_21 = arith.constant 0 : index
    %c0_22 = arith.constant 0 : index
    %36 = vector.load %arg5[%c0_21, %c0_22] : memref<64x64xbf16, #tpu.memory_space<vmem>>, vector<64x64xbf16>
    %cst_23 = arith.constant dense<0.000000e+00> : vector<512x64xf32>
    %37 = tpu.matmul %35, %36, %cst_23 {dimension_numbers = #tpu.dot_dimension_numbers<[1], [0], [0], [1], [0, 0, 1, 1], [], []>} : vector<512x64xbf16>, vector<64x64xbf16>, vector<512x64xf32> -> vector<512x64xf32>
    %c0_24 = arith.constant 0 : index
    %c0_25 = arith.constant 0 : index
    %38 = vector.load %arg6[%c0_24, %c0_25] : memref<48x64xbf16, #tpu.memory_space<vmem>>, vector<48x64xbf16>
    %cst_26 = arith.constant dense<0.000000e+00> : vector<512x64xf32>
    %39 = tpu.matmul %1, %38, %cst_26 {dimension_numbers = #tpu.dot_dimension_numbers<[1], [0], [0], [1], [0, 0, 1, 1], [], []>} : vector<512x48xbf16>, vector<48x64xbf16>, vector<512x64xf32> -> vector<512x64xf32>
    %40 = arith.addf %37, %39 : vector<512x64xf32>
    %c4 = arith.constant 4 : index
    %c0_27 = arith.constant 0 : index
    %41 = vector.load %arg9[%c4, %c0_27] : memref<8x64xf32, #tpu.memory_space<vmem>>, vector<1x64xf32>
    %42 = vector.broadcast %41 : vector<1x64xf32> to vector<512x64xf32>
    %43 = arith.addf %40, %42 : vector<512x64xf32>
    %cst_28 = arith.constant 0.000000e+00 : f32
    %44 = vector.broadcast %cst_28 : f32 to vector<512x64xf32>
    %45 = arith.maximumf %43, %44 : vector<512x64xf32>
    %46 = arith.truncf %45 : vector<512x64xf32> to vector<512x64xbf16>
    %c192 = arith.constant 192 : index
    %c0_29 = arith.constant 0 : index
    %47 = vector.load %arg4[%c192, %c0_29] : memref<384x64xbf16, #tpu.memory_space<vmem>>, vector<64x64xbf16>
    %cst_30 = arith.constant dense<0.000000e+00> : vector<512x64xf32>
    %48 = tpu.matmul %46, %47, %cst_30 {dimension_numbers = #tpu.dot_dimension_numbers<[1], [0], [0], [1], [0, 0, 1, 1], [], []>} : vector<512x64xbf16>, vector<64x64xbf16>, vector<512x64xf32> -> vector<512x64xf32>
    %c5 = arith.constant 5 : index
    %c0_31 = arith.constant 0 : index
    %49 = vector.load %arg9[%c5, %c0_31] : memref<8x64xf32, #tpu.memory_space<vmem>>, vector<1x64xf32>
    %50 = vector.broadcast %49 : vector<1x64xf32> to vector<512x64xf32>
    %51 = arith.addf %48, %50 : vector<512x64xf32>
    %cst_32 = arith.constant 0.000000e+00 : f32
    %52 = vector.broadcast %cst_32 : f32 to vector<512x64xf32>
    %53 = arith.maximumf %51, %52 : vector<512x64xf32>
    %54 = arith.truncf %53 : vector<512x64xf32> to vector<512x64xbf16>
    %c256 = arith.constant 256 : index
    %c0_33 = arith.constant 0 : index
    %55 = vector.load %arg4[%c256, %c0_33] : memref<384x64xbf16, #tpu.memory_space<vmem>>, vector<64x64xbf16>
    %cst_34 = arith.constant dense<0.000000e+00> : vector<512x64xf32>
    %56 = tpu.matmul %54, %55, %cst_34 {dimension_numbers = #tpu.dot_dimension_numbers<[1], [0], [0], [1], [0, 0, 1, 1], [], []>} : vector<512x64xbf16>, vector<64x64xbf16>, vector<512x64xf32> -> vector<512x64xf32>
    %c6 = arith.constant 6 : index
    %c0_35 = arith.constant 0 : index
    %57 = vector.load %arg9[%c6, %c0_35] : memref<8x64xf32, #tpu.memory_space<vmem>>, vector<1x64xf32>
    %58 = vector.broadcast %57 : vector<1x64xf32> to vector<512x64xf32>
    %59 = arith.addf %56, %58 : vector<512x64xf32>
    %cst_36 = arith.constant 0.000000e+00 : f32
    %60 = vector.broadcast %cst_36 : f32 to vector<512x64xf32>
    %61 = arith.maximumf %59, %60 : vector<512x64xf32>
    %62 = arith.truncf %61 : vector<512x64xf32> to vector<512x64xbf16>
    %c320 = arith.constant 320 : index
    %c0_37 = arith.constant 0 : index
    %63 = vector.load %arg4[%c320, %c0_37] : memref<384x64xbf16, #tpu.memory_space<vmem>>, vector<64x64xbf16>
    %cst_38 = arith.constant dense<0.000000e+00> : vector<512x64xf32>
    %64 = tpu.matmul %62, %63, %cst_38 {dimension_numbers = #tpu.dot_dimension_numbers<[1], [0], [0], [1], [0, 0, 1, 1], [], []>} : vector<512x64xbf16>, vector<64x64xbf16>, vector<512x64xf32> -> vector<512x64xf32>
    %c7 = arith.constant 7 : index
    %c0_39 = arith.constant 0 : index
    %65 = vector.load %arg9[%c7, %c0_39] : memref<8x64xf32, #tpu.memory_space<vmem>>, vector<1x64xf32>
    %66 = vector.broadcast %65 : vector<1x64xf32> to vector<512x64xf32>
    %67 = arith.addf %64, %66 : vector<512x64xf32>
    %cst_40 = arith.constant 0.000000e+00 : f32
    %68 = vector.broadcast %cst_40 : f32 to vector<512x64xf32>
    %69 = arith.maximumf %67, %68 : vector<512x64xf32>
    %70 = arith.truncf %69 : vector<512x64xf32> to vector<512x64xbf16>
    %c0_41 = arith.constant 0 : index
    %c0_42 = arith.constant 0 : index
    %71 = vector.load %arg7[%c0_41, %c0_42] : memref<64x33xbf16, #tpu.memory_space<vmem>>, vector<64x33xbf16>
    %cst_43 = arith.constant dense<0.000000e+00> : vector<512x33xf32>
    %72 = tpu.matmul %70, %71, %cst_43 {dimension_numbers = #tpu.dot_dimension_numbers<[1], [0], [0], [1], [0, 0, 1, 1], [], []>} : vector<512x64xbf16>, vector<64x33xbf16>, vector<512x33xf32> -> vector<512x33xf32>
    %c0_44 = arith.constant 0 : index
    %c0_45 = arith.constant 0 : index
    %73 = vector.load %arg8[%c0_44, %c0_45] : memref<24x33xbf16, #tpu.memory_space<vmem>>, vector<24x33xbf16>
    %cst_46 = arith.constant dense<0.000000e+00> : vector<512x33xf32>
    %74 = tpu.matmul %3, %73, %cst_46 {dimension_numbers = #tpu.dot_dimension_numbers<[1], [0], [0], [1], [0, 0, 1, 1], [], []>} : vector<512x24xbf16>, vector<24x33xbf16>, vector<512x33xf32> -> vector<512x33xf32>
    %75 = arith.addf %72, %74 : vector<512x33xf32>
    %c0_47 = arith.constant 0 : index
    %c0_48 = arith.constant 0 : index
    %76 = vector.load %arg10[%c0_47, %c0_48] : memref<1x33xf32, #tpu.memory_space<vmem>>, vector<1x33xf32>
    %77 = vector.broadcast %76 : vector<1x33xf32> to vector<512x33xf32>
    %78 = arith.addf %75, %77 : vector<512x33xf32>
    %79 = tpu.iota {dimensions = array<i32: 1>} : vector<512x33xi32>
    %c32_i32 = arith.constant 32 : i32
    %80 = vector.broadcast %c32_i32 : i32 to vector<512x33xi32>
    %81 = arith.cmpi slt, %79, %80 : vector<512x33xi32>
    %cst_49 = arith.constant 0.000000e+00 : f32
    %82 = vector.broadcast %cst_49 : f32 to vector<512x33xf32>
    %83 = arith.maximumf %78, %82 : vector<512x33xf32>
    %84 = arith.select %81, %83, %78 : vector<512x33xi1>, vector<512x33xf32>
    %85 = arith.truncf %84 : vector<512x33xf32> to vector<512x33xbf16>
    %c0_50 = arith.constant 0 : index
    %c0_51 = arith.constant 0 : index
    %86 = vector.load %arg11[%c0_50, %c0_51] : memref<33x4xbf16, #tpu.memory_space<vmem>>, vector<33x4xbf16>
    %cst_52 = arith.constant dense<0.000000e+00> : vector<512x4xf32>
    %87 = tpu.matmul %85, %86, %cst_52 {dimension_numbers = #tpu.dot_dimension_numbers<[1], [0], [0], [1], [0, 0, 1, 1], [], []>} : vector<512x33xbf16>, vector<33x4xbf16>, vector<512x4xf32> -> vector<512x4xf32>
    %c0_53 = arith.constant 0 : index
    %c0_54 = arith.constant 0 : index
    %88 = vector.load %arg12[%c0_53, %c0_54] : memref<1x4xf32, #tpu.memory_space<vmem>>, vector<1x4xf32>
    %89 = vector.broadcast %88 : vector<1x4xf32> to vector<512x4xf32>
    %90 = arith.addf %87, %89 : vector<512x4xf32>
    %c0_55 = arith.constant 0 : index
    %c0_56 = arith.constant 0 : index
    %91 = vector.load %arg13[%c0_55, %c0_56] : memref<512x4xf32, #tpu.memory_space<vmem>>, vector<512x4xf32>
    tpu.vector_store %arg13[%c0_55, %c0_56], %90 {strides = array<i32>} : memref<512x4xf32, #tpu.memory_space<vmem>>, vector<512x4xf32>,
    return
  }
  func.func @transform_0(%arg0: i32) -> (i32, i32) {
    %c0_i32 = arith.constant 0 : i32
    %c0_i32_0 = arith.constant 0 : i32
    return %arg0, %c0_i32 : i32, i32
  }
  func.func @transform_1(%arg0: i32) -> (i32, i32) {
    %c0_i32 = arith.constant 0 : i32
    %c0_i32_0 = arith.constant 0 : i32
    return %arg0, %c0_i32 : i32, i32
  }
  func.func @transform_2(%arg0: i32) -> (i32, i32) {
    %c0_i32 = arith.constant 0 : i32
    %c0_i32_0 = arith.constant 0 : i32
    %c0_i32_1 = arith.constant 0 : i32
    return %c0_i32, %c0_i32_0 : i32, i32
  }
  func.func @transform_3(%arg0: i32) -> (i32, i32) {
    %c0_i32 = arith.constant 0 : i32
    %c0_i32_0 = arith.constant 0 : i32
    %c0_i32_1 = arith.constant 0 : i32
    return %c0_i32, %c0_i32_0 : i32, i32
  }
  func.func @transform_4(%arg0: i32) -> (i32, i32) {
    %c0_i32 = arith.constant 0 : i32
    %c0_i32_0 = arith.constant 0 : i32
    %c0_i32_1 = arith.constant 0 : i32
    return %c0_i32, %c0_i32_0 : i32, i32
  }
  func.func @transform_5(%arg0: i32) -> (i32, i32) {
    %c0_i32 = arith.constant 0 : i32
    %c0_i32_0 = arith.constant 0 : i32
    %c0_i32_1 = arith.constant 0 : i32
    return %c0_i32, %c0_i32_0 : i32, i32
  }
  func.func @transform_6(%arg0: i32) -> (i32, i32) {
    %c0_i32 = arith.constant 0 : i32
    %c0_i32_0 = arith.constant 0 : i32
    %c0_i32_1 = arith.constant 0 : i32
    return %c0_i32, %c0_i32_0 : i32, i32
  }
  func.func @transform_7(%arg0: i32) -> (i32, i32) {
    %c0_i32 = arith.constant 0 : i32
    %c0_i32_0 = arith.constant 0 : i32
    %c0_i32_1 = arith.constant 0 : i32
    return %c0_i32, %c0_i32_0 : i32, i32
  }
  func.func @transform_8(%arg0: i32) -> (i32, i32) {
    %c0_i32 = arith.constant 0 : i32
    %c0_i32_0 = arith.constant 0 : i32
    %c0_i32_1 = arith.constant 0 : i32
    return %c0_i32, %c0_i32_0 : i32, i32
  }
  func.func @transform_9(%arg0: i32) -> (i32, i32) {
    %c0_i32 = arith.constant 0 : i32
    %c0_i32_0 = arith.constant 0 : i32
    %c0_i32_1 = arith.constant 0 : i32
    return %c0_i32, %c0_i32_0 : i32, i32
  }
  func.func @transform_10(%arg0: i32) -> (i32, i32) {
    %c0_i32 = arith.constant 0 : i32
    %c0_i32_0 = arith.constant 0 : i32
    %c0_i32_1 = arith.constant 0 : i32
    return %c0_i32, %c0_i32_0 : i32, i32
  }
  func.func @transform_11(%arg0: i32) -> (i32, i32) {
    %c0_i32 = arith.constant 0 : i32
    %c0_i32_0 = arith.constant 0 : i32
    %c0_i32_1 = arith.constant 0 : i32
    return %c0_i32, %c0_i32_0 : i32, i32
  }
  func.func @transform_12(%arg0: i32) -> (i32, i32) {
    %c0_i32 = arith.constant 0 : i32
    %c0_i32_0 = arith.constant 0 : i32
    return %arg0, %c0_i32 : i32, i32
  }
}

</mosaic_0001>

<bundles_post_ra>
// kernel: tpu_custom_call.1
= control target key start
LH: loop header
LB: loop body
LE: loop exit
PB: predicated region body
PF: predicated region fallthrough
CT: control target
= control target key end

     0   :  { %s11535_s0 = inlined_call_operand.vmem [shape: f32[1000,48], index: 0, kind: input, shape index: {}]   ;;  %s11536_s1 = inlined_call_operand.vmem [shape: f32[1000,24], index: 1, kind: input, shape index: {}]   ;;  %s11537_s2 = inlined_call_operand.vmem [shape: bf16[48,64], index: 2, kind: input, shape index: {}]   ;;  %s11538_s3 = inlined_call_operand.vmem [shape: bf16[384,64], index: 3, kind: input, shape index: {}]   ;;  %s11539_s4 = inlined_call_operand.vmem [shape: bf16[64,64], index: 4, kind: input, shape index: {}]   ;;  %s11540_s5 = inlined_call_operand.vmem [shape: bf16[48,64], index: 5, kind: input, shape index: {}]   ;;  %s11541_s6 = inlined_call_operand.vmem [shape: bf16[64,33], index: 6, kind: input, shape index: {}]   ;;  %s11542_s7 = inlined_call_operand.vmem [shape: bf16[24,33], index: 7, kind: input, shape index: {}]   ;;  %s11543_s8 = inlined_call_operand.vmem [shape: f32[8,64], index: 8, kind: input, shape index: {}]   ;;  %s11544_s9 = inlined_call_operand.vmem [shape: f32[1,33], index: 9, kind: input, shape index: {}]   ;;  %s11545_s10 = inlined_call_operand.vmem [shape: bf16[33,4], index: 10, kind: input, shape index: {}]   ;;  %s11546_s11 = inlined_call_operand.vmem [shape: f32[1,4], index: 11, kind: input, shape index: {}]   ;;  %s11547_s12 = inlined_call_operand.vmem [shape: f32[1000,4], index: 12, kind: output, shape index: {}]  }
   0x1   :  { %11548 = sst [smem:[#allocation3_spill]] %s11535_s0 }
   0x2   :  { %s9236_s21 = smov 0   ;;  %s9238_s22 = smov 0  }
   0x3   :  { %s9240_s23 = smov 0  }
   0x4 LB: > { %s9249_s24 = sadd.s32 4294967295, %s9136_s23   ;;  %s9251_s25 = sadd.s32 1, %s9136_s23   ;;  %s9136_s23 = sphi %s9240_s23, %s11558_s23   ;;  %s9132_s22 = sphi %s9238_s22, %s11557_s22   ;;  %s9128_s21 = sphi %s9236_s21, %s11556_s21  }
   0x5   : > { %s288_s26 = ssub.s32 %s9136_s23, %s9251_s25  ;;  %s291_s27 = sadd.s32 1, %s9132_s22 }
   0x6   : > { %p289_p0 = scmp.eq.s32.totalorder %s288_s26, 0  ;;  %p301_p1 = scmp.ne.s32.totalorder %s9132_s22, %s9128_s21 }
   0x7   : > { %p302_p2 = scmp.eq.s32.totalorder %s9249_s24, 1  ;;  %p7205_p3 = scmp.ge.s32.totalorder %s9136_s23, 1 }
   0x8   : > { %s9259_s28 = scalar_select %p289_p0, %s9132_s22, %s291_s27  }
   0x9   : > { %p9261_p4 = por %p302_p2, %p301_p1  ;;  %p390_p5 = scmp.lt.s32.totalorder %s9136_s23, 3 }
   0xb   : > { %p391_p6 = pnand %p7205_p3, %p390_p5 }
   0xc   : > { %s9269_s14 = sshll.u32 (!%p391_p6), %s9249_s24, 6  ;;  %s11550_s0 = sld [smem:[#allocation3_spill]] (!%p391_p6) }
   0xd   : > { %394 = sbr.rel (%p391_p6) target bundleno = 2276 (0x8e4), region = 68  ;;  %p449_p7 = scmp.lt.s32.totalorder (!%p391_p6), %s9269_s14, 124 }
  0x12   : > { %v9039_v0 = vld [vmem:[%s11537_s2 + $0x10] sm:$0xff]   ;;  %v9040_v1 = vld [vmem:[%s11537_s2 + $0x8] sm:$0xff]   ;;  %v9041_v2 = vld [vmem:[%s11537_s2] sm:$0xff]   ;;  %s9279_s19 = scalar_select %p449_p7, %s9269_s14, 124  ;;  %vm699_vm0 = vcmask 392192   ;;  %vm1218_vm1 = vcmask 523264  }
  0x13   : > { %8095 = vmatprep.subr.bf16.mxu0 %v9039_v0  ;;  %v9042_v3 = vld [vmem:[%s11538_s3 + $0x18] sm:$0xff]   ;;  %v9043_v61 = vld [vmem:[%s11538_s3 + $0x10] sm:$0xff]   ;;  %vm5302_vm2 = vcmask 1043456   ;;  %vm5205_vm3 = vcmask 195584   ;;  %vm6362_vm4 = vcmask 1040384   ;;  %vm6265_vm6 = vcmask 269312  }
  0x14   : > { %8096 = vmatpush3.bf16.msra.mxu0 %v9039_v0  ;;  %s7208_s20 = sshll.u32 %s9279_s19, 3  ;;  %8165 = vmatprep.subr.bf16.mxu1 %v9042_v3  ;;  %vm6657_vm7 = vcmask 31744  }
  0x15   : > { %8097 = vmatprep.subr.bf16.mxu0 %v9040_v1  ;;  %s9287_s27 = scalar_lea.vmem %s11550_s0, %s7208_s20  ;;  %8166 = vmatpush3.bf16.msra.mxu1 %v9042_v3  ;;  %v9044_v3 = vld [vmem:[%s11538_s3 + $0x8] sm:$0xff]   ;;  %s10488_s13 = scalar_lea.vmem %s11536_s1, %s7208_s20 }
  0x16   : > { %v478_v4 = vld [vmem:[%s9287_s27] sm:$0xff]  ;;  %v479_v5 = vld [vmem:[%s9287_s27 + $0x8] sm:$0xff]  ;;  %v480_v6 = vld [vmem:[%s9287_s27 + $0x10] sm:$0xff]  ;;  %8167 = vmatprep.subr.bf16.mxu1 %v9043_v61 }
  0x17   : > { %v9295_v7 = vpack.c.bf16 %v479_v5, %v478_v4  ;;  %v481_v8 = vld [vmem:[%s9287_s27 + $0x18] sm:$0xff]  ;;  %v482_v9 = vld [vmem:[%s9287_s27 + $0x20] sm:$0xff]  ;;  %v483_v10 = vld [vmem:[%s9287_s27 + $0x28] sm:$0xff] }
  0x18   : > { %8098 = vmatpush3.bf16.msra.mxu0 %v9040_v1  ;;  %v9302_v11 = vpack.c.bf16 %v481_v8, %v480_v6  ;;  %v9304_v12 = vpack.c.bf16 %v483_v10, %v482_v9  ;;  %v484_v13 = vld [vmem:[%s9287_s27 + $0x30] sm:$0xff]  ;;  %v485_v14 = vld [vmem:[%s9287_s27 + $0x38] sm:$0xff]  ;;  %v486_v15 = vld [vmem:[%s9287_s27 + $0x40] sm:$0xff] }
  0x19   : > { %8099 = vmatprep.subr.bf16.mxu0 %v9041_v2  ;;  %8101 = vmatprep.mubr.msk.bf16.mxu0 %vm699_vm0, %v9295_v7  ;;  %v487_v16 = vld [vmem:[%s9287_s27 + $0x48] sm:$0xff]  ;;  %v9314_v17 = vpack.c.bf16 %v485_v14, %v484_v13  ;;  %v488_v19 = vld [vmem:[%s9287_s27 + $0x50] sm:$0xff]  ;;  %v489_v20 = vld [vmem:[%s9287_s27 + $0x58] sm:$0xff] }
  0x1a   : > { %v9316_v18 = vpack.c.bf16 %v487_v16, %v486_v15  ;;  %v490_v21 = vld [vmem:[%s9287_s27 + $0x60] sm:$0xff]  ;;  %v491_v22 = vld [vmem:[%s9287_s27 + $0x68] sm:$0xff]  ;;  %v9326_v23 = vpack.c.bf16 %v489_v20, %v488_v19  ;;  %v492_v25 = vld [vmem:[%s9287_s27 + $0x70] sm:$0xff]  ;;  %8168 = vmatpush3.bf16.msra.mxu1 %v9043_v61 }
  0x1b   : > { %v9328_v24 = vpack.c.bf16 %v491_v22, %v490_v21  ;;  %v493_v26 = vld [vmem:[%s9287_s27 + $0x78] sm:$0xff]  ;;  %v494_v27 = vld [vmem:[%s9287_s27 + $0x80] sm:$0xff]  ;;  %v495_v28 = vld [vmem:[%s9287_s27 + $0x88] sm:$0xff]  ;;  %8169 = vmatprep.subr.bf16.mxu1 %v9044_v3 }
  0x1c   : > { %8100 = vmatpush3.bf16.msra.mxu0 %v9041_v2  ;;  %v9338_v29 = vpack.c.bf16 %v493_v26, %v492_v25  ;;  %v9340_v30 = vpack.c.bf16 %v495_v28, %v494_v27  ;;  %v496_v31 = vld [vmem:[%s9287_s27 + $0x90] sm:$0xff]  ;;  %v497_v32 = vld [vmem:[%s9287_s27 + $0x98] sm:$0xff]  ;;  %v498_v33 = vld [vmem:[%s9287_s27 + $0xa0] sm:$0xff] }
  0x1d   : > { %v499_v34 = vld [vmem:[%s9287_s27 + $0xa8] sm:$0xff]  ;;  %v9350_v35 = vpack.c.bf16 %v497_v32, %v496_v31  ;;  %v500_v37 = vld [vmem:[%s9287_s27 + $0xb0] sm:$0xff]  ;;  %v501_v38 = vld [vmem:[%s9287_s27 + $0xb8] sm:$0xff] }
  0x1e   : > { %v9352_v36 = vpack.c.bf16 %v499_v34, %v498_v33  ;;  %v502_v39 = vld [vmem:[%s9287_s27 + $0xc0] sm:$0xff]  ;;  %v503_v40 = vld [vmem:[%s9287_s27 + $0xc8] sm:$0xff]  ;;  %v9362_v41 = vpack.c.bf16 %v501_v38, %v500_v37  ;;  %v504_v43 = vld [vmem:[%s9287_s27 + $0xd0] sm:$0xff]  ;;  %8170 = vmatpush3.bf16.msra.mxu1 %v9044_v3 }
  0x1f   : > { %8102 = vmatmul.mubr.msk.bf16.vlgmr.msra.gmra.mxu0 %vm699_vm0, %v9302_v11  ;;  %v9364_v42 = vpack.c.bf16 %v503_v40, %v502_v39  ;;  %v505_v44 = vld [vmem:[%s9287_s27 + $0xd8] sm:$0xff]  ;;  %v506_v45 = vld [vmem:[%s9287_s27 + $0xe0] sm:$0xff]  ;;  %v507_v46 = vld [vmem:[%s9287_s27 + $0xe8] sm:$0xff] }
  0x20   : > { %8105 = vmatprep.mubr.msk.bf16.mxu0 %vm699_vm0, %v9304_v12  ;;  %v9374_v47 = vpack.c.bf16 %v505_v44, %v504_v43  ;;  %v9376_v48 = vpack.c.bf16 %v507_v46, %v506_v45  ;;  %v508_v49 = vld [vmem:[%s9287_s27 + $0xf0] sm:$0xff]  ;;  %v509_v50 = vld [vmem:[%s9287_s27 + $0xf8] sm:$0xff]  ;;  %v510_v51 = vld [vmem:[%s9287_s27 + $0x100] sm:$0xff] }
  0x21   : > { %v511_v52 = vld [vmem:[%s9287_s27 + $0x108] sm:$0xff]  ;;  %v9386_v53 = vpack.c.bf16 %v509_v50, %v508_v49  ;;  %v512_v55 = vld [vmem:[%s9287_s27 + $0x110] sm:$0xff]  ;;  %v513_v56 = vld [vmem:[%s9287_s27 + $0x118] sm:$0xff] }
  0x22   : > { %v9388_v54 = vpack.c.bf16 %v511_v52, %v510_v51  ;;  %v514_v57 = vld [vmem:[%s9287_s27 + $0x120] sm:$0xff]  ;;  %v515_v58 = vld [vmem:[%s9287_s27 + $0x128] sm:$0xff]  ;;  %v9398_v59 = vpack.c.bf16 %v513_v56, %v512_v55  ;;  %v516_v62 = vld [vmem:[%s9287_s27 + $0x130] sm:$0xff] }
  0x23   : > { %v9400_v60 = vpack.c.bf16 %v515_v58, %v514_v57  ;;  %v517_v63 = vld [vmem:[%s9287_s27 + $0x138] sm:$0xff]  ;;  %v518_v0 = vld [vmem:[%s9287_s27 + $0x140] sm:$0xff]  ;;  %v519_v1 = vld [vmem:[%s9287_s27 + $0x148] sm:$0xff] }
  0x24   : > { %v9413_v2 = vpack.c.bf16 %v517_v63, %v516_v62  ;;  %v9418_v4 = vpack.c.bf16 %v519_v1, %v518_v0  ;;  %v9045_v5 = vld [vmem:[%s11538_s3] sm:$0xff]   ;;  %v520_v6 = vld [vmem:[%s9287_s27 + $0x150] sm:$0xff]  ;;  %v521_v8 = vld [vmem:[%s9287_s27 + $0x158] sm:$0xff] }
  0x25   : > { %v522_v9 = vld [vmem:[%s9287_s27 + $0x160] sm:$0xff]  ;;  %v523_v10 = vld [vmem:[%s9287_s27 + $0x168] sm:$0xff]  ;;  %8171 = vmatprep.subr.bf16.mxu1 %v9045_v5  ;;  %v9431_v13 = vpack.c.bf16 %v521_v8, %v520_v6  ;;  %v524_v15 = vld [vmem:[%s9287_s27 + $0x170] sm:$0xff] }
  0x26   : > { %8172 = vmatpush3.bf16.msra.mxu1 %v9045_v5  ;;  %v9433_v14 = vpack.c.bf16 %v523_v10, %v522_v9  ;;  %v525_v16 = vld [vmem:[%s9287_s27 + $0x178] sm:$0xff]  ;;  %v526_v19 = vld [vmem:[%s9287_s27 + $0x180] sm:$0xff]  ;;  %v527_v20 = vld [vmem:[%s9287_s27 + $0x188] sm:$0xff] }
  0x27   : > { %8106 = vmatmul.mubr.msk.bf16.gmra.mxu0 %vm699_vm0, %v9314_v17  ;;  %v9443_v21 = vpack.c.bf16 %v525_v16, %v524_v15  ;;  %v9445_v22 = vpack.c.bf16 %v527_v20, %v526_v19  ;;  %v528_v25 = vld [vmem:[%s9287_s27 + $0x190] sm:$0xff]  ;;  %v529_v26 = vld [vmem:[%s9287_s27 + $0x198] sm:$0xff]  ;;  %v530_v27 = vld [vmem:[%s9287_s27 + $0x1a0] sm:$0xff] }
  0x28   : > { %8109 = vmatprep.mubr.msk.bf16.mxu0 %vm699_vm0, %v9316_v18  ;;  %v531_v28 = vld [vmem:[%s9287_s27 + $0x1a8] sm:$0xff]  ;;  %v9455_v31 = vpack.c.bf16 %v529_v26, %v528_v25  ;;  %v532_v33 = vld [vmem:[%s9287_s27 + $0x1b0] sm:$0xff]  ;;  %v533_v34 = vld [vmem:[%s9287_s27 + $0x1b8] sm:$0xff] }
  0x29   : > { %v9457_v32 = vpack.c.bf16 %v531_v28, %v530_v27  ;;  %v534_v37 = vld [vmem:[%s9287_s27 + $0x1c0] sm:$0xff]  ;;  %v535_v38 = vld [vmem:[%s9287_s27 + $0x1c8] sm:$0xff]  ;;  %v9467_v39 = vpack.c.bf16 %v533_v34, %v532_v33  ;;  %v536_v43 = vld [vmem:[%s9287_s27 + $0x1d0] sm:$0xff] }
  0x2a   : > { %v9469_v40 = vpack.c.bf16 %v535_v38, %v534_v37  ;;  %v537_v44 = vld [vmem:[%s9287_s27 + $0x1d8] sm:$0xff]  ;;  %v538_v45 = vld [vmem:[%s9287_s27 + $0x1e0] sm:$0xff]  ;;  %v539_v46 = vld [vmem:[%s9287_s27 + $0x1e8] sm:$0xff] }
  0x2b   : > { %v9479_v49 = vpack.c.bf16 %v537_v44, %v536_v43  ;;  %v9481_v50 = vpack.c.bf16 %v539_v46, %v538_v45  ;;  %v540_v51 = vld [vmem:[%s9287_s27 + $0x1f0] sm:$0xff]  ;;  %v541_v52 = vld [vmem:[%s9287_s27 + $0x1f8] sm:$0xff]  ;;  %v9502_v62 = vld [vmem:[%s11543_s8] ss:$0 sm:$0xff]  ;;  %s7665_s27 = sshll.u32 (%p9261_p4), %s9249_s24, 9 }
  0x2c   : > { %v9489_v55 = vpack.c.bf16 %v541_v52, %v540_v51  ;;  %v9046_v56 = vld [vmem:[%s11538_s3 + $0x38] sm:$0xff]   ;;  %v9047_v57 = vld [vmem:[%s11538_s3 + $0x30] sm:$0xff]   ;;  %v9048_v6 = vld [vmem:[%s11538_s3 + $0x28] sm:$0xff]   ;;  %s11336_s23 = scalar_lea.vmem (%p9261_p4), %s11547_s12, %s7665_s27  }
  0x2d   : > { %8237 = vmatprep.subr.bf16.mxu0 %v9046_v56  ;;  %v9049_v8 = vld [vmem:[%s11538_s3 + $0x20] sm:$0xff]  }
  0x2e   : > { %8238 = vmatpush3.bf16.msra.mxu0 %v9046_v56 }
  0x2f   : > { %8110 = vmatmul.mubr.msk.bf16.gmra.mxu0 %vm699_vm0, %v9326_v23  ;;  %8239 = vmatprep.subr.bf16.mxu0 %v9047_v57 }
  0x30   : > { %8113 = vmatprep.mubr.msk.bf16.mxu0 %vm699_vm0, %v9328_v24 }
  0x32   : > { %8240 = vmatpush3.bf16.msra.mxu0 %v9047_v57 }
  0x33   : > { %8241 = vmatprep.subr.bf16.mxu0 %v9048_v6 }
  0x36   : > { %8242 = vmatpush3.bf16.msra.mxu0 %v9048_v6 }
  0x37   : > { %8114 = vmatmul.mubr.msk.bf16.gmra.mxu0 %vm699_vm0, %v9338_v29  ;;  %8243 = vmatprep.subr.bf16.mxu0 %v9049_v8 }
  0x38   : > { %8117 = vmatprep.mubr.msk.bf16.mxu0 %vm699_vm0, %v9340_v30 }
  0x3a   : > { %8244 = vmatpush3.bf16.msra.mxu0 %v9049_v8 }
  0x3f   : > { %8118 = vmatmul.mubr.msk.bf16.gmra.mxu0 %vm699_vm0, %v9350_v35 }
  0x40   : > { %8121 = vmatprep.mubr.msk.bf16.mxu0 %vm699_vm0, %v9352_v36 }
  0x47   : > { %8122 = vmatmul.mubr.msk.bf16.gmra.mxu0 %vm699_vm0, %v9362_v41 }
  0x48   : > { %8125 = vmatprep.mubr.msk.bf16.mxu0 %vm699_vm0, %v9364_v42 }
  0x4f   : > { %8126 = vmatmul.mubr.msk.bf16.gmra.mxu0 %vm699_vm0, %v9374_v47 }
  0x50   : > { %8129 = vmatprep.mubr.msk.bf16.mxu0 %vm699_vm0, %v9376_v48 }
  0x57   : > { %8130 = vmatmul.mubr.msk.bf16.gmra.mxu0 %vm699_vm0, %v9386_v53 }
  0x58   : > { %8133 = vmatprep.mubr.msk.bf16.mxu0 %vm699_vm0, %v9388_v54 }
  0x5f   : > { %8134 = vmatmul.mubr.msk.bf16.gmra.mxu0 %vm699_vm0, %v9398_v59 }
  0x60   : > { %8137 = vmatprep.mubr.msk.bf16.mxu0 %vm699_vm0, %v9400_v60 }
  0x67   : > { %8138 = vmatmul.mubr.msk.bf16.gmra.mxu0 %vm699_vm0, %v9413_v2 }
  0x68   : > { %8141 = vmatprep.mubr.msk.bf16.mxu0 %vm699_vm0, %v9418_v4 }
  0x6f   : > { %8142 = vmatmul.mubr.msk.bf16.gmra.mxu0 %vm699_vm0, %v9431_v13 }
  0x70   : > { %8145 = vmatprep.mubr.msk.bf16.mxu0 %vm699_vm0, %v9433_v14 }
  0x77   : > { %8146 = vmatmul.mubr.msk.bf16.gmra.mxu0 %vm699_vm0, %v9443_v21 }
  0x78   : > { %8149 = vmatprep.mubr.msk.bf16.mxu0 %vm699_vm0, %v9445_v22 }
  0x7f   : > { %8150 = vmatmul.mubr.msk.bf16.gmra.mxu0 %vm699_vm0, %v9455_v31 }
  0x80   : > { %8153 = vmatprep.mubr.msk.bf16.mxu0 %vm699_vm0, %v9457_v32 }
  0x87   : > { %8154 = vmatmul.mubr.msk.bf16.gmra.mxu0 %vm699_vm0, %v9467_v39 }
  0x88   : > { %8157 = vmatprep.mubr.msk.bf16.mxu0 %vm699_vm0, %v9469_v40 }
  0x8f   : > { %8158 = vmatmul.mubr.msk.bf16.gmra.mxu0 %vm699_vm0, %v9479_v49 }
  0x90   : > { %8161 = vmatprep.mubr.msk.bf16.mxu0 %vm699_vm0, %v9481_v50 }
  0x97   : > { %8162 = vmatmul.mubr.msk.bf16.gmra.mxu0 %vm699_vm0, %v9489_v55 }
  0xdf   : > { %v8103_v58 = vpop.f32.mrf.mxu0 }
  0xe0   : > { %v839_v3 = vadd.f32 %v8103_v58, %v9502_v62 }
  0xe1   : > { %v830_v61 = vpop.f32.mrf.mxu0 }
  0xe2   : > { %v831_v0 = vadd.f32 %v9502_v62, %v830_v61  ;;  %v1087_v20 = vmax.f32 %v839_v3, 0.0 }
  0xe3   : > { %v8104_v63 = vpop.f32.mrf.mxu0 }
  0xe4   : > { %v842_v1 = vadd.f32 %v8104_v63, %v9502_v62  ;;  %v1085_v16 = vmax.f32 %v831_v0, 0.0 }
  0xe5   : > { %v833_v5 = vpop.f32.mrf.mxu0 }
  0xe6   : > { %v834_v9 = vadd.f32 %v9502_v62, %v833_v5  ;;  %v1088_v10 = vmax.f32 %v842_v1, 0.0 }
  0xe7   : > { %v8107_v15 = vpop.f32.mrf.mxu0 }
  0xe8   : > { %v1086_v19 = vmax.f32 %v834_v9, 0.0  ;;  %v1150_v27 = vpack.c.bf16 %v1088_v10, %v1087_v20  ;;  %v855_v37 = vadd.f32 %v8107_v15, %v9502_v62 }
  0xe9   : > { %v846_v25 = vpop.f32.mrf.mxu0 }
  0xea   : > { %v1149_v26 = vpack.c.bf16 %v1086_v19, %v1085_v16  ;;  %v847_v33 = vadd.f32 %v9502_v62, %v846_v25  ;;  %v1091_v52 = vmax.f32 %v855_v37, 0.0 }
  0xeb   : > { %v8108_v28 = vpop.f32.mrf.mxu0 }
  0xec   : > { %v858_v34 = vadd.f32 %v8108_v28, %v9502_v62  ;;  %8173 = vmatprep.mubr.msk.bf16.mxu1 %vm1218_vm1, %v1149_v26  ;;  %v1089_v46 = vmax.f32 %v847_v33, 0.0 }
  0xed   : > { %v849_v38 = vpop.f32.mrf.mxu0  ;;  %8174 = vmatmul.mubr.msk.bf16.vlgmr.msra.gmra.mxu1 %vm1218_vm1, %v1150_v27 }
  0xee   : > { %v850_v43 = vadd.f32 %v9502_v62, %v849_v38  ;;  %v1092_v44 = vmax.f32 %v858_v34, 0.0 }
  0xef   : > { %v8111_v45 = vpop.f32.mrf.mxu0 }
  0xf0   : > { %v1090_v51 = vmax.f32 %v850_v43, 0.0  ;;  %v1152_v58 = vpack.c.bf16 %v1092_v44, %v1091_v52  ;;  %v871_v1 = vadd.f32 %v8111_v45, %v9502_v62 }
  0xf1   : > { %v862_v56 = vpop.f32.mrf.mxu0 }
  0xf2   : > { %v1151_v57 = vpack.c.bf16 %v1090_v51, %v1089_v46  ;;  %v863_v63 = vadd.f32 %v9502_v62, %v862_v56  ;;  %v1095_v15 = vmax.f32 %v871_v1, 0.0 }
  0xf3   : > { %v8112_v61 = vpop.f32.mrf.mxu0 }
  0xf4   : > { %v874_v0 = vadd.f32 %v8112_v61, %v9502_v62  ;;  %8177 = vmatprep.mubr.msk.bf16.mxu1 %vm1218_vm1, %v1151_v57  ;;  %v1093_v9 = vmax.f32 %v863_v63, 0.0 }
  0xf5   : > { %v865_v3 = vpop.f32.mrf.mxu0  ;;  %8178 = vmatmul.mubr.msk.bf16.gmra.mxu1 %vm1218_vm1, %v1152_v58 }
  0xf6   : > { %v866_v5 = vadd.f32 %v9502_v62, %v865_v3  ;;  %v1096_v6 = vmax.f32 %v874_v0, 0.0 }
  0xf7   : > { %v8115_v8 = vpop.f32.mrf.mxu0 }
  0xf8   : > { %v1094_v10 = vmax.f32 %v866_v5, 0.0  ;;  %v1154_v20 = vpack.c.bf16 %v1096_v6, %v1095_v15  ;;  %v887_v28 = vadd.f32 %v8115_v8, %v9502_v62 }
  0xf9   : > { %v878_v16 = vpop.f32.mrf.mxu0 }
  0xfa   : > { %v1153_v19 = vpack.c.bf16 %v1094_v10, %v1093_v9  ;;  %v879_v26 = vadd.f32 %v9502_v62, %v878_v16  ;;  %v1099_v45 = vmax.f32 %v887_v28, 0.0 }
  0xfb   : > { %v8116_v25 = vpop.f32.mrf.mxu0 }
  0xfc   : > { %v890_v27 = vadd.f32 %v8116_v25, %v9502_v62  ;;  %8181 = vmatprep.mubr.msk.bf16.mxu1 %vm1218_vm1, %v1153_v19  ;;  %v1097_v43 = vmax.f32 %v879_v26, 0.0 }
  0xfd   : > { %v881_v33 = vpop.f32.mrf.mxu0  ;;  %8182 = vmatmul.mubr.msk.bf16.gmra.mxu1 %vm1218_vm1, %v1154_v20 }
  0xfe   : > { %v882_v34 = vadd.f32 %v9502_v62, %v881_v33  ;;  %v1100_v37 = vmax.f32 %v890_v27, 0.0 }
  0xff   : > { %v8119_v38 = vpop.f32.mrf.mxu0 }
 0x100   : > { %v1098_v44 = vmax.f32 %v882_v34, 0.0  ;;  %v1156_v52 = vpack.c.bf16 %v1100_v37, %v1099_v45  ;;  %v903_v61 = vadd.f32 %v8119_v38, %v9502_v62 }
 0x101   : > { %v894_v46 = vpop.f32.mrf.mxu0 }
 0x102   : > { %v1155_v51 = vpack.c.bf16 %v1098_v44, %v1097_v43  ;;  %v895_v57 = vadd.f32 %v9502_v62, %v894_v46  ;;  %v1103_v8 = vmax.f32 %v903_v61, 0.0 }
 0x103   : > { %v8120_v56 = vpop.f32.mrf.mxu0 }
 0x104   : > { %v906_v58 = vadd.f32 %v8120_v56, %v9502_v62  ;;  %8185 = vmatprep.mubr.msk.bf16.mxu1 %vm1218_vm1, %v1155_v51  ;;  %v1101_v5 = vmax.f32 %v895_v57, 0.0 }
 0x105   : > { %v897_v63 = vpop.f32.mrf.mxu0  ;;  %8186 = vmatmul.mubr.msk.bf16.gmra.mxu1 %vm1218_vm1, %v1156_v52 }
 0x106   : > { %v898_v0 = vadd.f32 %v9502_v62, %v897_v63  ;;  %v1104_v1 = vmax.f32 %v906_v58, 0.0 }
 0x107   : > { %v8123_v3 = vpop.f32.mrf.mxu0 }
 0x108   : > { %v1102_v6 = vmax.f32 %v898_v0, 0.0  ;;  %v1158_v15 = vpack.c.bf16 %v1104_v1, %v1103_v8  ;;  %v919_v25 = vadd.f32 %v8123_v3, %v9502_v62 }
 0x109   : > { %v910_v9 = vpop.f32.mrf.mxu0 }
 0x10a   : > { %v1157_v10 = vpack.c.bf16 %v1102_v6, %v1101_v5  ;;  %v911_v19 = vadd.f32 %v9502_v62, %v910_v9  ;;  %v1107_v38 = vmax.f32 %v919_v25, 0.0 }
 0x10b   : > { %v8124_v16 = vpop.f32.mrf.mxu0 }
 0x10c   : > { %v922_v20 = vadd.f32 %v8124_v16, %v9502_v62  ;;  %8189 = vmatprep.mubr.msk.bf16.mxu1 %vm1218_vm1, %v1157_v10  ;;  %v1105_v34 = vmax.f32 %v911_v19, 0.0 }
 0x10d   : > { %v913_v26 = vpop.f32.mrf.mxu0  ;;  %8190 = vmatmul.mubr.msk.bf16.gmra.mxu1 %vm1218_vm1, %v1158_v15 }
 0x10e   : > { %v914_v27 = vadd.f32 %v9502_v62, %v913_v26  ;;  %v1108_v28 = vmax.f32 %v922_v20, 0.0 }
 0x10f   : > { %v8127_v33 = vpop.f32.mrf.mxu0 }
 0x110   : > { %v1106_v37 = vmax.f32 %v914_v27, 0.0  ;;  %v1160_v45 = vpack.c.bf16 %v1108_v28, %v1107_v38  ;;  %v935_v56 = vadd.f32 %v8127_v33, %v9502_v62 }
 0x111   : > { %v926_v43 = vpop.f32.mrf.mxu0 }
 0x112   : > { %v1159_v44 = vpack.c.bf16 %v1106_v37, %v1105_v34  ;;  %v927_v51 = vadd.f32 %v9502_v62, %v926_v43  ;;  %v1111_v3 = vmax.f32 %v935_v56, 0.0 }
 0x113   : > { %v8128_v46 = vpop.f32.mrf.mxu0 }
 0x114   : > { %v938_v52 = vadd.f32 %v8128_v46, %v9502_v62  ;;  %8193 = vmatprep.mubr.msk.bf16.mxu1 %vm1218_vm1, %v1159_v44  ;;  %v1109_v0 = vmax.f32 %v927_v51, 0.0 }
 0x115   : > { %v929_v57 = vpop.f32.mrf.mxu0  ;;  %8194 = vmatmul.mubr.msk.bf16.gmra.mxu1 %vm1218_vm1, %v1160_v45 }
 0x116   : > { %v930_v58 = vadd.f32 %v9502_v62, %v929_v57  ;;  %v1112_v61 = vmax.f32 %v938_v52, 0.0 }
 0x117   : > { %v8131_v63 = vpop.f32.mrf.mxu0 }
 0x118   : > { %v1110_v1 = vmax.f32 %v930_v58, 0.0  ;;  %v1162_v8 = vpack.c.bf16 %v1112_v61, %v1111_v3  ;;  %v951_v16 = vadd.f32 %v8131_v63, %v9502_v62 }
 0x119   : > { %v942_v5 = vpop.f32.mrf.mxu0 }
 0x11a   : > { %v1161_v6 = vpack.c.bf16 %v1110_v1, %v1109_v0  ;;  %v943_v10 = vadd.f32 %v9502_v62, %v942_v5  ;;  %v1115_v33 = vmax.f32 %v951_v16, 0.0 }
 0x11b   : > { %v8132_v9 = vpop.f32.mrf.mxu0 }
 0x11c   : > { %v954_v15 = vadd.f32 %v8132_v9, %v9502_v62  ;;  %8197 = vmatprep.mubr.msk.bf16.mxu1 %vm1218_vm1, %v1161_v6  ;;  %v1113_v27 = vmax.f32 %v943_v10, 0.0 }
 0x11d   : > { %v945_v19 = vpop.f32.mrf.mxu0  ;;  %8198 = vmatmul.mubr.msk.bf16.gmra.mxu1 %vm1218_vm1, %v1162_v8 }
 0x11e   : > { %v946_v20 = vadd.f32 %v9502_v62, %v945_v19  ;;  %v1116_v25 = vmax.f32 %v954_v15, 0.0 }
 0x11f   : > { %v8135_v26 = vpop.f32.mrf.mxu0 }
 0x120   : > { %v1114_v28 = vmax.f32 %v946_v20, 0.0  ;;  %v1164_v38 = vpack.c.bf16 %v1116_v25, %v1115_v33  ;;  %v967_v46 = vadd.f32 %v8135_v26, %v9502_v62 }
 0x121   : > { %v958_v34 = vpop.f32.mrf.mxu0 }
 0x122   : > { %v1163_v37 = vpack.c.bf16 %v1114_v28, %v1113_v27  ;;  %v959_v44 = vadd.f32 %v9502_v62, %v958_v34  ;;  %v1119_v63 = vmax.f32 %v967_v46, 0.0 }
 0x123   : > { %v8136_v43 = vpop.f32.mrf.mxu0 }
 0x124   : > { %v970_v45 = vadd.f32 %v8136_v43, %v9502_v62  ;;  %8201 = vmatprep.mubr.msk.bf16.mxu1 %vm1218_vm1, %v1163_v37  ;;  %v1117_v58 = vmax.f32 %v959_v44, 0.0 }
 0x125   : > { %v961_v51 = vpop.f32.mrf.mxu0  ;;  %8202 = vmatmul.mubr.msk.bf16.gmra.mxu1 %vm1218_vm1, %v1164_v38 }
 0x126   : > { %v962_v52 = vadd.f32 %v9502_v62, %v961_v51  ;;  %v1120_v56 = vmax.f32 %v970_v45, 0.0 }
 0x127   : > { %v8139_v57 = vpop.f32.mrf.mxu0 }
 0x128   : > { %v1118_v61 = vmax.f32 %v962_v52, 0.0  ;;  %v1166_v3 = vpack.c.bf16 %v1120_v56, %v1119_v63  ;;  %v983_v9 = vadd.f32 %v8139_v57, %v9502_v62 }
 0x129   : > { %v974_v0 = vpop.f32.mrf.mxu0 }
 0x12a   : > { %v1165_v1 = vpack.c.bf16 %v1118_v61, %v1117_v58  ;;  %v975_v6 = vadd.f32 %v9502_v62, %v974_v0  ;;  %v1123_v26 = vmax.f32 %v983_v9, 0.0 }
 0x12b   : > { %v8140_v5 = vpop.f32.mrf.mxu0 }
 0x12c   : > { %v986_v8 = vadd.f32 %v8140_v5, %v9502_v62  ;;  %8205 = vmatprep.mubr.msk.bf16.mxu1 %vm1218_vm1, %v1165_v1  ;;  %v1121_v20 = vmax.f32 %v975_v6, 0.0 }
 0x12d   : > { %v977_v10 = vpop.f32.mrf.mxu0  ;;  %8206 = vmatmul.mubr.msk.bf16.gmra.mxu1 %vm1218_vm1, %v1166_v3 }
 0x12e   : > { %v978_v15 = vadd.f32 %v9502_v62, %v977_v10  ;;  %v1124_v16 = vmax.f32 %v986_v8, 0.0 }
 0x12f   : > { %v8143_v19 = vpop.f32.mrf.mxu0 }
 0x130   : > { %v1122_v25 = vmax.f32 %v978_v15, 0.0  ;;  %v1168_v33 = vpack.c.bf16 %v1124_v16, %v1123_v26  ;;  %v999_v43 = vadd.f32 %v8143_v19, %v9502_v62 }
 0x131   : > { %v990_v27 = vpop.f32.mrf.mxu0 }
 0x132   : > { %v1167_v28 = vpack.c.bf16 %v1122_v25, %v1121_v20  ;;  %v991_v37 = vadd.f32 %v9502_v62, %v990_v27  ;;  %v1127_v57 = vmax.f32 %v999_v43, 0.0 }
 0x133   : > { %v8144_v34 = vpop.f32.mrf.mxu0 }
 0x134   : > { %v1002_v38 = vadd.f32 %v8144_v34, %v9502_v62  ;;  %8209 = vmatprep.mubr.msk.bf16.mxu1 %vm1218_vm1, %v1167_v28  ;;  %v1125_v52 = vmax.f32 %v991_v37, 0.0 }
 0x135   : > { %v993_v44 = vpop.f32.mrf.mxu0  ;;  %8210 = vmatmul.mubr.msk.bf16.gmra.mxu1 %vm1218_vm1, %v1168_v33 }
 0x136   : > { %v994_v45 = vadd.f32 %v9502_v62, %v993_v44  ;;  %v1128_v46 = vmax.f32 %v1002_v38, 0.0 }
 0x137   : > { %v8147_v51 = vpop.f32.mrf.mxu0 }
 0x138   : > { %v1126_v56 = vmax.f32 %v994_v45, 0.0  ;;  %v1170_v63 = vpack.c.bf16 %v1128_v46, %v1127_v57  ;;  %v1015_v5 = vadd.f32 %v8147_v51, %v9502_v62 }
 0x139   : > { %v1006_v58 = vpop.f32.mrf.mxu0 }
 0x13a   : > { %v1169_v61 = vpack.c.bf16 %v1126_v56, %v1125_v52  ;;  %v1007_v1 = vadd.f32 %v9502_v62, %v1006_v58  ;;  %v1131_v19 = vmax.f32 %v1015_v5, 0.0 }
 0x13b   : > { %v8148_v0 = vpop.f32.mrf.mxu0 }
 0x13c   : > { %v1018_v3 = vadd.f32 %v8148_v0, %v9502_v62  ;;  %8213 = vmatprep.mubr.msk.bf16.mxu1 %vm1218_vm1, %v1169_v61  ;;  %v1129_v15 = vmax.f32 %v1007_v1, 0.0 }
 0x13d   : > { %v1009_v6 = vpop.f32.mrf.mxu0  ;;  %8214 = vmatmul.mubr.msk.bf16.gmra.mxu1 %vm1218_vm1, %v1170_v63 }
 0x13e   : > { %v1010_v8 = vadd.f32 %v9502_v62, %v1009_v6  ;;  %v1132_v9 = vmax.f32 %v1018_v3, 0.0 }
 0x13f   : > { %v8151_v10 = vpop.f32.mrf.mxu0 }
 0x140   : > { %v1130_v16 = vmax.f32 %v1010_v8, 0.0  ;;  %v1172_v26 = vpack.c.bf16 %v1132_v9, %v1131_v19  ;;  %v1031_v34 = vadd.f32 %v8151_v10, %v9502_v62 }
 0x141   : > { %v1022_v20 = vpop.f32.mrf.mxu0 }
 0x142   : > { %v1171_v25 = vpack.c.bf16 %v1130_v16, %v1129_v15  ;;  %v1023_v28 = vadd.f32 %v9502_v62, %v1022_v20  ;;  %v1135_v51 = vmax.f32 %v1031_v34, 0.0 }
 0x143   : > { %v8152_v27 = vpop.f32.mrf.mxu0 }
 0x144   : > { %v1034_v33 = vadd.f32 %v8152_v27, %v9502_v62  ;;  %8217 = vmatprep.mubr.msk.bf16.mxu1 %vm1218_vm1, %v1171_v25  ;;  %v1133_v45 = vmax.f32 %v1023_v28, 0.0 }
 0x145   : > { %v1025_v37 = vpop.f32.mrf.mxu0  ;;  %8218 = vmatmul.mubr.msk.bf16.gmra.mxu1 %vm1218_vm1, %v1172_v26 }
 0x146   : > { %v1026_v38 = vadd.f32 %v9502_v62, %v1025_v37  ;;  %v1136_v43 = vmax.f32 %v1034_v33, 0.0 }
 0x147   : > { %v8155_v44 = vpop.f32.mrf.mxu0 }
 0x148   : > { %v1134_v46 = vmax.f32 %v1026_v38, 0.0  ;;  %v1174_v57 = vpack.c.bf16 %v1136_v43, %v1135_v51  ;;  %v1047_v0 = vadd.f32 %v8155_v44, %v9502_v62 }
 0x149   : > { %v1038_v52 = vpop.f32.mrf.mxu0 }
 0x14a   : > { %v1173_v56 = vpack.c.bf16 %v1134_v46, %v1133_v45  ;;  %v1039_v61 = vadd.f32 %v9502_v62, %v1038_v52  ;;  %v1139_v10 = vmax.f32 %v1047_v0, 0.0 }
 0x14b   : > { %v8156_v58 = vpop.f32.mrf.mxu0 }
 0x14c   : > { %v1050_v63 = vadd.f32 %v8156_v58, %v9502_v62  ;;  %8221 = vmatprep.mubr.msk.bf16.mxu1 %vm1218_vm1, %v1173_v56  ;;  %v1137_v8 = vmax.f32 %v1039_v61, 0.0 }
 0x14d   : > { %v1041_v1 = vpop.f32.mrf.mxu0  ;;  %8222 = vmatmul.mubr.msk.bf16.gmra.mxu1 %vm1218_vm1, %v1174_v57 }
 0x14e   : > { %v1042_v3 = vadd.f32 %v9502_v62, %v1041_v1  ;;  %v1140_v5 = vmax.f32 %v1050_v63, 0.0 }
 0x14f   : > { %v8159_v6 = vpop.f32.mrf.mxu0 }
 0x150   : > { %v1138_v9 = vmax.f32 %v1042_v3, 0.0  ;;  %v1176_v19 = vpack.c.bf16 %v1140_v5, %v1139_v10  ;;  %v1063_v27 = vadd.f32 %v8159_v6, %v9502_v62 }
 0x151   : > { %v1054_v15 = vpop.f32.mrf.mxu0 }
 0x152   : > { %v1175_v16 = vpack.c.bf16 %v1138_v9, %v1137_v8  ;;  %v1055_v25 = vadd.f32 %v9502_v62, %v1054_v15  ;;  %v1143_v44 = vmax.f32 %v1063_v27, 0.0  ;;  %v9050_v9 = vld [vmem:[%s11538_s3 + $0x58] sm:$0xff]  }
 0x153   : > { %v8160_v20 = vpop.f32.mrf.mxu0  ;;  %8309 = vmatprep.subr.bf16.mxu1 %v9050_v9 }
 0x154   : > { %v1066_v26 = vadd.f32 %v8160_v20, %v9502_v62  ;;  %8225 = vmatprep.mubr.msk.bf16.mxu1 %vm1218_vm1, %v1175_v16  ;;  %v1141_v38 = vmax.f32 %v1055_v25, 0.0  ;;  %8310 = vmatpush3.bf16.msra.mxu1 %v9050_v9  ;;  %v9615_v16 = vld [vmem:[%s11543_s8 + $0x1] ss:$0 sm:$0xff] }
 0x155   : > { %v1057_v28 = vpop.f32.mrf.mxu0  ;;  %8226 = vmatmul.mubr.msk.bf16.gmra.mxu1 %vm1218_vm1, %v1176_v19 }
 0x156   : > { %v1058_v33 = vadd.f32 %v9502_v62, %v1057_v28  ;;  %v1144_v34 = vmax.f32 %v1066_v26, 0.0  ;;  %v9052_v28 = vld [vmem:[%s11538_s3 + $0x48] sm:$0xff]  }
 0x157   : > { %v8163_v37 = vpop.f32.mrf.mxu0 }
 0x158   : > { %v1142_v43 = vmax.f32 %v1058_v33, 0.0  ;;  %v1178_v51 = vpack.c.bf16 %v1144_v34, %v1143_v44  ;;  %v1079_v58 = vadd.f32 %v8163_v37, %v9502_v62  ;;  %v9053_v33 = vld [vmem:[%s11538_s3 + $0x40] sm:$0xff]  }
 0x159   : > { %v1070_v45 = vpop.f32.mrf.mxu0 }
 0x15a   : > { %v1177_v46 = vpack.c.bf16 %v1142_v43, %v1141_v38  ;;  %v1071_v56 = vadd.f32 %v9502_v62, %v1070_v45  ;;  %v1147_v5 = vmax.f32 %v1079_v58, 0.0 }
 0x15b   : > { %v8164_v52 = vpop.f32.mrf.mxu0 }
 0x15c   : > { %v1082_v57 = vadd.f32 %v8164_v52, %v9502_v62  ;;  %8229 = vmatprep.mubr.msk.bf16.mxu1 %vm1218_vm1, %v1177_v46  ;;  %v1145_v1 = vmax.f32 %v1071_v56, 0.0 }
 0x15d   : > { %v1073_v61 = vpop.f32.mrf.mxu0  ;;  %8230 = vmatmul.mubr.msk.bf16.gmra.mxu1 %vm1218_vm1, %v1178_v51 }
 0x15e   : > { %v1074_v63 = vadd.f32 %v9502_v62, %v1073_v61  ;;  %v1148_v0 = vmax.f32 %v1082_v57, 0.0  ;;  %v9051_v62 = vld [vmem:[%s11538_s3 + $0x50] sm:$0xff]  }
 0x15f   : > { %8311 = vmatprep.subr.bf16.mxu1 %v9051_v62 }
 0x160   : > { %v1146_v3 = vmax.f32 %v1074_v63, 0.0  ;;  %v1180_v8 = vpack.c.bf16 %v1148_v0, %v1147_v5  ;;  %8312 = vmatpush3.bf16.msra.mxu1 %v9051_v62 }
 0x161   : > { %8313 = vmatprep.subr.bf16.mxu1 %v9052_v28 }
 0x162   : > { %v1179_v6 = vpack.c.bf16 %v1146_v3, %v1145_v1 }
 0x164   : > { %8233 = vmatprep.mubr.msk.bf16.mxu1 %vm1218_vm1, %v1179_v6  ;;  %8314 = vmatpush3.bf16.msra.mxu1 %v9052_v28 }
 0x165   : > { %8234 = vmatmul.mubr.msk.bf16.gmra.mxu1 %vm1218_vm1, %v1180_v8  ;;  %8315 = vmatprep.subr.bf16.mxu1 %v9053_v33 }
 0x168   : > { %8316 = vmatpush3.bf16.msra.mxu1 %v9053_v33 }
 0x1ad   : > { %v8175_v10 = vpop.f32.mrf.mxu1 }
 0x1ae   : > { %v1358_v26 = vadd.f32 %v8175_v10, %v9615_v16 }
 0x1af   : > { %v1349_v15 = vpop.f32.mrf.mxu1 }
 0x1b0   : > { %v1350_v20 = vadd.f32 %v9615_v16, %v1349_v15  ;;  %v1606_v45 = vmax.f32 %v1358_v26, 0.0 }
 0x1b1   : > { %v8176_v19 = vpop.f32.mrf.mxu1 }
 0x1b2   : > { %v1361_v25 = vadd.f32 %v8176_v19, %v9615_v16  ;;  %v1604_v43 = vmax.f32 %v1350_v20, 0.0 }
 0x1b3   : > { %v1352_v27 = vpop.f32.mrf.mxu1 }
 0x1b4   : > { %v1353_v34 = vadd.f32 %v9615_v16, %v1352_v27  ;;  %v1607_v37 = vmax.f32 %v1361_v25, 0.0 }
 0x1b5   : > { %v8179_v38 = vpop.f32.mrf.mxu1 }
 0x1b6   : > { %v1605_v44 = vmax.f32 %v1353_v34, 0.0  ;;  %v1669_v52 = vpack.c.bf16 %v1607_v37, %v1606_v45  ;;  %v1374_v61 = vadd.f32 %v8179_v38, %v9615_v16 }
 0x1b7   : > { %v1365_v46 = vpop.f32.mrf.mxu1 }
 0x1b8   : > { %v1668_v51 = vpack.c.bf16 %v1605_v44, %v1604_v43  ;;  %v1366_v57 = vadd.f32 %v9615_v16, %v1365_v46  ;;  %v1610_v8 = vmax.f32 %v1374_v61, 0.0 }
 0x1b9   : > { %v8180_v56 = vpop.f32.mrf.mxu1 }
 0x1ba   : > { %v1377_v58 = vadd.f32 %v8180_v56, %v9615_v16  ;;  %8245 = vmatprep.mubr.msk.bf16.mxu0 %vm1218_vm1, %v1668_v51  ;;  %v1608_v5 = vmax.f32 %v1366_v57, 0.0 }
 0x1bb   : > { %v1368_v63 = vpop.f32.mrf.mxu1  ;;  %8246 = vmatmul.mubr.msk.bf16.vlgmr.msra.gmra.mxu0 %vm1218_vm1, %v1669_v52 }
 0x1bc   : > { %v1369_v0 = vadd.f32 %v9615_v16, %v1368_v63  ;;  %v1611_v1 = vmax.f32 %v1377_v58, 0.0 }
 0x1bd   : > { %v8183_v3 = vpop.f32.mrf.mxu1 }
 0x1be   : > { %v1609_v6 = vmax.f32 %v1369_v0, 0.0  ;;  %v1671_v10 = vpack.c.bf16 %v1611_v1, %v1610_v8  ;;  %v1390_v25 = vadd.f32 %v8183_v3, %v9615_v16 }
 0x1bf   : > { %v1381_v9 = vpop.f32.mrf.mxu1 }
 0x1c0   : > { %v1670_v62 = vpack.c.bf16 %v1609_v6, %v1608_v5  ;;  %v1382_v19 = vadd.f32 %v9615_v16, %v1381_v9  ;;  %v1614_v38 = vmax.f32 %v1390_v25, 0.0 }
 0x1c1   : > { %v8184_v15 = vpop.f32.mrf.mxu1 }
 0x1c2   : > { %v1393_v20 = vadd.f32 %v8184_v15, %v9615_v16  ;;  %8249 = vmatprep.mubr.msk.bf16.mxu0 %vm1218_vm1, %v1670_v62  ;;  %v1612_v34 = vmax.f32 %v1382_v19, 0.0 }
 0x1c3   : > { %v1384_v26 = vpop.f32.mrf.mxu1  ;;  %8250 = vmatmul.mubr.msk.bf16.gmra.mxu0 %vm1218_vm1, %v1671_v10 }
 0x1c4   : > { %v1385_v27 = vadd.f32 %v9615_v16, %v1384_v26  ;;  %v1615_v28 = vmax.f32 %v1393_v20, 0.0 }
 0x1c5   : > { %v8187_v33 = vpop.f32.mrf.mxu1 }
 0x1c6   : > { %v1613_v37 = vmax.f32 %v1385_v27, 0.0  ;;  %v1673_v45 = vpack.c.bf16 %v1615_v28, %v1614_v38  ;;  %v1406_v56 = vadd.f32 %v8187_v33, %v9615_v16 }
 0x1c7   : > { %v1397_v43 = vpop.f32.mrf.mxu1 }
 0x1c8   : > { %v1672_v44 = vpack.c.bf16 %v1613_v37, %v1612_v34  ;;  %v1398_v51 = vadd.f32 %v9615_v16, %v1397_v43  ;;  %v1618_v3 = vmax.f32 %v1406_v56, 0.0 }
 0x1c9   : > { %v8188_v46 = vpop.f32.mrf.mxu1 }
 0x1ca   : > { %v1409_v52 = vadd.f32 %v8188_v46, %v9615_v16  ;;  %8253 = vmatprep.mubr.msk.bf16.mxu0 %vm1218_vm1, %v1672_v44  ;;  %v1616_v0 = vmax.f32 %v1398_v51, 0.0 }
 0x1cb   : > { %v1400_v57 = vpop.f32.mrf.mxu1  ;;  %8254 = vmatmul.mubr.msk.bf16.gmra.mxu0 %vm1218_vm1, %v1673_v45 }
 0x1cc   : > { %v1401_v58 = vadd.f32 %v9615_v16, %v1400_v57  ;;  %v1619_v61 = vmax.f32 %v1409_v52, 0.0 }
 0x1cd   : > { %v8191_v63 = vpop.f32.mrf.mxu1 }
 0x1ce   : > { %v1617_v1 = vmax.f32 %v1401_v58, 0.0  ;;  %v1675_v8 = vpack.c.bf16 %v1619_v61, %v1618_v3  ;;  %v1422_v15 = vadd.f32 %v8191_v63, %v9615_v16 }
 0x1cf   : > { %v1413_v5 = vpop.f32.mrf.mxu1 }
 0x1d0   : > { %v1674_v6 = vpack.c.bf16 %v1617_v1, %v1616_v0  ;;  %v1414_v62 = vadd.f32 %v9615_v16, %v1413_v5  ;;  %v1622_v33 = vmax.f32 %v1422_v15, 0.0 }
 0x1d1   : > { %v8192_v9 = vpop.f32.mrf.mxu1 }
 0x1d2   : > { %v1425_v10 = vadd.f32 %v8192_v9, %v9615_v16  ;;  %8257 = vmatprep.mubr.msk.bf16.mxu0 %vm1218_vm1, %v1674_v6  ;;  %v1620_v27 = vmax.f32 %v1414_v62, 0.0 }
 0x1d3   : > { %v1416_v19 = vpop.f32.mrf.mxu1  ;;  %8258 = vmatmul.mubr.msk.bf16.gmra.mxu0 %vm1218_vm1, %v1675_v8 }
 0x1d4   : > { %v1417_v20 = vadd.f32 %v9615_v16, %v1416_v19  ;;  %v1623_v25 = vmax.f32 %v1425_v10, 0.0 }
 0x1d5   : > { %v8195_v26 = vpop.f32.mrf.mxu1 }
 0x1d6   : > { %v1621_v28 = vmax.f32 %v1417_v20, 0.0  ;;  %v1677_v38 = vpack.c.bf16 %v1623_v25, %v1622_v33  ;;  %v1438_v46 = vadd.f32 %v8195_v26, %v9615_v16 }
 0x1d7   : > { %v1429_v34 = vpop.f32.mrf.mxu1 }
 0x1d8   : > { %v1676_v37 = vpack.c.bf16 %v1621_v28, %v1620_v27  ;;  %v1430_v44 = vadd.f32 %v9615_v16, %v1429_v34  ;;  %v1626_v63 = vmax.f32 %v1438_v46, 0.0 }
 0x1d9   : > { %v8196_v43 = vpop.f32.mrf.mxu1 }
 0x1da   : > { %v1441_v45 = vadd.f32 %v8196_v43, %v9615_v16  ;;  %8261 = vmatprep.mubr.msk.bf16.mxu0 %vm1218_vm1, %v1676_v37  ;;  %v1624_v58 = vmax.f32 %v1430_v44, 0.0 }
 0x1db   : > { %v1432_v51 = vpop.f32.mrf.mxu1  ;;  %8262 = vmatmul.mubr.msk.bf16.gmra.mxu0 %vm1218_vm1, %v1677_v38 }
 0x1dc   : > { %v1433_v52 = vadd.f32 %v9615_v16, %v1432_v51  ;;  %v1627_v56 = vmax.f32 %v1441_v45, 0.0 }
 0x1dd   : > { %v8199_v57 = vpop.f32.mrf.mxu1 }
 0x1de   : > { %v1625_v61 = vmax.f32 %v1433_v52, 0.0  ;;  %v1679_v3 = vpack.c.bf16 %v1627_v56, %v1626_v63  ;;  %v1454_v9 = vadd.f32 %v8199_v57, %v9615_v16 }
 0x1df   : > { %v1445_v0 = vpop.f32.mrf.mxu1 }
 0x1e0   : > { %v1678_v1 = vpack.c.bf16 %v1625_v61, %v1624_v58  ;;  %v1446_v6 = vadd.f32 %v9615_v16, %v1445_v0  ;;  %v1630_v26 = vmax.f32 %v1454_v9, 0.0 }
 0x1e1   : > { %v8200_v5 = vpop.f32.mrf.mxu1 }
 0x1e2   : > { %v1457_v8 = vadd.f32 %v8200_v5, %v9615_v16  ;;  %8265 = vmatprep.mubr.msk.bf16.mxu0 %vm1218_vm1, %v1678_v1  ;;  %v1628_v20 = vmax.f32 %v1446_v6, 0.0 }
 0x1e3   : > { %v1448_v62 = vpop.f32.mrf.mxu1  ;;  %8266 = vmatmul.mubr.msk.bf16.gmra.mxu0 %vm1218_vm1, %v1679_v3 }
 0x1e4   : > { %v1449_v10 = vadd.f32 %v9615_v16, %v1448_v62  ;;  %v1631_v15 = vmax.f32 %v1457_v8, 0.0 }
 0x1e5   : > { %v8203_v19 = vpop.f32.mrf.mxu1 }
 0x1e6   : > { %v1629_v25 = vmax.f32 %v1449_v10, 0.0  ;;  %v1681_v33 = vpack.c.bf16 %v1631_v15, %v1630_v26  ;;  %v1470_v43 = vadd.f32 %v8203_v19, %v9615_v16 }
 0x1e7   : > { %v1461_v27 = vpop.f32.mrf.mxu1 }
 0x1e8   : > { %v1680_v28 = vpack.c.bf16 %v1629_v25, %v1628_v20  ;;  %v1462_v37 = vadd.f32 %v9615_v16, %v1461_v27  ;;  %v1634_v57 = vmax.f32 %v1470_v43, 0.0 }
 0x1e9   : > { %v8204_v34 = vpop.f32.mrf.mxu1 }
 0x1ea   : > { %v1473_v38 = vadd.f32 %v8204_v34, %v9615_v16  ;;  %8269 = vmatprep.mubr.msk.bf16.mxu0 %vm1218_vm1, %v1680_v28  ;;  %v1632_v52 = vmax.f32 %v1462_v37, 0.0 }
 0x1eb   : > { %v1464_v44 = vpop.f32.mrf.mxu1  ;;  %8270 = vmatmul.mubr.msk.bf16.gmra.mxu0 %vm1218_vm1, %v1681_v33 }
 0x1ec   : > { %v1465_v45 = vadd.f32 %v9615_v16, %v1464_v44  ;;  %v1635_v46 = vmax.f32 %v1473_v38, 0.0 }
 0x1ed   : > { %v8207_v51 = vpop.f32.mrf.mxu1 }
 0x1ee   : > { %v1633_v56 = vmax.f32 %v1465_v45, 0.0  ;;  %v1683_v63 = vpack.c.bf16 %v1635_v46, %v1634_v57  ;;  %v1486_v5 = vadd.f32 %v8207_v51, %v9615_v16 }
 0x1ef   : > { %v1477_v58 = vpop.f32.mrf.mxu1 }
 0x1f0   : > { %v1682_v61 = vpack.c.bf16 %v1633_v56, %v1632_v52  ;;  %v1478_v1 = vadd.f32 %v9615_v16, %v1477_v58  ;;  %v1638_v19 = vmax.f32 %v1486_v5, 0.0 }
 0x1f1   : > { %v8208_v0 = vpop.f32.mrf.mxu1 }
 0x1f2   : > { %v1489_v3 = vadd.f32 %v8208_v0, %v9615_v16  ;;  %8273 = vmatprep.mubr.msk.bf16.mxu0 %vm1218_vm1, %v1682_v61  ;;  %v1636_v10 = vmax.f32 %v1478_v1, 0.0 }
 0x1f3   : > { %v1480_v6 = vpop.f32.mrf.mxu1  ;;  %8274 = vmatmul.mubr.msk.bf16.gmra.mxu0 %vm1218_vm1, %v1683_v63 }
 0x1f4   : > { %v1481_v8 = vadd.f32 %v9615_v16, %v1480_v6  ;;  %v1639_v9 = vmax.f32 %v1489_v3, 0.0 }
 0x1f5   : > { %v8211_v62 = vpop.f32.mrf.mxu1 }
 0x1f6   : > { %v1637_v15 = vmax.f32 %v1481_v8, 0.0  ;;  %v1685_v26 = vpack.c.bf16 %v1639_v9, %v1638_v19  ;;  %v1502_v34 = vadd.f32 %v8211_v62, %v9615_v16 }
 0x1f7   : > { %v1493_v20 = vpop.f32.mrf.mxu1 }
 0x1f8   : > { %v1684_v25 = vpack.c.bf16 %v1637_v15, %v1636_v10  ;;  %v1494_v28 = vadd.f32 %v9615_v16, %v1493_v20  ;;  %v1642_v51 = vmax.f32 %v1502_v34, 0.0 }
 0x1f9   : > { %v8212_v27 = vpop.f32.mrf.mxu1 }
 0x1fa   : > { %v1505_v33 = vadd.f32 %v8212_v27, %v9615_v16  ;;  %8277 = vmatprep.mubr.msk.bf16.mxu0 %vm1218_vm1, %v1684_v25  ;;  %v1640_v45 = vmax.f32 %v1494_v28, 0.0 }
 0x1fb   : > { %v1496_v37 = vpop.f32.mrf.mxu1  ;;  %8278 = vmatmul.mubr.msk.bf16.gmra.mxu0 %vm1218_vm1, %v1685_v26 }
 0x1fc   : > { %v1497_v38 = vadd.f32 %v9615_v16, %v1496_v37  ;;  %v1643_v43 = vmax.f32 %v1505_v33, 0.0 }
 0x1fd   : > { %v8215_v44 = vpop.f32.mrf.mxu1 }
 0x1fe   : > { %v1641_v46 = vmax.f32 %v1497_v38, 0.0  ;;  %v1687_v57 = vpack.c.bf16 %v1643_v43, %v1642_v51  ;;  %v1518_v0 = vadd.f32 %v8215_v44, %v9615_v16 }
 0x1ff   : > { %v1509_v52 = vpop.f32.mrf.mxu1 }
 0x200   : > { %v1686_v56 = vpack.c.bf16 %v1641_v46, %v1640_v45  ;;  %v1510_v61 = vadd.f32 %v9615_v16, %v1509_v52  ;;  %v1646_v62 = vmax.f32 %v1518_v0, 0.0 }
 0x201   : > { %v8216_v58 = vpop.f32.mrf.mxu1 }
 0x202   : > { %v1521_v63 = vadd.f32 %v8216_v58, %v9615_v16  ;;  %8281 = vmatprep.mubr.msk.bf16.mxu0 %vm1218_vm1, %v1686_v56  ;;  %v1644_v8 = vmax.f32 %v1510_v61, 0.0 }
 0x203   : > { %v1512_v1 = vpop.f32.mrf.mxu1  ;;  %8282 = vmatmul.mubr.msk.bf16.gmra.mxu0 %vm1218_vm1, %v1687_v57 }
 0x204   : > { %v1513_v3 = vadd.f32 %v9615_v16, %v1512_v1  ;;  %v1647_v5 = vmax.f32 %v1521_v63, 0.0 }
 0x205   : > { %v8219_v6 = vpop.f32.mrf.mxu1 }
 0x206   : > { %v1645_v9 = vmax.f32 %v1513_v3, 0.0  ;;  %v1689_v19 = vpack.c.bf16 %v1647_v5, %v1646_v62  ;;  %v1534_v27 = vadd.f32 %v8219_v6, %v9615_v16 }
 0x207   : > { %v1525_v10 = vpop.f32.mrf.mxu1 }
 0x208   : > { %v1688_v15 = vpack.c.bf16 %v1645_v9, %v1644_v8  ;;  %v1526_v25 = vadd.f32 %v9615_v16, %v1525_v10  ;;  %v1650_v44 = vmax.f32 %v1534_v27, 0.0 }
 0x209   : > { %v8220_v20 = vpop.f32.mrf.mxu1 }
 0x20a   : > { %v1537_v26 = vadd.f32 %v8220_v20, %v9615_v16  ;;  %8285 = vmatprep.mubr.msk.bf16.mxu0 %vm1218_vm1, %v1688_v15  ;;  %v1648_v38 = vmax.f32 %v1526_v25, 0.0 }
 0x20b   : > { %v1528_v28 = vpop.f32.mrf.mxu1  ;;  %8286 = vmatmul.mubr.msk.bf16.gmra.mxu0 %vm1218_vm1, %v1689_v19 }
 0x20c   : > { %v1529_v33 = vadd.f32 %v9615_v16, %v1528_v28  ;;  %v1651_v34 = vmax.f32 %v1537_v26, 0.0 }
 0x20d   : > { %v8223_v37 = vpop.f32.mrf.mxu1 }
 0x20e   : > { %v1649_v43 = vmax.f32 %v1529_v33, 0.0  ;;  %v1691_v51 = vpack.c.bf16 %v1651_v34, %v1650_v44  ;;  %v1550_v58 = vadd.f32 %v8223_v37, %v9615_v16 }
 0x20f   : > { %v1541_v45 = vpop.f32.mrf.mxu1 }
 0x210   : > { %v1690_v46 = vpack.c.bf16 %v1649_v43, %v1648_v38  ;;  %v1542_v56 = vadd.f32 %v9615_v16, %v1541_v45  ;;  %v1654_v6 = vmax.f32 %v1550_v58, 0.0 }
 0x211   : > { %v8224_v52 = vpop.f32.mrf.mxu1 }
 0x212   : > { %v1553_v57 = vadd.f32 %v8224_v52, %v9615_v16  ;;  %8289 = vmatprep.mubr.msk.bf16.mxu0 %vm1218_vm1, %v1690_v46  ;;  %v1652_v3 = vmax.f32 %v1542_v56, 0.0 }
 0x213   : > { %v1544_v61 = vpop.f32.mrf.mxu1  ;;  %8290 = vmatmul.mubr.msk.bf16.gmra.mxu0 %vm1218_vm1, %v1691_v51 }
 0x214   : > { %v1545_v63 = vadd.f32 %v9615_v16, %v1544_v61  ;;  %v1655_v0 = vmax.f32 %v1553_v57, 0.0 }
 0x215   : > { %v8227_v1 = vpop.f32.mrf.mxu1 }
 0x216   : > { %v1653_v5 = vmax.f32 %v1545_v63, 0.0  ;;  %v1693_v62 = vpack.c.bf16 %v1655_v0, %v1654_v6  ;;  %v1566_v20 = vadd.f32 %v8227_v1, %v9615_v16 }
 0x217   : > { %v1557_v8 = vpop.f32.mrf.mxu1 }
 0x218   : > { %v1692_v9 = vpack.c.bf16 %v1653_v5, %v1652_v3  ;;  %v1558_v15 = vadd.f32 %v9615_v16, %v1557_v8  ;;  %v1658_v37 = vmax.f32 %v1566_v20, 0.0 }
 0x219   : > { %v8228_v10 = vpop.f32.mrf.mxu1 }
 0x21a   : > { %v1569_v19 = vadd.f32 %v8228_v10, %v9615_v16  ;;  %8293 = vmatprep.mubr.msk.bf16.mxu0 %vm1218_vm1, %v1692_v9  ;;  %v1656_v33 = vmax.f32 %v1558_v15, 0.0 }
 0x21b   : > { %v1560_v25 = vpop.f32.mrf.mxu1  ;;  %8294 = vmatmul.mubr.msk.bf16.gmra.mxu0 %vm1218_vm1, %v1693_v62 }
 0x21c   : > { %v1561_v26 = vadd.f32 %v9615_v16, %v1560_v25  ;;  %v1659_v27 = vmax.f32 %v1569_v19, 0.0 }
 0x21d   : > { %v8231_v28 = vpop.f32.mrf.mxu1 }
 0x21e   : > { %v1657_v34 = vmax.f32 %v1561_v26, 0.0  ;;  %v1695_v44 = vpack.c.bf16 %v1659_v27, %v1658_v37  ;;  %v1582_v52 = vadd.f32 %v8231_v28, %v9615_v16 }
 0x21f   : > { %v1573_v38 = vpop.f32.mrf.mxu1 }
 0x220   : > { %v1694_v43 = vpack.c.bf16 %v1657_v34, %v1656_v33  ;;  %v1574_v46 = vadd.f32 %v9615_v16, %v1573_v38  ;;  %v1662_v1 = vmax.f32 %v1582_v52, 0.0  ;;  %v9054_v34 = vld [vmem:[%s11540_s5 + $0x10] sm:$0xff]   ;;  %v9057_v52 = vld [vmem:[%s11540_s5 + $0x8] sm:$0xff]  }
 0x221   : > { %v8232_v45 = vpop.f32.mrf.mxu1  ;;  %8381 = vmatprep.subr.bf16.mxu0 %v9054_v34 }
 0x222   : > { %v1585_v51 = vadd.f32 %v8232_v45, %v9615_v16  ;;  %8297 = vmatprep.mubr.msk.bf16.mxu0 %vm1218_vm1, %v1694_v43  ;;  %v1660_v63 = vmax.f32 %v1574_v46, 0.0  ;;  %8382 = vmatpush3.bf16.msra.mxu0 %v9054_v34  ;;  %v9730_v43 = vld [vmem:[%s11543_s8 + $0x2] ss:$0 sm:$0xff] }
 0x223   : > { %v1576_v56 = vpop.f32.mrf.mxu1  ;;  %8298 = vmatmul.mubr.msk.bf16.gmra.mxu0 %vm1218_vm1, %v1695_v44  ;;  %8383 = vmatprep.subr.bf16.mxu0 %v9057_v52 }
 0x224   : > { %v1577_v57 = vadd.f32 %v9615_v16, %v1576_v56  ;;  %v1663_v58 = vmax.f32 %v1585_v51, 0.0  ;;  %v9059_v56 = vld [vmem:[%s11540_s5] sm:$0xff]  }
 0x225   : > { %v8235_v61 = vpop.f32.mrf.mxu1 }
 0x226   : > { %v1661_v0 = vmax.f32 %v1577_v57, 0.0  ;;  %v1697_v6 = vpack.c.bf16 %v1663_v58, %v1662_v1  ;;  %v1598_v10 = vadd.f32 %v8235_v61, %v9615_v16  ;;  %8384 = vmatpush3.bf16.msra.mxu0 %v9057_v52 }
 0x227   : > { %v1589_v3 = vpop.f32.mrf.mxu1  ;;  %8385 = vmatprep.subr.bf16.mxu0 %v9059_v56 }
 0x228   : > { %v1696_v5 = vpack.c.bf16 %v1661_v0, %v1660_v63  ;;  %v1590_v9 = vadd.f32 %v9615_v16, %v1589_v3  ;;  %v1666_v27 = vmax.f32 %v1598_v10, 0.0 }
 0x229   : > { %v8236_v8 = vpop.f32.mrf.mxu1 }
 0x22a   : > { %v1601_v62 = vadd.f32 %v8236_v8, %v9615_v16  ;;  %8301 = vmatprep.mubr.msk.bf16.mxu0 %vm1218_vm1, %v1696_v5  ;;  %v1664_v25 = vmax.f32 %v1590_v9, 0.0  ;;  %v9056_v9 = vld [vmem:[%s11539_s4 + $0x10] sm:$0xff]   ;;  %8386 = vmatpush3.bf16.msra.mxu0 %v9059_v56 }
 0x22b   : > { %v1592_v15 = vpop.f32.mrf.mxu1  ;;  %8302 = vmatmul.mubr.msk.bf16.gmra.mxu0 %vm1218_vm1, %v1697_v6 }
 0x22c   : > { %v1593_v19 = vadd.f32 %v9615_v16, %v1592_v15  ;;  %v1667_v20 = vmax.f32 %v1601_v62, 0.0  ;;  %v9055_v16 = vld [vmem:[%s11539_s4 + $0x18] sm:$0xff]  }
 0x22d   : > { %8451 = vmatprep.subr.bf16.mxu1 %v9055_v16 }
 0x22e   : > { %v1665_v26 = vmax.f32 %v1593_v19, 0.0  ;;  %v1699_v33 = vpack.c.bf16 %v1667_v20, %v1666_v27  ;;  %v9058_v27 = vld [vmem:[%s11539_s4 + $0x8] sm:$0xff]  }
 0x230   : > { %v1698_v28 = vpack.c.bf16 %v1665_v26, %v1664_v25 }
 0x232   : > { %8305 = vmatprep.mubr.msk.bf16.mxu0 %vm1218_vm1, %v1698_v28 }
 0x233   : > { %8306 = vmatmul.mubr.msk.bf16.gmra.mxu0 %vm1218_vm1, %v1699_v33 }
 0x234   : > { %8387 = vmatprep.mubr.msk.bf16.mxu0 %vm699_vm0, %v9295_v7 }
 0x23b   : > { %8388 = vmatmul.mubr.msk.bf16.vlgmr.msra.gmra.mxu0 %vm699_vm0, %v9302_v11 }
 0x23c   : > { %8391 = vmatprep.mubr.msk.bf16.mxu0 %vm699_vm0, %v9304_v12 }
 0x243   : > { %8392 = vmatmul.mubr.msk.bf16.gmra.mxu0 %vm699_vm0, %v9314_v17 }
 0x244   : > { %8395 = vmatprep.mubr.msk.bf16.mxu0 %vm699_vm0, %v9316_v18 }
 0x24b   : > { %8396 = vmatmul.mubr.msk.bf16.gmra.mxu0 %vm699_vm0, %v9326_v23 }
 0x24c   : > { %8399 = vmatprep.mubr.msk.bf16.mxu0 %vm699_vm0, %v9328_v24 }
 0x253   : > { %8400 = vmatmul.mubr.msk.bf16.gmra.mxu0 %vm699_vm0, %v9338_v29 }
 0x254   : > { %8403 = vmatprep.mubr.msk.bf16.mxu0 %vm699_vm0, %v9340_v30 }
 0x25b   : > { %8404 = vmatmul.mubr.msk.bf16.gmra.mxu0 %vm699_vm0, %v9350_v35 }
 0x25c   : > { %8407 = vmatprep.mubr.msk.bf16.mxu0 %vm699_vm0, %v9352_v36 }
 0x263   : > { %8408 = vmatmul.mubr.msk.bf16.gmra.mxu0 %vm699_vm0, %v9362_v41 }
 0x264   : > { %8411 = vmatprep.mubr.msk.bf16.mxu0 %vm699_vm0, %v9364_v42 }
 0x26b   : > { %8412 = vmatmul.mubr.msk.bf16.gmra.mxu0 %vm699_vm0, %v9374_v47 }
 0x26c   : > { %8415 = vmatprep.mubr.msk.bf16.mxu0 %vm699_vm0, %v9376_v48 }
 0x273   : > { %8416 = vmatmul.mubr.msk.bf16.gmra.mxu0 %vm699_vm0, %v9386_v53 }
 0x274   : > { %8419 = vmatprep.mubr.msk.bf16.mxu0 %vm699_vm0, %v9388_v54 }
 0x27b   : > { %v8247_v37 = vpop.f32.mrf.mxu0  ;;  %8420 = vmatmul.mubr.msk.bf16.gmra.mxu0 %vm699_vm0, %v9398_v59 }
 0x27c   : > { %v1876_v46 = vadd.f32 %v8247_v37, %v9730_v43  ;;  %8423 = vmatprep.mubr.msk.bf16.mxu0 %vm699_vm0, %v9400_v60 }
 0x27d   : > { %v1867_v38 = vpop.f32.mrf.mxu0 }
 0x27e   : > { %v1868_v7 = vadd.f32 %v9730_v43, %v1867_v38  ;;  %v2124_v1 = vmax.f32 %v1876_v46, 0.0 }
 0x27f   : > { %v8248_v44 = vpop.f32.mrf.mxu0 }
 0x280   : > { %v1879_v45 = vadd.f32 %v8248_v44, %v9730_v43  ;;  %v2122_v63 = vmax.f32 %v1868_v7, 0.0  ;;  %v9060_v7 = vld [vmem:[%s11539_s4] sm:$0xff]  }
 0x281   : > { %v1870_v51 = vpop.f32.mrf.mxu0 }
 0x282   : > { %v1871_v57 = vadd.f32 %v9730_v43, %v1870_v51  ;;  %v2125_v58 = vmax.f32 %v1879_v45, 0.0 }
 0x283   : > { %v8251_v61 = vpop.f32.mrf.mxu0  ;;  %8424 = vmatmul.mubr.msk.bf16.gmra.mxu0 %vm699_vm0, %v9413_v2 }
 0x284   : > { %v2123_v0 = vmax.f32 %v1871_v57, 0.0  ;;  %v2187_v6 = vpack.c.bf16 %v2125_v58, %v2124_v1  ;;  %v1892_v15 = vadd.f32 %v8251_v61, %v9730_v43  ;;  %8427 = vmatprep.mubr.msk.bf16.mxu0 %vm699_vm0, %v9418_v4 }
 0x285   : > { %v1883_v3 = vpop.f32.mrf.mxu0 }
 0x286   : > { %v2186_v5 = vpack.c.bf16 %v2123_v0, %v2122_v63  ;;  %v1884_v62 = vadd.f32 %v9730_v43, %v1883_v3  ;;  %v2128_v34 = vmax.f32 %v1892_v15, 0.0 }
 0x287   : > { %v8252_v8 = vpop.f32.mrf.mxu0 }
 0x288   : > { %v1895_v10 = vadd.f32 %v8252_v8, %v9730_v43  ;;  %8317 = vmatprep.mubr.msk.bf16.mxu1 %vm1218_vm1, %v2186_v5  ;;  %v2126_v28 = vmax.f32 %v1884_v62, 0.0 }
 0x289   : > { %v1886_v19 = vpop.f32.mrf.mxu0  ;;  %8318 = vmatmul.mubr.msk.bf16.vlgmr.msra.gmra.mxu1 %vm1218_vm1, %v2187_v6 }
 0x28a   : > { %v1887_v20 = vadd.f32 %v9730_v43, %v1886_v19  ;;  %8452 = vmatpush3.bf16.msra.mxu1 %v9055_v16  ;;  %v2129_v25 = vmax.f32 %v1895_v10, 0.0 }
 0x28b   : > { %v8255_v26 = vpop.f32.mrf.mxu0  ;;  %8453 = vmatprep.subr.bf16.mxu1 %v9056_v9  ;;  %8428 = vmatmul.mubr.msk.bf16.gmra.mxu0 %vm699_vm0, %v9431_v13 }
 0x28c   : > { %v2127_v33 = vmax.f32 %v1887_v20, 0.0  ;;  %v2189_v16 = vpack.c.bf16 %v2129_v25, %v2128_v34  ;;  %v1908_v46 = vadd.f32 %v8255_v26, %v9730_v43  ;;  %8431 = vmatprep.mubr.msk.bf16.mxu0 %vm699_vm0, %v9433_v14 }
 0x28d   : > { %v1899_v37 = vpop.f32.mrf.mxu0 }
 0x28e   : > { %v2188_v38 = vpack.c.bf16 %v2127_v33, %v2126_v28  ;;  %8454 = vmatpush3.bf16.msra.mxu1 %v9056_v9  ;;  %v1900_v45 = vadd.f32 %v9730_v43, %v1899_v37  ;;  %v2132_v61 = vmax.f32 %v1908_v46, 0.0 }
 0x28f   : > { %v8256_v44 = vpop.f32.mrf.mxu0  ;;  %8455 = vmatprep.subr.bf16.mxu1 %v9058_v27 }
 0x290   : > { %v1911_v11 = vadd.f32 %v8256_v44, %v9730_v43  ;;  %8321 = vmatprep.mubr.msk.bf16.mxu1 %vm1218_vm1, %v2188_v38  ;;  %v2130_v57 = vmax.f32 %v1900_v45, 0.0 }
 0x291   : > { %v1902_v12 = vpop.f32.mrf.mxu0  ;;  %8322 = vmatmul.mubr.msk.bf16.gmra.mxu1 %vm1218_vm1, %v2189_v16 }
 0x292   : > { %v1903_v51 = vadd.f32 %v9730_v43, %v1902_v12  ;;  %8456 = vmatpush3.bf16.msra.mxu1 %v9058_v27  ;;  %v2133_v52 = vmax.f32 %v1911_v11, 0.0 }
 0x293   : > { %v8259_v56 = vpop.f32.mrf.mxu0  ;;  %8457 = vmatprep.subr.bf16.mxu1 %v9060_v7  ;;  %8432 = vmatmul.mubr.msk.bf16.gmra.mxu0 %vm699_vm0, %v9443_v21 }
 0x294   : > { %v2131_v58 = vmax.f32 %v1903_v51, 0.0  ;;  %v2191_v1 = vpack.c.bf16 %v2133_v52, %v2132_v61  ;;  %v1924_v8 = vadd.f32 %v8259_v56, %v9730_v43  ;;  %8435 = vmatprep.mubr.msk.bf16.mxu0 %vm699_vm0, %v9445_v22 }
 0x295   : > { %v1915_v63 = vpop.f32.mrf.mxu0 }
 0x296   : > { %v2190_v0 = vpack.c.bf16 %v2131_v58, %v2130_v57  ;;  %8458 = vmatpush3.bf16.msra.mxu1 %v9060_v7  ;;  %v1916_v5 = vadd.f32 %v9730_v43, %v1915_v63  ;;  %v2136_v19 = vmax.f32 %v1924_v8, 0.0 }
 0x297   : > { %v8260_v3 = vpop.f32.mrf.mxu0 }
 0x298   : > { %v1927_v6 = vadd.f32 %v8260_v3, %v9730_v43  ;;  %8325 = vmatprep.mubr.msk.bf16.mxu1 %vm1218_vm1, %v2190_v0  ;;  %v2134_v10 = vmax.f32 %v1916_v5, 0.0 }
 0x299   : > { %v1918_v17 = vpop.f32.mrf.mxu0  ;;  %8326 = vmatmul.mubr.msk.bf16.gmra.mxu1 %vm1218_vm1, %v2191_v1 }
 0x29a   : > { %v1919_v9 = vadd.f32 %v9730_v43, %v1918_v17  ;;  %v2137_v18 = vmax.f32 %v1927_v6, 0.0 }
 0x29b   : > { %v8263_v62 = vpop.f32.mrf.mxu0  ;;  %8436 = vmatmul.mubr.msk.bf16.gmra.mxu0 %vm699_vm0, %v9455_v31 }
 0x29c   : > { %v2135_v15 = vmax.f32 %v1919_v9, 0.0  ;;  %v2193_v26 = vpack.c.bf16 %v2137_v18, %v2136_v19  ;;  %v1940_v34 = vadd.f32 %v8263_v62, %v9730_v43  ;;  %8439 = vmatprep.mubr.msk.bf16.mxu0 %vm699_vm0, %v9457_v32 }
 0x29d   : > { %v1931_v20 = vpop.f32.mrf.mxu0 }
 0x29e   : > { %v2192_v25 = vpack.c.bf16 %v2135_v15, %v2134_v10  ;;  %v1932_v28 = vadd.f32 %v9730_v43, %v1931_v20  ;;  %v2140_v7 = vmax.f32 %v1940_v34, 0.0 }
 0x29f   : > { %v8264_v27 = vpop.f32.mrf.mxu0 }
 0x2a0   : > { %v1943_v33 = vadd.f32 %v8264_v27, %v9730_v43  ;;  %8329 = vmatprep.mubr.msk.bf16.mxu1 %vm1218_vm1, %v2192_v25  ;;  %v2138_v16 = vmax.f32 %v1932_v28, 0.0 }
 0x2a1   : > { %v1934_v37 = vpop.f32.mrf.mxu0  ;;  %8330 = vmatmul.mubr.msk.bf16.gmra.mxu1 %vm1218_vm1, %v2193_v26 }
 0x2a2   : > { %v1935_v23 = vadd.f32 %v9730_v43, %v1934_v37  ;;  %v2141_v38 = vmax.f32 %v1943_v33, 0.0 }
 0x2a3   : > { %v8267_v24 = vpop.f32.mrf.mxu0  ;;  %8440 = vmatmul.mubr.msk.bf16.gmra.mxu0 %vm699_vm0, %v9467_v39 }
 0x2a4   : > { %v2139_v44 = vmax.f32 %v1935_v23, 0.0  ;;  %v2195_v46 = vpack.c.bf16 %v2141_v38, %v2140_v7  ;;  %v1956_v56 = vadd.f32 %v8267_v24, %v9730_v43  ;;  %8443 = vmatprep.mubr.msk.bf16.mxu0 %vm699_vm0, %v9469_v40 }
 0x2a5   : > { %v1947_v45 = vpop.f32.mrf.mxu0 }
 0x2a6   : > { %v2194_v11 = vpack.c.bf16 %v2139_v44, %v2138_v16  ;;  %v1948_v51 = vadd.f32 %v9730_v43, %v1947_v45  ;;  %v2144_v0 = vmax.f32 %v1956_v56, 0.0 }
 0x2a7   : > { %v8268_v12 = vpop.f32.mrf.mxu0 }
 0x2a8   : > { %v1959_v52 = vadd.f32 %v8268_v12, %v9730_v43  ;;  %8333 = vmatprep.mubr.msk.bf16.mxu1 %vm1218_vm1, %v2194_v11  ;;  %v2142_v61 = vmax.f32 %v1948_v51, 0.0 }
 0x2a9   : > { %v1950_v57 = vpop.f32.mrf.mxu0  ;;  %8334 = vmatmul.mubr.msk.bf16.gmra.mxu1 %vm1218_vm1, %v2195_v46 }
 0x2aa   : > { %v1951_v29 = vadd.f32 %v9730_v43, %v1950_v57  ;;  %v2145_v58 = vmax.f32 %v1959_v52, 0.0 }
 0x2ab   : > { %v8271_v30 = vpop.f32.mrf.mxu0  ;;  %8444 = vmatmul.mubr.msk.bf16.gmra.mxu0 %vm699_vm0, %v9479_v49 }
 0x2ac   : > { %v2143_v63 = vmax.f32 %v1951_v29, 0.0  ;;  %v2197_v5 = vpack.c.bf16 %v2145_v58, %v2144_v0  ;;  %v1972_v9 = vadd.f32 %v8271_v30, %v9730_v43  ;;  %8447 = vmatprep.mubr.msk.bf16.mxu0 %vm699_vm0, %v9481_v50  ;;  %v9062_v50 = vld [vmem:[%s11538_s3 + $0x70] sm:$0xff]  }
 0x2ad   : > { %v1963_v1 = vpop.f32.mrf.mxu0 }
 0x2ae   : > { %v2196_v3 = vpack.c.bf16 %v2143_v63, %v2142_v61  ;;  %v1964_v8 = vadd.f32 %v9730_v43, %v1963_v1  ;;  %v2148_v19 = vmax.f32 %v1972_v9, 0.0 }
 0x2af   : > { %v8272_v6 = vpop.f32.mrf.mxu0 }
 0x2b0   : > { %v1975_v17 = vadd.f32 %v8272_v6, %v9730_v43  ;;  %8337 = vmatprep.mubr.msk.bf16.mxu1 %vm1218_vm1, %v2196_v3  ;;  %v2146_v10 = vmax.f32 %v1964_v8, 0.0 }
 0x2b1   : > { %v1966_v18 = vpop.f32.mrf.mxu0  ;;  %8338 = vmatmul.mubr.msk.bf16.gmra.mxu1 %vm1218_vm1, %v2197_v5 }
 0x2b2   : > { %v1967_v35 = vadd.f32 %v9730_v43, %v1966_v18  ;;  %v2149_v62 = vmax.f32 %v1975_v17, 0.0 }
 0x2b3   : > { %v8275_v36 = vpop.f32.mrf.mxu0  ;;  %8448 = vmatmul.mubr.msk.bf16.gmra.mxu0 %vm699_vm0, %v9489_v55 }
 0x2b4   : > { %v2147_v15 = vmax.f32 %v1967_v35, 0.0  ;;  %v2199_v26 = vpack.c.bf16 %v2149_v62, %v2148_v19  ;;  %v1988_v34 = vadd.f32 %v8275_v36, %v9730_v43 }
 0x2b5   : > { %v1979_v20 = vpop.f32.mrf.mxu0 }
 0x2b6   : > { %v2198_v25 = vpack.c.bf16 %v2147_v15, %v2146_v10  ;;  %v1980_v28 = vadd.f32 %v9730_v43, %v1979_v20  ;;  %v2152_v16 = vmax.f32 %v1988_v34, 0.0 }
 0x2b7   : > { %v8276_v27 = vpop.f32.mrf.mxu0 }
 0x2b8   : > { %v1991_v33 = vadd.f32 %v8276_v27, %v9730_v43  ;;  %8341 = vmatprep.mubr.msk.bf16.mxu1 %vm1218_vm1, %v2198_v25  ;;  %v2150_v38 = vmax.f32 %v1980_v28, 0.0 }
 0x2b9   : > { %v1982_v37 = vpop.f32.mrf.mxu0  ;;  %8342 = vmatmul.mubr.msk.bf16.gmra.mxu1 %vm1218_vm1, %v2199_v26 }
 0x2ba   : > { %v1983_v41 = vadd.f32 %v9730_v43, %v1982_v37  ;;  %v2153_v23 = vmax.f32 %v1991_v33, 0.0 }
 0x2bb   : > { %v8279_v42 = vpop.f32.mrf.mxu0 }
 0x2bc   : > { %v2151_v24 = vmax.f32 %v1983_v41, 0.0  ;;  %v2201_v45 = vpack.c.bf16 %v2153_v23, %v2152_v16  ;;  %v2004_v51 = vadd.f32 %v8279_v42, %v9730_v43 }
 0x2bd   : > { %v1995_v44 = vpop.f32.mrf.mxu0 }
 0x2be   : > { %v2200_v7 = vpack.c.bf16 %v2151_v24, %v2150_v38  ;;  %v1996_v46 = vadd.f32 %v9730_v43, %v1995_v44  ;;  %v2156_v58 = vmax.f32 %v2004_v51, 0.0 }
 0x2bf   : > { %v8280_v11 = vpop.f32.mrf.mxu0 }
 0x2c0   : > { %v2007_v12 = vadd.f32 %v8280_v11, %v9730_v43  ;;  %8345 = vmatprep.mubr.msk.bf16.mxu1 %vm1218_vm1, %v2200_v7  ;;  %v2154_v57 = vmax.f32 %v1996_v46, 0.0 }
 0x2c1   : > { %v1998_v52 = vpop.f32.mrf.mxu0  ;;  %8346 = vmatmul.mubr.msk.bf16.gmra.mxu1 %vm1218_vm1, %v2201_v45 }
 0x2c2   : > { %v1999_v47 = vadd.f32 %v9730_v43, %v1998_v52  ;;  %v2157_v56 = vmax.f32 %v2007_v12, 0.0 }
 0x2c3   : > { %v8283_v48 = vpop.f32.mrf.mxu0 }
 0x2c4   : > { %v2155_v29 = vmax.f32 %v1999_v47, 0.0  ;;  %v2203_v63 = vpack.c.bf16 %v2157_v56, %v2156_v58  ;;  %v2020_v5 = vadd.f32 %v8283_v48, %v9730_v43 }
 0x2c5   : > { %v2011_v30 = vpop.f32.mrf.mxu0 }
 0x2c6   : > { %v2202_v61 = vpack.c.bf16 %v2155_v29, %v2154_v57  ;;  %v2012_v1 = vadd.f32 %v9730_v43, %v2011_v30  ;;  %v2160_v18 = vmax.f32 %v2020_v5, 0.0 }
 0x2c7   : > { %v8284_v0 = vpop.f32.mrf.mxu0 }
 0x2c8   : > { %v2023_v3 = vadd.f32 %v8284_v0, %v9730_v43  ;;  %8349 = vmatprep.mubr.msk.bf16.mxu1 %vm1218_vm1, %v2202_v61  ;;  %v2158_v17 = vmax.f32 %v2012_v1, 0.0 }
 0x2c9   : > { %v2014_v6 = vpop.f32.mrf.mxu0  ;;  %8350 = vmatmul.mubr.msk.bf16.gmra.mxu1 %vm1218_vm1, %v2203_v63 }
 0x2ca   : > { %v2015_v53 = vadd.f32 %v9730_v43, %v2014_v6  ;;  %v2161_v8 = vmax.f32 %v2023_v3, 0.0 }
 0x2cb   : > { %v8287_v54 = vpop.f32.mrf.mxu0 }
 0x2cc   : > { %v2159_v9 = vmax.f32 %v2015_v53, 0.0  ;;  %v2205_v36 = vpack.c.bf16 %v2161_v8, %v2160_v18  ;;  %v2036_v20 = vadd.f32 %v8287_v54, %v9730_v43 }
 0x2cd   : > { %v2027_v35 = vpop.f32.mrf.mxu0 }
 0x2ce   : > { %v2204_v62 = vpack.c.bf16 %v2159_v9, %v2158_v17  ;;  %v2028_v15 = vadd.f32 %v9730_v43, %v2027_v35  ;;  %v2164_v33 = vmax.f32 %v2036_v20, 0.0 }
 0x2cf   : > { %v8288_v10 = vpop.f32.mrf.mxu0 }
 0x2d0   : > { %v2039_v19 = vadd.f32 %v8288_v10, %v9730_v43  ;;  %8353 = vmatprep.mubr.msk.bf16.mxu1 %vm1218_vm1, %v2204_v62  ;;  %v2162_v27 = vmax.f32 %v2028_v15, 0.0 }
 0x2d1   : > { %v2030_v25 = vpop.f32.mrf.mxu0  ;;  %8354 = vmatmul.mubr.msk.bf16.gmra.mxu1 %vm1218_vm1, %v2205_v36 }
 0x2d2   : > { %v2031_v59 = vadd.f32 %v9730_v43, %v2030_v25  ;;  %v2165_v26 = vmax.f32 %v2039_v19, 0.0 }
 0x2d3   : > { %v8291_v60 = vpop.f32.mrf.mxu0 }
 0x2d4   : > { %v2163_v28 = vmax.f32 %v2031_v59, 0.0  ;;  %v2207_v41 = vpack.c.bf16 %v2165_v26, %v2164_v33  ;;  %v2052_v24 = vadd.f32 %v8291_v60, %v9730_v43 }
 0x2d5   : > { %v2043_v34 = vpop.f32.mrf.mxu0 }
 0x2d6   : > { %v2206_v37 = vpack.c.bf16 %v2163_v28, %v2162_v27  ;;  %v2044_v42 = vadd.f32 %v9730_v43, %v2043_v34  ;;  %v2168_v11 = vmax.f32 %v2052_v24, 0.0 }
 0x2d7   : > { %v8292_v23 = vpop.f32.mrf.mxu0 }
 0x2d8   : > { %v2055_v38 = vadd.f32 %v8292_v23, %v9730_v43  ;;  %8357 = vmatprep.mubr.msk.bf16.mxu1 %vm1218_vm1, %v2206_v37  ;;  %v2166_v7 = vmax.f32 %v2044_v42, 0.0 }
 0x2d9   : > { %v2046_v16 = vpop.f32.mrf.mxu0  ;;  %8358 = vmatmul.mubr.msk.bf16.gmra.mxu1 %vm1218_vm1, %v2207_v41 }
 0x2da   : > { %v2047_v2 = vadd.f32 %v9730_v43, %v2046_v16  ;;  %v2169_v44 = vmax.f32 %v2055_v38, 0.0 }
 0x2db   : > { %v8295_v4 = vpop.f32.mrf.mxu0 }
 0x2dc   : > { %v2167_v45 = vmax.f32 %v2047_v2, 0.0  ;;  %v2209_v51 = vpack.c.bf16 %v2169_v44, %v2168_v11  ;;  %v2068_v48 = vadd.f32 %v8295_v4, %v9730_v43 }
 0x2dd   : > { %v2059_v46 = vpop.f32.mrf.mxu0 }
 0x2de   : > { %v2208_v12 = vpack.c.bf16 %v2167_v45, %v2166_v7  ;;  %v2060_v47 = vadd.f32 %v9730_v43, %v2059_v46  ;;  %v2172_v61 = vmax.f32 %v2068_v48, 0.0  ;;  %v9914_v45 = vld [vmem:[%s11543_s8 + $0x3] ss:$0 sm:$0xff] }
 0x2df   : > { %v8296_v52 = vpop.f32.mrf.mxu0 }
 0x2e0   : > { %v2071_v56 = vadd.f32 %v8296_v52, %v9730_v43  ;;  %8361 = vmatprep.mubr.msk.bf16.mxu1 %vm1218_vm1, %v2208_v12  ;;  %v2170_v58 = vmax.f32 %v2060_v47, 0.0  ;;  %v9063_v52 = vld [vmem:[%s11538_s3 + $0x68] sm:$0xff]   ;;  %v9064_v47 = vld [vmem:[%s11538_s3 + $0x60] sm:$0xff]  }
 0x2e1   : > { %v2062_v57 = vpop.f32.mrf.mxu0  ;;  %8362 = vmatmul.mubr.msk.bf16.gmra.mxu1 %vm1218_vm1, %v2209_v51 }
 0x2e2   : > { %v2063_v13 = vadd.f32 %v9730_v43, %v2062_v57  ;;  %v2173_v29 = vmax.f32 %v2071_v56, 0.0 }
 0x2e3   : > { %v8299_v14 = vpop.f32.mrf.mxu0 }
 0x2e4   : > { %v2171_v30 = vmax.f32 %v2063_v13, 0.0  ;;  %v2211_v1 = vpack.c.bf16 %v2173_v29, %v2172_v61  ;;  %v2084_v53 = vadd.f32 %v8299_v14, %v9730_v43 }
 0x2e5   : > { %v2075_v63 = vpop.f32.mrf.mxu0 }
 0x2e6   : > { %v2210_v0 = vpack.c.bf16 %v2171_v30, %v2170_v58  ;;  %v2076_v5 = vadd.f32 %v9730_v43, %v2075_v63  ;;  %v2176_v18 = vmax.f32 %v2084_v53, 0.0 }
 0x2e7   : > { %v8300_v3 = vpop.f32.mrf.mxu0 }
 0x2e8   : > { %v2087_v6 = vadd.f32 %v8300_v3, %v9730_v43  ;;  %8365 = vmatprep.mubr.msk.bf16.mxu1 %vm1218_vm1, %v2210_v0  ;;  %v2174_v17 = vmax.f32 %v2076_v5, 0.0 }
 0x2e9   : > { %v2078_v8 = vpop.f32.mrf.mxu0  ;;  %8366 = vmatmul.mubr.msk.bf16.gmra.mxu1 %vm1218_vm1, %v2211_v1 }
 0x2ea   : > { %v2079_v21 = vadd.f32 %v9730_v43, %v2078_v8  ;;  %v2177_v54 = vmax.f32 %v2087_v6, 0.0 }
 0x2eb   : > { %v8303_v22 = vpop.f32.mrf.mxu0 }
 0x2ec   : > { %v2175_v9 = vmax.f32 %v2079_v21, 0.0  ;;  %v2213_v36 = vpack.c.bf16 %v2177_v54, %v2176_v18  ;;  %v2100_v20 = vadd.f32 %v8303_v22, %v9730_v43 }
 0x2ed   : > { %v2091_v35 = vpop.f32.mrf.mxu0 }
 0x2ee   : > { %v2212_v62 = vpack.c.bf16 %v2175_v9, %v2174_v17  ;;  %v2092_v15 = vadd.f32 %v9730_v43, %v2091_v35  ;;  %v2180_v27 = vmax.f32 %v2100_v20, 0.0 }
 0x2ef   : > { %v8304_v10 = vpop.f32.mrf.mxu0 }
 0x2f0   : > { %v2103_v19 = vadd.f32 %v8304_v10, %v9730_v43  ;;  %8369 = vmatprep.mubr.msk.bf16.mxu1 %vm1218_vm1, %v2212_v62  ;;  %v2178_v26 = vmax.f32 %v2092_v15, 0.0 }
 0x2f1   : > { %v2094_v25 = vpop.f32.mrf.mxu0  ;;  %8370 = vmatmul.mubr.msk.bf16.gmra.mxu1 %vm1218_vm1, %v2213_v36 }
 0x2f2   : > { %v2095_v31 = vadd.f32 %v9730_v43, %v2094_v25  ;;  %v2181_v59 = vmax.f32 %v2103_v19, 0.0 }
 0x2f3   : > { %v8307_v32 = vpop.f32.mrf.mxu0 }
 0x2f4   : > { %v2179_v60 = vmax.f32 %v2095_v31, 0.0  ;;  %v2215_v34 = vpack.c.bf16 %v2181_v59, %v2180_v27  ;;  %v2116_v42 = vadd.f32 %v8307_v32, %v9730_v43 }
 0x2f5   : > { %v2107_v28 = vpop.f32.mrf.mxu0 }
 0x2f6   : > { %v2214_v33 = vpack.c.bf16 %v2179_v60, %v2178_v26  ;;  %v2108_v41 = vadd.f32 %v9730_v43, %v2107_v28  ;;  %v2184_v2 = vmax.f32 %v2116_v42, 0.0 }
 0x2f7   : > { %v8308_v37 = vpop.f32.mrf.mxu0 }
 0x2f8   : > { %v2119_v23 = vadd.f32 %v8308_v37, %v9730_v43  ;;  %8373 = vmatprep.mubr.msk.bf16.mxu1 %vm1218_vm1, %v2214_v33  ;;  %v2182_v40 = vmax.f32 %v2108_v41, 0.0 }
 0x2f9   : > { %v2110_v38 = vpop.f32.mrf.mxu0  ;;  %8374 = vmatmul.mubr.msk.bf16.gmra.mxu1 %vm1218_vm1, %v2215_v34 }
 0x2fa   : > { %v2111_v39 = vadd.f32 %v9730_v43, %v2110_v38  ;;  %v2185_v24 = vmax.f32 %v2119_v23, 0.0  ;;  %v9061_v43 = vld [vmem:[%s11538_s3 + $0x78] sm:$0xff]  }
 0x2fb   : > { %8523 = vmatprep.subr.bf16.mxu0 %v9061_v43 }
 0x2fc   : > { %v2183_v16 = vmax.f32 %v2111_v39, 0.0  ;;  %v2217_v4 = vpack.c.bf16 %v2185_v24, %v2184_v2  ;;  %8524 = vmatpush3.bf16.msra.mxu0 %v9061_v43 }
 0x2fd   : > { %8525 = vmatprep.subr.bf16.mxu0 %v9062_v50 }
 0x2fe   : > { %v2216_v44 = vpack.c.bf16 %v2183_v16, %v2182_v40 }
 0x300   : > { %8377 = vmatprep.mubr.msk.bf16.mxu1 %vm1218_vm1, %v2216_v44  ;;  %8526 = vmatpush3.bf16.msra.mxu0 %v9062_v50 }
 0x301   : > { %8378 = vmatmul.mubr.msk.bf16.gmra.mxu1 %vm1218_vm1, %v2217_v4  ;;  %8527 = vmatprep.subr.bf16.mxu0 %v9063_v52 }
 0x304   : > { %8528 = vmatpush3.bf16.msra.mxu0 %v9063_v52 }
 0x305   : > { %8529 = vmatprep.subr.bf16.mxu0 %v9064_v47 }
 0x308   : > { %8530 = vmatpush3.bf16.msra.mxu0 %v9064_v47 }
 0x349   : > { %v8319_v49 = vpop.f32.mrf.mxu1 }
 0x34a   : > { %v2394_v12 = vadd.f32 %v8319_v49, %v9914_v45 }
 0x34b   : > { %v2385_v7 = vpop.f32.mrf.mxu1 }
 0x34c   : > { %v2386_v55 = vadd.f32 %v9914_v45, %v2385_v7  ;;  %v2642_v14 = vmax.f32 %v2394_v12, 0.0 }
 0x34d   : > { %v8320_v11 = vpop.f32.mrf.mxu1 }
 0x34e   : > { %v2397_v46 = vadd.f32 %v8320_v11, %v9914_v45  ;;  %v2640_v13 = vmax.f32 %v2386_v55, 0.0 }
 0x34f   : > { %v2388_v51 = vpop.f32.mrf.mxu1 }
 0x350   : > { %v2389_v56 = vadd.f32 %v9914_v45, %v2388_v51  ;;  %v2643_v48 = vmax.f32 %v2397_v46, 0.0 }
 0x351   : > { %v8323_v57 = vpop.f32.mrf.mxu1 }
 0x352   : > { %v2641_v29 = vmax.f32 %v2389_v56, 0.0  ;;  %v2705_v61 = vpack.c.bf16 %v2643_v48, %v2642_v14  ;;  %v2410_v3 = vadd.f32 %v8323_v57, %v9914_v45 }
 0x353   : > { %v2401_v58 = vpop.f32.mrf.mxu1 }
 0x354   : > { %v2704_v30 = vpack.c.bf16 %v2641_v29, %v2640_v13  ;;  %v2402_v0 = vadd.f32 %v9914_v45, %v2401_v58  ;;  %v2646_v22 = vmax.f32 %v2410_v3, 0.0 }
 0x355   : > { %v8324_v63 = vpop.f32.mrf.mxu1 }
 0x356   : > { %v2413_v1 = vadd.f32 %v8324_v63, %v9914_v45  ;;  %8459 = vmatprep.mubr.msk.bf16.mxu1 %vm1218_vm1, %v2704_v30  ;;  %v2644_v21 = vmax.f32 %v2402_v0, 0.0 }
 0x357   : > { %v2404_v5 = vpop.f32.mrf.mxu1  ;;  %8460 = vmatmul.mubr.msk.bf16.vlgmr.msra.gmra.mxu1 %vm1218_vm1, %v2705_v61 }
 0x358   : > { %v2405_v6 = vadd.f32 %v9914_v45, %v2404_v5  ;;  %v2647_v53 = vmax.f32 %v2413_v1, 0.0 }
 0x359   : > { %v8327_v8 = vpop.f32.mrf.mxu1 }
 0x35a   : > { %v2645_v54 = vmax.f32 %v2405_v6, 0.0  ;;  %v2707_v18 = vpack.c.bf16 %v2647_v53, %v2646_v22  ;;  %v2426_v10 = vadd.f32 %v8327_v8, %v9914_v45 }
 0x35b   : > { %v2417_v17 = vpop.f32.mrf.mxu1 }
 0x35c   : > { %v2706_v9 = vpack.c.bf16 %v2645_v54, %v2644_v21  ;;  %v2418_v62 = vadd.f32 %v9914_v45, %v2417_v17  ;;  %v2650_v32 = vmax.f32 %v2426_v10, 0.0 }
 0x35d   : > { %v8328_v35 = vpop.f32.mrf.mxu1 }
 0x35e   : > { %v2429_v36 = vadd.f32 %v8328_v35, %v9914_v45  ;;  %8463 = vmatprep.mubr.msk.bf16.mxu1 %vm1218_vm1, %v2706_v9  ;;  %v2648_v31 = vmax.f32 %v2418_v62, 0.0 }
 0x35f   : > { %v2420_v15 = vpop.f32.mrf.mxu1  ;;  %8464 = vmatmul.mubr.msk.bf16.gmra.mxu1 %vm1218_vm1, %v2707_v18 }
 0x360   : > { %v2421_v19 = vadd.f32 %v9914_v45, %v2420_v15  ;;  %v2651_v20 = vmax.f32 %v2429_v36, 0.0 }
 0x361   : > { %v8331_v25 = vpop.f32.mrf.mxu1 }
 0x362   : > { %v2649_v59 = vmax.f32 %v2421_v19, 0.0  ;;  %v2709_v27 = vpack.c.bf16 %v2651_v20, %v2650_v32  ;;  %v2442_v37 = vadd.f32 %v8331_v25, %v9914_v45 }
 0x363   : > { %v2433_v26 = vpop.f32.mrf.mxu1 }
 0x364   : > { %v2708_v60 = vpack.c.bf16 %v2649_v59, %v2648_v31  ;;  %v2434_v33 = vadd.f32 %v9914_v45, %v2433_v26  ;;  %v2654_v40 = vmax.f32 %v2442_v37, 0.0 }
 0x365   : > { %v8332_v28 = vpop.f32.mrf.mxu1 }
 0x366   : > { %v2445_v34 = vadd.f32 %v8332_v28, %v9914_v45  ;;  %8467 = vmatprep.mubr.msk.bf16.mxu1 %vm1218_vm1, %v2708_v60  ;;  %v2652_v39 = vmax.f32 %v2434_v33, 0.0 }
 0x367   : > { %v2436_v41 = vpop.f32.mrf.mxu1  ;;  %8468 = vmatmul.mubr.msk.bf16.gmra.mxu1 %vm1218_vm1, %v2709_v27 }
 0x368   : > { %v2437_v23 = vadd.f32 %v9914_v45, %v2436_v41  ;;  %v2655_v42 = vmax.f32 %v2445_v34, 0.0 }
 0x369   : > { %v8335_v38 = vpop.f32.mrf.mxu1 }
 0x36a   : > { %v2653_v24 = vmax.f32 %v2437_v23, 0.0  ;;  %v2711_v44 = vpack.c.bf16 %v2655_v42, %v2654_v40  ;;  %v2458_v50 = vadd.f32 %v8335_v38, %v9914_v45 }
 0x36b   : > { %v2449_v16 = vpop.f32.mrf.mxu1 }
 0x36c   : > { %v2710_v2 = vpack.c.bf16 %v2653_v24, %v2652_v39  ;;  %v2450_v43 = vadd.f32 %v9914_v45, %v2449_v16  ;;  %v2658_v52 = vmax.f32 %v2458_v50, 0.0 }
 0x36d   : > { %v8336_v4 = vpop.f32.mrf.mxu1 }
 0x36e   : > { %v2461_v49 = vadd.f32 %v8336_v4, %v9914_v45  ;;  %8471 = vmatprep.mubr.msk.bf16.mxu1 %vm1218_vm1, %v2710_v2  ;;  %v2656_v12 = vmax.f32 %v2450_v43, 0.0 }
 0x36f   : > { %v2452_v7 = vpop.f32.mrf.mxu1  ;;  %8472 = vmatmul.mubr.msk.bf16.gmra.mxu1 %vm1218_vm1, %v2711_v44 }
 0x370   : > { %v2453_v11 = vadd.f32 %v9914_v45, %v2452_v7  ;;  %v2659_v55 = vmax.f32 %v2461_v49, 0.0 }
 0x371   : > { %v8339_v46 = vpop.f32.mrf.mxu1 }
 0x372   : > { %v2657_v51 = vmax.f32 %v2453_v11, 0.0  ;;  %v2713_v48 = vpack.c.bf16 %v2659_v55, %v2658_v52  ;;  %v2474_v14 = vadd.f32 %v8339_v46, %v9914_v45 }
 0x373   : > { %v2465_v47 = vpop.f32.mrf.mxu1 }
 0x374   : > { %v2712_v56 = vpack.c.bf16 %v2657_v51, %v2656_v12  ;;  %v2466_v13 = vadd.f32 %v9914_v45, %v2465_v47  ;;  %v2662_v3 = vmax.f32 %v2474_v14, 0.0 }
 0x375   : > { %v8340_v57 = vpop.f32.mrf.mxu1 }
 0x376   : > { %v2477_v29 = vadd.f32 %v8340_v57, %v9914_v45  ;;  %8475 = vmatprep.mubr.msk.bf16.mxu1 %vm1218_vm1, %v2712_v56  ;;  %v2660_v0 = vmax.f32 %v2466_v13, 0.0  ;;  %v9980_v13 = vpop.f32.mrf.mxu0 }
 0x377   : > { %v2468_v58 = vpop.f32.mrf.mxu1  ;;  %8476 = vmatmul.mubr.msk.bf16.gmra.mxu1 %vm1218_vm1, %v2713_v48 }
 0x378   : > { %v2469_v30 = vadd.f32 %v9914_v45, %v2468_v58  ;;  %v2663_v61 = vmax.f32 %v2477_v29, 0.0 }
 0x379   : > { %v8343_v63 = vpop.f32.mrf.mxu1 }
 0x37a   : > { %v2661_v1 = vmax.f32 %v2469_v30, 0.0  ;;  %v2715_v53 = vpack.c.bf16 %v2663_v61, %v2662_v3  ;;  %v2490_v22 = vadd.f32 %v8343_v63, %v9914_v45 }
 0x37b   : > { %v2481_v5 = vpop.f32.mrf.mxu1 }
 0x37c   : > { %v2714_v6 = vpack.c.bf16 %v2661_v1, %v2660_v0  ;;  %v2482_v21 = vadd.f32 %v9914_v45, %v2481_v5  ;;  %v2666_v10 = vmax.f32 %v2490_v22, 0.0  ;;  %v9982_v1 = vpop.f32.mrf.mxu0 }
 0x37d   : > { %v8344_v8 = vpop.f32.mrf.mxu1 }
 0x37e   : > { %v2493_v54 = vadd.f32 %v8344_v8, %v9914_v45  ;;  %8479 = vmatprep.mubr.msk.bf16.mxu1 %vm1218_vm1, %v2714_v6  ;;  %v2664_v62 = vmax.f32 %v2482_v21, 0.0  ;;  %v9990_v22 = vpop.f32.mrf.mxu0 }
 0x37f   : > { %v2484_v17 = vpop.f32.mrf.mxu1  ;;  %8480 = vmatmul.mubr.msk.bf16.gmra.mxu1 %vm1218_vm1, %v2715_v53 }
 0x380   : > { %v2485_v9 = vadd.f32 %v9914_v45, %v2484_v17  ;;  %v2667_v18 = vmax.f32 %v2493_v54, 0.0 }
 0x381   : > { %v8347_v35 = vpop.f32.mrf.mxu1 }
 0x382   : > { %v2665_v36 = vmax.f32 %v2485_v9, 0.0  ;;  %v2717_v20 = vpack.c.bf16 %v2667_v18, %v2666_v10  ;;  %v2506_v32 = vadd.f32 %v8347_v35, %v9914_v45 }
 0x383   : > { %v2497_v15 = vpop.f32.mrf.mxu1 }
 0x384   : > { %v2716_v19 = vpack.c.bf16 %v2665_v36, %v2664_v62  ;;  %v2498_v31 = vadd.f32 %v9914_v45, %v2497_v15  ;;  %v2670_v37 = vmax.f32 %v2506_v32, 0.0  ;;  %v9992_v15 = vpop.f32.mrf.mxu0 }
 0x385   : > { %v8348_v25 = vpop.f32.mrf.mxu1 }
 0x386   : > { %v2509_v59 = vadd.f32 %v8348_v25, %v9914_v45  ;;  %8483 = vmatprep.mubr.msk.bf16.mxu1 %vm1218_vm1, %v2716_v19  ;;  %v2668_v33 = vmax.f32 %v2498_v31, 0.0 }
 0x387   : > { %v2500_v26 = vpop.f32.mrf.mxu1  ;;  %8484 = vmatmul.mubr.msk.bf16.gmra.mxu1 %vm1218_vm1, %v2717_v20 }
 0x388   : > { %v2501_v60 = vadd.f32 %v9914_v45, %v2500_v26  ;;  %v2671_v27 = vmax.f32 %v2509_v59, 0.0 }
 0x389   : > { %v8351_v28 = vpop.f32.mrf.mxu1 }
 0x38a   : > { %v2669_v34 = vmax.f32 %v2501_v60, 0.0  ;;  %v2719_v42 = vpack.c.bf16 %v2671_v27, %v2670_v37  ;;  %v2522_v40 = vadd.f32 %v8351_v28, %v9914_v45  ;;  %v10000_v60 = vpop.f32.mrf.mxu0 }
 0x38b   : > { %v2513_v41 = vpop.f32.mrf.mxu1 }
 0x38c   : > { %v2718_v23 = vpack.c.bf16 %v2669_v34, %v2668_v33  ;;  %v2514_v39 = vadd.f32 %v9914_v45, %v2513_v41  ;;  %v2674_v50 = vmax.f32 %v2522_v40, 0.0 }
 0x38d   : > { %v8352_v38 = vpop.f32.mrf.mxu1 }
 0x38e   : > { %v2525_v24 = vadd.f32 %v8352_v38, %v9914_v45  ;;  %8487 = vmatprep.mubr.msk.bf16.mxu1 %vm1218_vm1, %v2718_v23  ;;  %v2672_v43 = vmax.f32 %v2514_v39, 0.0 }
 0x38f   : > { %v2516_v16 = vpop.f32.mrf.mxu1  ;;  %8488 = vmatmul.mubr.msk.bf16.gmra.mxu1 %vm1218_vm1, %v2719_v42  ;;  %v10002_v42 = vpop.f32.mrf.mxu0 }
 0x390   : > { %v2517_v2 = vadd.f32 %v9914_v45, %v2516_v16  ;;  %v2675_v44 = vmax.f32 %v2525_v24, 0.0 }
 0x391   : > { %v8355_v4 = vpop.f32.mrf.mxu1 }
 0x392   : > { %v2673_v49 = vmax.f32 %v2517_v2, 0.0  ;;  %v2721_v55 = vpack.c.bf16 %v2675_v44, %v2674_v50  ;;  %v2538_v52 = vadd.f32 %v8355_v4, %v9914_v45  ;;  %v10010_v4 = vpop.f32.mrf.mxu0 }
 0x393   : > { %v2529_v7 = vpop.f32.mrf.mxu1 }
 0x394   : > { %v2720_v11 = vpack.c.bf16 %v2673_v49, %v2672_v43  ;;  %v2530_v12 = vadd.f32 %v9914_v45, %v2529_v7  ;;  %v2678_v58 = vmax.f32 %v2538_v52, 0.0 }
 0x395   : > { %v8356_v46 = vpop.f32.mrf.mxu1 }
 0x396   : > { %v2541_v51 = vadd.f32 %v8356_v46, %v9914_v45  ;;  %8491 = vmatprep.mubr.msk.bf16.mxu1 %vm1218_vm1, %v2720_v11  ;;  %v2676_v29 = vmax.f32 %v2530_v12, 0.0  ;;  %v10012_v12 = vpop.f32.mrf.mxu0 }
 0x397   : > { %v2532_v47 = vpop.f32.mrf.mxu1  ;;  %8492 = vmatmul.mubr.msk.bf16.gmra.mxu1 %vm1218_vm1, %v2721_v55 }
 0x398   : > { %v2533_v56 = vadd.f32 %v9914_v45, %v2532_v47  ;;  %v2679_v48 = vmax.f32 %v2541_v51, 0.0 }
 0x399   : > { %v8359_v57 = vpop.f32.mrf.mxu1 }
 0x39a   : > { %v2677_v14 = vmax.f32 %v2533_v56, 0.0  ;;  %v2723_v63 = vpack.c.bf16 %v2679_v48, %v2678_v58  ;;  %v2554_v6 = vadd.f32 %v8359_v57, %v9914_v45 }
 0x39b   : > { %v2545_v30 = vpop.f32.mrf.mxu1 }
 0x39c   : > { %v2722_v61 = vpack.c.bf16 %v2677_v14, %v2676_v29  ;;  %v2546_v3 = vadd.f32 %v9914_v45, %v2545_v30  ;;  %v2682_v18 = vmax.f32 %v2554_v6, 0.0  ;;  %v10020_v14 = vpop.f32.mrf.mxu0 }
 0x39d   : > { %v8360_v0 = vpop.f32.mrf.mxu1 }
 0x39e   : > { %v2557_v5 = vadd.f32 %v8360_v0, %v9914_v45  ;;  %8495 = vmatprep.mubr.msk.bf16.mxu1 %vm1218_vm1, %v2722_v61  ;;  %v2680_v17 = vmax.f32 %v2546_v3, 0.0  ;;  %v10022_v6 = vpop.f32.mrf.mxu0 }
 0x39f   : > { %v2548_v53 = vpop.f32.mrf.mxu1  ;;  %8496 = vmatmul.mubr.msk.bf16.gmra.mxu1 %vm1218_vm1, %v2723_v63 }
 0x3a0   : > { %v2549_v8 = vadd.f32 %v9914_v45, %v2548_v53  ;;  %v2683_v21 = vmax.f32 %v2557_v5, 0.0 }
 0x3a1   : > { %v8363_v54 = vpop.f32.mrf.mxu1 }
 0x3a2   : > { %v2681_v9 = vmax.f32 %v2549_v8, 0.0  ;;  %v2725_v36 = vpack.c.bf16 %v2683_v21, %v2682_v18  ;;  %v2570_v25 = vadd.f32 %v8363_v54, %v9914_v45 }
 0x3a3   : > { %v2561_v35 = vpop.f32.mrf.mxu1 }
 0x3a4   : > { %v2724_v62 = vpack.c.bf16 %v2681_v9, %v2680_v17  ;;  %v2562_v19 = vadd.f32 %v9914_v45, %v2561_v35  ;;  %v2686_v33 = vmax.f32 %v2570_v25, 0.0  ;;  %v10030_v35 = vpop.f32.mrf.mxu0 }
 0x3a5   : > { %v8364_v10 = vpop.f32.mrf.mxu1 }
 0x3a6   : > { %v2573_v20 = vadd.f32 %v8364_v10, %v9914_v45  ;;  %8499 = vmatprep.mubr.msk.bf16.mxu1 %vm1218_vm1, %v2724_v62  ;;  %v2684_v27 = vmax.f32 %v2562_v19, 0.0 }
 0x3a7   : > { %v2564_v31 = vpop.f32.mrf.mxu1  ;;  %8500 = vmatmul.mubr.msk.bf16.gmra.mxu1 %vm1218_vm1, %v2725_v36 }
 0x3a8   : > { %v2565_v59 = vadd.f32 %v9914_v45, %v2564_v31  ;;  %v2687_v32 = vmax.f32 %v2573_v20, 0.0 }
 0x3a9   : > { %v8367_v26 = vpop.f32.mrf.mxu1 }
 0x3aa   : > { %v2685_v28 = vmax.f32 %v2565_v59, 0.0  ;;  %v2727_v41 = vpack.c.bf16 %v2687_v32, %v2686_v33  ;;  %v2586_v24 = vadd.f32 %v8367_v26, %v9914_v45  ;;  %v10032_v59 = vpop.f32.mrf.mxu0 }
 0x3ab   : > { %v2577_v34 = vpop.f32.mrf.mxu1 }
 0x3ac   : > { %v2726_v37 = vpack.c.bf16 %v2685_v28, %v2684_v27  ;;  %v2578_v38 = vadd.f32 %v9914_v45, %v2577_v34  ;;  %v2690_v50 = vmax.f32 %v2586_v24, 0.0 }
 0x3ad   : > { %v8368_v23 = vpop.f32.mrf.mxu1 }
 0x3ae   : > { %v2589_v39 = vadd.f32 %v8368_v23, %v9914_v45  ;;  %8503 = vmatprep.mubr.msk.bf16.mxu1 %vm1218_vm1, %v2726_v37  ;;  %v2688_v43 = vmax.f32 %v2578_v38, 0.0  ;;  %v10040_v37 = vpop.f32.mrf.mxu0 }
 0x3af   : > { %v2580_v40 = vpop.f32.mrf.mxu1  ;;  %8504 = vmatmul.mubr.msk.bf16.gmra.mxu1 %vm1218_vm1, %v2727_v41 }
 0x3b0   : > { %v2581_v16 = vadd.f32 %v9914_v45, %v2580_v40  ;;  %v2691_v2 = vmax.f32 %v2589_v39, 0.0  ;;  %v10042_v40 = vpop.f32.mrf.mxu0 }
 0x3b1   : > { %v8371_v44 = vpop.f32.mrf.mxu1 }
 0x3b2   : > { %v2689_v49 = vmax.f32 %v2581_v16, 0.0  ;;  %v2729_v55 = vpack.c.bf16 %v2691_v2, %v2690_v50  ;;  %v2602_v47 = vadd.f32 %v8371_v44, %v9914_v45  ;;  %v10046_v16 = vpop.f32.mrf.mxu0 }
 0x3b3   : > { %v2593_v7 = vpop.f32.mrf.mxu1 }
 0x3b4   : > { %v2728_v11 = vpack.c.bf16 %v2689_v49, %v2688_v43  ;;  %v2594_v51 = vadd.f32 %v9914_v45, %v2593_v7  ;;  %v2694_v61 = vmax.f32 %v2602_v47, 0.0  ;;  %v10048_v2 = vpop.f32.mrf.mxu0 }
 0x3b5   : > { %v8372_v46 = vpop.f32.mrf.mxu1 }
 0x3b6   : > { %v2605_v52 = vadd.f32 %v8372_v46, %v9914_v45  ;;  %8507 = vmatprep.mubr.msk.bf16.mxu1 %vm1218_vm1, %v2728_v11  ;;  %v2692_v58 = vmax.f32 %v2594_v51, 0.0  ;;  %v10050_v44 = vpop.f32.mrf.mxu0  ;;  %v9065_v51 = vld [vmem:[%s11538_s3 + $0x98] sm:$0xff]  }
 0x3b7   : > { %v2596_v56 = vpop.f32.mrf.mxu1  ;;  %8508 = vmatmul.mubr.msk.bf16.gmra.mxu1 %vm1218_vm1, %v2729_v55  ;;  %8595 = vmatprep.subr.bf16.mxu1 %v9065_v51 }
 0x3b8   : > { %v2597_v48 = vadd.f32 %v9914_v45, %v2596_v56  ;;  %v2695_v57 = vmax.f32 %v2605_v52, 0.0  ;;  %8596 = vmatpush3.bf16.msra.mxu1 %v9065_v51 }
 0x3b9   : > { %v8375_v29 = vpop.f32.mrf.mxu1 }
 0x3ba   : > { %v2693_v30 = vmax.f32 %v2597_v48, 0.0  ;;  %v2731_v3 = vpack.c.bf16 %v2695_v57, %v2694_v61  ;;  %v2618_v21 = vadd.f32 %v8375_v29, %v9914_v45 }
 0x3bb   : > { %v2609_v63 = vpop.f32.mrf.mxu1 }
 0x3bc   : > { %v2730_v0 = vpack.c.bf16 %v2693_v30, %v2692_v58  ;;  %v2610_v53 = vadd.f32 %v9914_v45, %v2609_v63  ;;  %v2698_v10 = vmax.f32 %v2618_v21, 0.0 }
 0x3bd   : > { %v8376_v5 = vpop.f32.mrf.mxu1 }
 0x3be   : > { %v2621_v8 = vadd.f32 %v8376_v5, %v9914_v45  ;;  %8511 = vmatprep.mubr.msk.bf16.mxu1 %vm1218_vm1, %v2730_v0  ;;  %v2696_v62 = vmax.f32 %v2610_v53, 0.0 }
 0x3bf   : > { %v2612_v54 = vpop.f32.mrf.mxu1  ;;  %8512 = vmatmul.mubr.msk.bf16.gmra.mxu1 %vm1218_vm1, %v2731_v3  ;;  %v9066_v3 = vld [vmem:[%s11538_s3 + $0x90] sm:$0xff]  }
 0x3c0   : > { %v2613_v17 = vadd.f32 %v9914_v45, %v2612_v54  ;;  %v2699_v9 = vmax.f32 %v2621_v8, 0.0  ;;  %v10095_v8 = vld [vmem:[%s11543_s8 + $0x4] ss:$0 sm:$0xff]  ;;  %8597 = vmatprep.subr.bf16.mxu1 %v9066_v3 }
 0x3c1   : > { %v8379_v18 = vpop.f32.mrf.mxu1  ;;  %8598 = vmatpush3.bf16.msra.mxu1 %v9066_v3 }
 0x3c2   : > { %v2697_v36 = vmax.f32 %v2613_v17, 0.0  ;;  %v2733_v25 = vpack.c.bf16 %v2699_v9, %v2698_v10  ;;  %v2634_v27 = vadd.f32 %v8379_v18, %v9914_v45 }
 0x3c3   : > { %v2625_v19 = vpop.f32.mrf.mxu1 }
 0x3c4   : > { %v2732_v20 = vpack.c.bf16 %v2697_v36, %v2696_v62  ;;  %v2626_v32 = vadd.f32 %v9914_v45, %v2625_v19  ;;  %v2702_v38 = vmax.f32 %v2634_v27, 0.0  ;;  %v9067_v36 = vld [vmem:[%s11538_s3 + $0x88] sm:$0xff]  }
 0x3c5   : > { %v8380_v31 = vpop.f32.mrf.mxu1  ;;  %8599 = vmatprep.subr.bf16.mxu1 %v9067_v36 }
 0x3c6   : > { %v2637_v26 = vadd.f32 %v8380_v31, %v9914_v45  ;;  %8515 = vmatprep.mubr.msk.bf16.mxu1 %vm1218_vm1, %v2732_v20  ;;  %v2700_v41 = vmax.f32 %v2626_v32, 0.0  ;;  %8600 = vmatpush3.bf16.msra.mxu1 %v9067_v36 }
 0x3c7   : > { %v2628_v28 = vpop.f32.mrf.mxu1  ;;  %8516 = vmatmul.mubr.msk.bf16.gmra.mxu1 %vm1218_vm1, %v2733_v25 }
 0x3c8   : > { %v2629_v33 = vadd.f32 %v9914_v45, %v2628_v28  ;;  %v2703_v34 = vmax.f32 %v2637_v26, 0.0  ;;  %v10052_v45 = vpop.f32.mrf.mxu0 }
 0x3ca   : > { %v2701_v23 = vmax.f32 %v2629_v33, 0.0  ;;  %v2735_v24 = vpack.c.bf16 %v2703_v34, %v2702_v38  ;;  %v10054_v43 = vpop.f32.mrf.mxu0 }
 0x3cc   : > { %v2734_v39 = vpack.c.bf16 %v2701_v23, %v2700_v41  ;;  %v10056_v49 = vpop.f32.mrf.mxu0 }
 0x3ce   : > { %8519 = vmatprep.mubr.msk.bf16.mxu1 %vm1218_vm1, %v2734_v39  ;;  %v10058_v50 = vpop.f32.mrf.mxu0 }
 0x3cf   : > { %8520 = vmatmul.mubr.msk.bf16.gmra.mxu1 %vm1218_vm1, %v2735_v24 }
 0x3d0   : > { %v10060_v7 = vpop.f32.mrf.mxu0 }
 0x3d2   : > { %v10062_v11 = vpop.f32.mrf.mxu0 }
 0x3d4   : > { %v10064_v55 = vpop.f32.mrf.mxu0 }
 0x3d6   : > { %v10066_v46 = vpop.f32.mrf.mxu0 }
 0x3d8   : > { %v10071_v52 = vpop.f32.mrf.mxu0 }
 0x3da   : > { %v10073_v47 = vpop.f32.mrf.mxu0 }
 0x3dc   : > { %v10075_v56 = vpop.f32.mrf.mxu0 }
 0x3de   : > { %v10077_v48 = vpop.f32.mrf.mxu0 }
 0x3e0   : > { %v10079_v57 = vpop.f32.mrf.mxu0 }
 0x3e2   : > { %v10081_v29 = vpop.f32.mrf.mxu0 }
 0x3e4   : > { %v10083_v58 = vpop.f32.mrf.mxu0 }
 0x3e6   : > { %v10085_v63 = vpop.f32.mrf.mxu0 }
 0x3e8   : > { %v10098_v17 = vpop.f32.mrf.mxu0 }
 0x3ea   : > { %v10111_v25 = vpop.f32.mrf.mxu0 }
 0x3ec   : > { %v10116_v38 = vpop.f32.mrf.mxu0 }
 0x417   : > { %v8461_v30 = vpop.f32.mrf.mxu1 }
 0x418   : > { %v3220_v5 = vadd.f32 %v8461_v30, %v9980_v13 }
 0x419   : > { %v3211_v61 = vpop.f32.mrf.mxu1 }
 0x41a   : > { %v3212_v0 = vadd.f32 %v3211_v61, %v9982_v1  ;;  %v3473_v13 = vadd.f32 %v10095_v8, %v3220_v5 }
 0x41b   : > { %v8462_v53 = vpop.f32.mrf.mxu1 }
 0x41c   : > { %v3223_v21 = vadd.f32 %v8462_v53, %v9990_v22  ;;  %v3471_v1 = vadd.f32 %v10095_v8, %v3212_v0  ;;  %v9068_v22 = vld [vmem:[%s11538_s3 + $0x80] sm:$0xff]   ;;  %v3537_v26 = vmax.f32 %v3473_v13, 0.0  ;;  %v10125_v0 = vpop.f32.mrf.mxu0 }
 0x41d   : > { %v3214_v54 = vpop.f32.mrf.mxu1  ;;  %8601 = vmatprep.subr.bf16.mxu1 %v9068_v22 }
 0x41e   : > { %v3474_v9 = vadd.f32 %v10095_v8, %v3223_v21  ;;  %v3215_v18 = vadd.f32 %v3214_v54, %v9992_v15  ;;  %v3535_v31 = vmax.f32 %v3471_v1, 0.0  ;;  %8602 = vmatpush3.bf16.msra.mxu1 %v9068_v22 }
 0x41f   : > { %v8465_v62 = vpop.f32.mrf.mxu1 }
 0x420   : > { %v3472_v10 = vadd.f32 %v10095_v8, %v3215_v18  ;;  %v3538_v19 = vmax.f32 %v3474_v9, 0.0  ;;  %v3236_v27 = vadd.f32 %v8465_v62, %v10000_v60  ;;  %v10130_v62 = vpop.f32.mrf.mxu0 }
 0x421   : > { %v3227_v20 = vpop.f32.mrf.mxu1 }
 0x422   : > { %v3536_v15 = vmax.f32 %v3472_v10, 0.0  ;;  %v3228_v32 = vadd.f32 %v3227_v20, %v10002_v42  ;;  %v3600_v41 = vpack.c.bf16 %v3538_v19, %v3537_v26  ;;  %v3477_v60 = vadd.f32 %v10095_v8, %v3236_v27 }
 0x423   : > { %v8466_v28 = vpop.f32.mrf.mxu1 }
 0x424   : > { %v3599_v33 = vpack.c.bf16 %v3536_v15, %v3535_v31  ;;  %v3239_v34 = vadd.f32 %v8466_v28, %v10010_v4  ;;  %v3475_v39 = vadd.f32 %v10095_v8, %v3228_v32  ;;  %v3541_v21 = vmax.f32 %v3477_v60, 0.0  ;;  %v10139_v31 = vpop.f32.mrf.mxu0 }
 0x425   : > { %v3230_v23 = vpop.f32.mrf.mxu1 }
 0x426   : > { %v3478_v24 = vadd.f32 %v10095_v8, %v3239_v34  ;;  %v3231_v51 = vadd.f32 %v3230_v23, %v10012_v12  ;;  %8531 = vmatprep.mubr.msk.bf16.mxu0 %vm1218_vm1, %v3599_v33  ;;  %v3539_v3 = vmax.f32 %v3475_v39, 0.0  ;;  %v10144_v39 = vpop.f32.mrf.mxu0 }
 0x427   : > { %v8469_v42 = vpop.f32.mrf.mxu1  ;;  %8532 = vmatmul.mubr.msk.bf16.vlgmr.msra.gmra.mxu0 %vm1218_vm1, %v3600_v41 }
 0x428   : > { %v3476_v4 = vadd.f32 %v10095_v8, %v3231_v51  ;;  %v3542_v30 = vmax.f32 %v3478_v24, 0.0  ;;  %v3252_v12 = vadd.f32 %v8469_v42, %v10020_v14 }
 0x429   : > { %v3243_v61 = vpop.f32.mrf.mxu1 }
 0x42a   : > { %v3540_v5 = vmax.f32 %v3476_v4, 0.0  ;;  %v3244_v53 = vadd.f32 %v3243_v61, %v10022_v6  ;;  %v3602_v18 = vpack.c.bf16 %v3542_v30, %v3541_v21  ;;  %v3481_v6 = vadd.f32 %v10095_v8, %v3252_v12  ;;  %v10153_v30 = vpop.f32.mrf.mxu0 }
 0x42b   : > { %v8470_v54 = vpop.f32.mrf.mxu1 }
 0x42c   : > { %v3601_v1 = vpack.c.bf16 %v3540_v5, %v3539_v3  ;;  %v3255_v9 = vadd.f32 %v8470_v54, %v10030_v35  ;;  %v3479_v36 = vadd.f32 %v10095_v8, %v3244_v53  ;;  %v3545_v27 = vmax.f32 %v3481_v6, 0.0 }
 0x42d   : > { %v3246_v13 = vpop.f32.mrf.mxu1 }
 0x42e   : > { %v3482_v22 = vadd.f32 %v10095_v8, %v3255_v9  ;;  %v3247_v10 = vadd.f32 %v3246_v13, %v10032_v59  ;;  %8535 = vmatprep.mubr.msk.bf16.mxu0 %vm1218_vm1, %v3601_v1  ;;  %v3543_v15 = vmax.f32 %v3479_v36, 0.0 }
 0x42f   : > { %v8473_v19 = vpop.f32.mrf.mxu1  ;;  %8536 = vmatmul.mubr.msk.bf16.gmra.mxu0 %vm1218_vm1, %v3602_v18  ;;  %v10158_v18 = vpop.f32.mrf.mxu0 }
 0x430   : > { %v3480_v14 = vadd.f32 %v10095_v8, %v3247_v10  ;;  %v3546_v35 = vmax.f32 %v3482_v22, 0.0  ;;  %v3268_v59 = vadd.f32 %v8473_v19, %v10040_v37 }
 0x431   : > { %v3259_v20 = vpop.f32.mrf.mxu1  ;;  %v10167_v19 = vpop.f32.mrf.mxu0 }
 0x432   : > { %v3544_v32 = vmax.f32 %v3480_v14, 0.0  ;;  %v3260_v26 = vadd.f32 %v3259_v20, %v10042_v40  ;;  %v3604_v41 = vpack.c.bf16 %v3546_v35, %v3545_v27  ;;  %v3485_v40 = vadd.f32 %v10095_v8, %v3268_v59 }
 0x433   : > { %v8474_v28 = vpop.f32.mrf.mxu1 }
 0x434   : > { %v3603_v33 = vpack.c.bf16 %v3544_v32, %v3543_v15  ;;  %v3271_v34 = vadd.f32 %v8474_v28, %v10046_v16  ;;  %v3483_v24 = vadd.f32 %v10095_v8, %v3260_v26  ;;  %v3549_v53 = vmax.f32 %v3485_v40, 0.0 }
 0x435   : > { %v3262_v23 = vpop.f32.mrf.mxu1 }
 0x436   : > { %v3486_v51 = vadd.f32 %v10095_v8, %v3271_v34  ;;  %v3263_v60 = vadd.f32 %v3262_v23, %v10048_v2  ;;  %8539 = vmatprep.mubr.msk.bf16.mxu0 %vm1218_vm1, %v3603_v33  ;;  %v3547_v61 = vmax.f32 %v3483_v24, 0.0  ;;  %v10172_v33 = vpop.f32.mrf.mxu0 }
 0x437   : > { %v8477_v42 = vpop.f32.mrf.mxu1  ;;  %8540 = vmatmul.mubr.msk.bf16.gmra.mxu0 %vm1218_vm1, %v3604_v41 }
 0x438   : > { %v3484_v37 = vadd.f32 %v10095_v8, %v3263_v60  ;;  %v3550_v16 = vmax.f32 %v3486_v51, 0.0  ;;  %v3284_v2 = vadd.f32 %v8477_v42, %v10050_v44  ;;  %v10181_v60 = vpop.f32.mrf.mxu0 }
 0x439   : > { %v3275_v4 = vpop.f32.mrf.mxu1 }
 0x43a   : > { %v3548_v3 = vmax.f32 %v3484_v37, 0.0  ;;  %v3276_v5 = vadd.f32 %v3275_v4, %v10052_v45  ;;  %v3606_v1 = vpack.c.bf16 %v3550_v16, %v3549_v53  ;;  %v3489_v45 = vadd.f32 %v10095_v8, %v3284_v2  ;;  %v10186_v2 = vpop.f32.mrf.mxu0 }
 0x43b   : > { %v8478_v21 = vpop.f32.mrf.mxu1 }
 0x43c   : > { %v3605_v12 = vpack.c.bf16 %v3548_v3, %v3547_v61  ;;  %v3287_v54 = vadd.f32 %v8478_v21, %v10054_v43  ;;  %v3487_v13 = vadd.f32 %v10095_v8, %v3276_v5  ;;  %v3553_v15 = vmax.f32 %v3489_v45, 0.0 }
 0x43d   : > { %v3278_v9 = vpop.f32.mrf.mxu1 }
 0x43e   : > { %v3490_v36 = vadd.f32 %v10095_v8, %v3287_v54  ;;  %v3279_v22 = vadd.f32 %v3278_v9, %v10056_v49  ;;  %8543 = vmatprep.mubr.msk.bf16.mxu0 %vm1218_vm1, %v3605_v12  ;;  %v3551_v14 = vmax.f32 %v3487_v13, 0.0  ;;  %v10195_v13 = vpop.f32.mrf.mxu0 }
 0x43f   : > { %v8481_v10 = vpop.f32.mrf.mxu1  ;;  %8544 = vmatmul.mubr.msk.bf16.gmra.mxu0 %vm1218_vm1, %v3606_v1 }
 0x440   : > { %v3488_v44 = vadd.f32 %v10095_v8, %v3279_v22  ;;  %v3554_v43 = vmax.f32 %v3490_v36, 0.0  ;;  %v3300_v49 = vadd.f32 %v8481_v10, %v10058_v50 }
 0x441   : > { %v3291_v6 = vpop.f32.mrf.mxu1 }
 0x442   : > { %v3552_v35 = vmax.f32 %v3488_v44, 0.0  ;;  %v3292_v20 = vadd.f32 %v3291_v6, %v10060_v7  ;;  %v3608_v59 = vpack.c.bf16 %v3554_v43, %v3553_v15  ;;  %v3493_v7 = vadd.f32 %v10095_v8, %v3300_v49 }
 0x443   : > { %v8482_v32 = vpop.f32.mrf.mxu1 }
 0x444   : > { %v3607_v26 = vpack.c.bf16 %v3552_v35, %v3551_v14  ;;  %v3303_v27 = vadd.f32 %v8482_v32, %v10062_v11  ;;  %v3491_v34 = vadd.f32 %v10095_v8, %v3292_v20  ;;  %v3557_v16 = vmax.f32 %v3493_v7, 0.0  ;;  %v10200_v20 = vpop.f32.mrf.mxu0 }
 0x445   : > { %v3294_v28 = vpop.f32.mrf.mxu1 }
 0x446   : > { %v3494_v41 = vadd.f32 %v10095_v8, %v3303_v27  ;;  %v3295_v23 = vadd.f32 %v3294_v28, %v10064_v55  ;;  %8547 = vmatprep.mubr.msk.bf16.mxu0 %vm1218_vm1, %v3607_v26  ;;  %v3555_v40 = vmax.f32 %v3491_v34, 0.0 }
 0x447   : > { %v8485_v24 = vpop.f32.mrf.mxu1  ;;  %8548 = vmatmul.mubr.msk.bf16.gmra.mxu0 %vm1218_vm1, %v3608_v59  ;;  %v10209_v59 = vpop.f32.mrf.mxu0 }
 0x448   : > { %v3492_v50 = vadd.f32 %v10095_v8, %v3295_v23  ;;  %v3558_v11 = vmax.f32 %v3494_v41, 0.0  ;;  %v3316_v55 = vadd.f32 %v8485_v24, %v10066_v46 }
 0x449   : > { %v3307_v51 = vpop.f32.mrf.mxu1 }
 0x44a   : > { %v3556_v42 = vmax.f32 %v3492_v50, 0.0  ;;  %v3308_v37 = vadd.f32 %v3307_v51, %v10071_v52  ;;  %v3610_v5 = vpack.c.bf16 %v3558_v11, %v3557_v16  ;;  %v3497_v52 = vadd.f32 %v10095_v8, %v3316_v55 }
 0x44b   : > { %v8486_v4 = vpop.f32.mrf.mxu1 }
 0x44c   : > { %v3609_v61 = vpack.c.bf16 %v3556_v42, %v3555_v40  ;;  %v3319_v3 = vadd.f32 %v8486_v4, %v10073_v47  ;;  %v3495_v21 = vadd.f32 %v10095_v8, %v3308_v37  ;;  %v3561_v10 = vmax.f32 %v3497_v52, 0.0  ;;  %v10214_v40 = vpop.f32.mrf.mxu0 }
 0x44d   : > { %v3310_v53 = vpop.f32.mrf.mxu1 }
 0x44e   : > { %v3498_v12 = vadd.f32 %v10095_v8, %v3319_v3  ;;  %v3311_v54 = vadd.f32 %v3310_v53, %v10075_v56  ;;  %8551 = vmatprep.mubr.msk.bf16.mxu0 %vm1218_vm1, %v3609_v61  ;;  %v3559_v36 = vmax.f32 %v3495_v21, 0.0  ;;  %v10223_v61 = vpop.f32.mrf.mxu0 }
 0x44f   : > { %v8489_v1 = vpop.f32.mrf.mxu1  ;;  %8552 = vmatmul.mubr.msk.bf16.gmra.mxu0 %vm1218_vm1, %v3610_v5 }
 0x450   : > { %v3496_v46 = vadd.f32 %v10095_v8, %v3311_v54  ;;  %v3562_v47 = vmax.f32 %v3498_v12, 0.0  ;;  %v3332_v56 = vadd.f32 %v8489_v1, %v10077_v48 }
 0x451   : > { %v3323_v9 = vpop.f32.mrf.mxu1 }
 0x452   : > { %v3560_v22 = vmax.f32 %v3496_v46, 0.0  ;;  %v3324_v45 = vadd.f32 %v3323_v9, %v10079_v57  ;;  %v3612_v14 = vpack.c.bf16 %v3562_v47, %v3561_v10  ;;  %v3501_v57 = vadd.f32 %v10095_v8, %v3332_v56  ;;  %v10228_v47 = vpop.f32.mrf.mxu0 }
 0x453   : > { %v8490_v44 = vpop.f32.mrf.mxu1 }
 0x454   : > { %v3611_v43 = vpack.c.bf16 %v3560_v22, %v3559_v36  ;;  %v3335_v6 = vadd.f32 %v8490_v44, %v10081_v29  ;;  %v3499_v15 = vadd.f32 %v10095_v8, %v3324_v45  ;;  %v3565_v23 = vmax.f32 %v3501_v57, 0.0  ;;  %v10237_v56 = vpop.f32.mrf.mxu0 }
 0x455   : > { %v3326_v35 = vpop.f32.mrf.mxu1 }
 0x456   : > { %v3502_v49 = vadd.f32 %v10095_v8, %v3335_v6  ;;  %v3327_v32 = vadd.f32 %v3326_v35, %v10083_v58  ;;  %8555 = vmatprep.mubr.msk.bf16.mxu0 %vm1218_vm1, %v3611_v43  ;;  %v3563_v28 = vmax.f32 %v3499_v15, 0.0 }
 0x457   : > { %v8493_v26 = vpop.f32.mrf.mxu1  ;;  %8556 = vmatmul.mubr.msk.bf16.gmra.mxu0 %vm1218_vm1, %v3612_v14 }
 0x458   : > { %v3500_v48 = vadd.f32 %v10095_v8, %v3327_v32  ;;  %v3566_v29 = vmax.f32 %v3502_v49, 0.0  ;;  %v3348_v58 = vadd.f32 %v8493_v26, %v10085_v63  ;;  %v3010_v26 = vpop.f32.mrf.mxu0 }
 0x459   : > { %v3339_v27 = vpop.f32.mrf.mxu1 }
 0x45a   : > { %v3564_v34 = vmax.f32 %v3500_v48, 0.0  ;;  %v3340_v41 = vadd.f32 %v3339_v27, %v10098_v17  ;;  %v3614_v11 = vpack.c.bf16 %v3566_v29, %v3565_v23  ;;  %v3505_v17 = vadd.f32 %v10095_v8, %v3348_v58 }
 0x45b   : > { %v8494_v7 = vpop.f32.mrf.mxu1 }
 0x45c   : > { %v3613_v24 = vpack.c.bf16 %v3564_v34, %v3563_v28  ;;  %v3351_v50 = vadd.f32 %v8494_v7, %v10111_v25  ;;  %v3503_v42 = vadd.f32 %v10095_v8, %v3340_v41  ;;  %v3569_v21 = vmax.f32 %v3505_v17, 0.0  ;;  %v8442_v41 = vpop.f32.mrf.mxu0 }
 0x45d   : > { %v3342_v51 = vpop.f32.mrf.mxu1 }
 0x45e   : > { %v3506_v37 = vadd.f32 %v10095_v8, %v3351_v50  ;;  %v3343_v16 = vadd.f32 %v3342_v51, %v10116_v38  ;;  %8559 = vmatprep.mubr.msk.bf16.mxu0 %vm1218_vm1, %v3613_v24  ;;  %v3567_v3 = vmax.f32 %v3503_v42, 0.0 }
 0x45f   : > { %v8497_v55 = vpop.f32.mrf.mxu1  ;;  %8560 = vmatmul.mubr.msk.bf16.gmra.mxu0 %vm1218_vm1, %v3614_v11 }
 0x460   : > { %v3504_v63 = vadd.f32 %v10095_v8, %v3343_v16  ;;  %v3570_v25 = vmax.f32 %v3506_v37, 0.0  ;;  %v3364_v38 = vadd.f32 %v8497_v55, %v10125_v0  ;;  %v3013_v16 = vpop.f32.mrf.mxu0 }
 0x461   : > { %v3355_v4 = vpop.f32.mrf.mxu1 }
 0x462   : > { %v3568_v5 = vmax.f32 %v3504_v63, 0.0  ;;  %v3356_v53 = vadd.f32 %v3355_v4, %v10130_v62  ;;  %v3616_v1 = vpack.c.bf16 %v3570_v25, %v3569_v21  ;;  %v3509_v62 = vadd.f32 %v10095_v8, %v3364_v38 }
 0x463   : > { %v8498_v12 = vpop.f32.mrf.mxu1 }
 0x464   : > { %v3615_v54 = vpack.c.bf16 %v3568_v5, %v3567_v3  ;;  %v3367_v52 = vadd.f32 %v8498_v12, %v10139_v31  ;;  %v3507_v9 = vadd.f32 %v10095_v8, %v3356_v53  ;;  %v3573_v14 = vmax.f32 %v3509_v62, 0.0  ;;  %v8445_v3 = vpop.f32.mrf.mxu0 }
 0x465   : > { %v3358_v46 = vpop.f32.mrf.mxu1 }
 0x466   : > { %v3510_v36 = vadd.f32 %v10095_v8, %v3367_v52  ;;  %v3359_v22 = vadd.f32 %v3358_v46, %v10144_v39  ;;  %8563 = vmatprep.mubr.msk.bf16.mxu0 %vm1218_vm1, %v3615_v54  ;;  %v3571_v44 = vmax.f32 %v3507_v9, 0.0  ;;  %v3026_v9 = vpop.f32.mrf.mxu0 }
 0x467   : > { %v8501_v45 = vpop.f32.mrf.mxu1  ;;  %8564 = vmatmul.mubr.msk.bf16.gmra.mxu0 %vm1218_vm1, %v3616_v1 }
 0x468   : > { %v3508_v0 = vadd.f32 %v10095_v8, %v3359_v22  ;;  %v3574_v31 = vmax.f32 %v3510_v36, 0.0  ;;  %v3380_v39 = vadd.f32 %v8501_v45, %v10153_v30 }
 0x469   : > { %v3371_v10 = vpop.f32.mrf.mxu1 }
 0x46a   : > { %v3572_v43 = vmax.f32 %v3508_v0, 0.0  ;;  %v3372_v6 = vadd.f32 %v3371_v10, %v10158_v18  ;;  %v3618_v32 = vpack.c.bf16 %v3574_v31, %v3573_v14  ;;  %v3513_v18 = vadd.f32 %v10095_v8, %v3380_v39  ;;  %v8446_v31 = vpop.f32.mrf.mxu0 }
 0x46b   : > { %v8502_v35 = vpop.f32.mrf.mxu1 }
 0x46c   : > { %v3617_v15 = vpack.c.bf16 %v3572_v43, %v3571_v44  ;;  %v3383_v49 = vadd.f32 %v8502_v35, %v10167_v19  ;;  %v3511_v48 = vadd.f32 %v10095_v8, %v3372_v6  ;;  %v3577_v24 = vmax.f32 %v3513_v18, 0.0 }
 0x46d   : > { %v3374_v57 = vpop.f32.mrf.mxu1 }
 0x46e   : > { %v3514_v29 = vadd.f32 %v10095_v8, %v3383_v49  ;;  %v3375_v27 = vadd.f32 %v3374_v57, %v10172_v33  ;;  %8567 = vmatprep.mubr.msk.bf16.mxu0 %vm1218_vm1, %v3617_v15  ;;  %v3575_v23 = vmax.f32 %v3511_v48, 0.0 }
 0x46f   : > { %v8505_v28 = vpop.f32.mrf.mxu1  ;;  %8568 = vmatmul.mubr.msk.bf16.gmra.mxu0 %vm1218_vm1, %v3618_v32  ;;  %v3029_v32 = vpop.f32.mrf.mxu0 }
 0x470   : > { %v3512_v30 = vadd.f32 %v10095_v8, %v3375_v27  ;;  %v3578_v34 = vmax.f32 %v3514_v29, 0.0  ;;  %v3396_v50 = vadd.f32 %v8505_v28, %v10181_v60 }
 0x471   : > { %v3387_v19 = vpop.f32.mrf.mxu1  ;;  %v8449_v28 = vpop.f32.mrf.mxu0 }
 0x472   : > { %v3576_v58 = vmax.f32 %v3512_v30, 0.0  ;;  %v3388_v7 = vadd.f32 %v3387_v19, %v10186_v2  ;;  %v3620_v42 = vpack.c.bf16 %v3578_v34, %v3577_v24  ;;  %v3517_v2 = vadd.f32 %v10095_v8, %v3396_v50 }
 0x473   : > { %v8506_v33 = vpop.f32.mrf.mxu1 }
 0x474   : > { %v3619_v11 = vpack.c.bf16 %v3576_v58, %v3575_v23  ;;  %v3399_v51 = vadd.f32 %v8506_v33, %v10195_v13  ;;  %v3515_v17 = vadd.f32 %v10095_v8, %v3388_v7  ;;  %v3581_v38 = vmax.f32 %v3517_v2, 0.0 }
 0x475   : > { %v3390_v37 = vpop.f32.mrf.mxu1 }
 0x476   : > { %v3518_v55 = vadd.f32 %v10095_v8, %v3399_v51  ;;  %v3391_v63 = vadd.f32 %v3390_v37, %v10200_v20  ;;  %8571 = vmatprep.mubr.msk.bf16.mxu0 %vm1218_vm1, %v3619_v11  ;;  %v3579_v5 = vmax.f32 %v3515_v17, 0.0  ;;  %v3042_v11 = vpop.f32.mrf.mxu0 }
 0x477   : > { %v8509_v25 = vpop.f32.mrf.mxu1  ;;  %8572 = vmatmul.mubr.msk.bf16.gmra.mxu0 %vm1218_vm1, %v3620_v42 }
 0x478   : > { %v3516_v60 = vadd.f32 %v10095_v8, %v3391_v63  ;;  %v3582_v4 = vmax.f32 %v3518_v55, 0.0  ;;  %v3412_v12 = vadd.f32 %v8509_v25, %v10209_v59  ;;  %v8450_v25 = vpop.f32.mrf.mxu0 }
 0x479   : > { %v3403_v13 = vpop.f32.mrf.mxu1 }
 0x47a   : > { %v3580_v53 = vmax.f32 %v3516_v60, 0.0  ;;  %v3404_v21 = vadd.f32 %v3403_v13, %v10214_v40  ;;  %v3622_v1 = vpack.c.bf16 %v3582_v4, %v3581_v38  ;;  %v3521_v40 = vadd.f32 %v10095_v8, %v3412_v12 }
 0x47b   : > { %v8510_v20 = vpop.f32.mrf.mxu1 }
 0x47c   : > { %v3621_v54 = vpack.c.bf16 %v3580_v53, %v3579_v5  ;;  %v3415_v52 = vadd.f32 %v8510_v20, %v10223_v61  ;;  %v3519_v36 = vadd.f32 %v10095_v8, %v3404_v21  ;;  %v3585_v6 = vmax.f32 %v3521_v40, 0.0 }
 0x47d   : > { %v3406_v46 = vpop.f32.mrf.mxu1 }
 0x47e   : > { %v3522_v22 = vadd.f32 %v10095_v8, %v3415_v52  ;;  %v3407_v62 = vadd.f32 %v3406_v46, %v10228_v47  ;;  %8575 = vmatprep.mubr.msk.bf16.mxu0 %vm1218_vm1, %v3621_v54  ;;  %v3583_v10 = vmax.f32 %v3519_v36, 0.0  ;;  %v3045_v54 = vpop.f32.mrf.mxu0 }
 0x47f   : > { %v8513_v45 = vpop.f32.mrf.mxu1  ;;  %8576 = vmatmul.mubr.msk.bf16.gmra.mxu0 %vm1218_vm1, %v3622_v1 }
 0x480   : > { %v3520_v59 = vadd.f32 %v10095_v8, %v3407_v62  ;;  %v3586_v0 = vmax.f32 %v3522_v22, 0.0  ;;  %v3428_v14 = vadd.f32 %v8513_v45, %v10237_v56 }
 0x481   : > { %v3419_v61 = vpop.f32.mrf.mxu1 }
 0x482   : > { %v3584_v44 = vmax.f32 %v3520_v59, 0.0  ;;  %v3420_v43 = vadd.f32 %v3419_v61, %v3010_v26  ;;  %v3624_v15 = vpack.c.bf16 %v3586_v0, %v3585_v6  ;;  %v3525_v27 = vadd.f32 %v10095_v8, %v3428_v14 }
 0x483   : > { %v8514_v39 = vpop.f32.mrf.mxu1 }
 0x484   : > { %v3623_v47 = vpack.c.bf16 %v3584_v44, %v3583_v10  ;;  %v3431_v35 = vadd.f32 %v8514_v39, %v8442_v41  ;;  %v3523_v57 = vadd.f32 %v10095_v8, %v3420_v43  ;;  %v3589_v23 = vmax.f32 %v3525_v27, 0.0  ;;  %v10299_v43 = vld [vmem:[%s11543_s8 + $0x5] ss:$0 sm:$0xff] }
 0x485   : > { %v3422_v49 = vpop.f32.mrf.mxu1 }
 0x486   : > { %v3526_v48 = vadd.f32 %v10095_v8, %v3431_v35  ;;  %v3423_v29 = vadd.f32 %v3422_v49, %v3013_v16  ;;  %8579 = vmatprep.mubr.msk.bf16.mxu0 %vm1218_vm1, %v3623_v47  ;;  %v3587_v34 = vmax.f32 %v3523_v57, 0.0  ;;  %v9072_v49 = vld [vmem:[%s11538_s3 + $0xa0] sm:$0xff]  }
 0x487   : > { %v8517_v18 = vpop.f32.mrf.mxu1  ;;  %8580 = vmatmul.mubr.msk.bf16.gmra.mxu0 %vm1218_vm1, %v3624_v15  ;;  %v9071_v15 = vld [vmem:[%s11538_s3 + $0xa8] sm:$0xff]  }
 0x488   : > { %v3524_v56 = vadd.f32 %v10095_v8, %v3423_v29  ;;  %v3590_v26 = vmax.f32 %v3526_v48, 0.0  ;;  %v3444_v58 = vadd.f32 %v8517_v18, %v8445_v3 }
 0x489   : > { %v3435_v30 = vpop.f32.mrf.mxu1 }
 0x48a   : > { %v3588_v19 = vmax.f32 %v3524_v56, 0.0  ;;  %v3436_v41 = vadd.f32 %v3435_v30, %v3026_v9  ;;  %v3626_v33 = vpack.c.bf16 %v3590_v26, %v3589_v23  ;;  %v3529_v17 = vadd.f32 %v10095_v8, %v3444_v58 }
 0x48b   : > { %v8518_v7 = vpop.f32.mrf.mxu1 }
 0x48c   : > { %v3625_v24 = vpack.c.bf16 %v3588_v19, %v3587_v34  ;;  %v3447_v50 = vadd.f32 %v8518_v7, %v8446_v31  ;;  %v3527_v42 = vadd.f32 %v10095_v8, %v3436_v41  ;;  %v3593_v5 = vmax.f32 %v3529_v17, 0.0  ;;  %v9069_v31 = vld [vmem:[%s11538_s3 + $0xb8] sm:$0xff]  }
 0x48d   : > { %v3438_v51 = vpop.f32.mrf.mxu1  ;;  %8667 = vmatprep.subr.bf16.mxu0 %v9069_v31 }
 0x48e   : > { %v3530_v37 = vadd.f32 %v10095_v8, %v3447_v50  ;;  %v3439_v16 = vadd.f32 %v3438_v51, %v3029_v32  ;;  %8583 = vmatprep.mubr.msk.bf16.mxu0 %vm1218_vm1, %v3625_v24  ;;  %v3591_v4 = vmax.f32 %v3527_v42, 0.0  ;;  %8668 = vmatpush3.bf16.msra.mxu0 %v9069_v31 }
 0x48f   : > { %v8521_v55 = vpop.f32.mrf.mxu1  ;;  %8584 = vmatmul.mubr.msk.bf16.gmra.mxu0 %vm1218_vm1, %v3626_v33 }
 0x490   : > { %v3528_v63 = vadd.f32 %v10095_v8, %v3439_v16  ;;  %v3594_v2 = vmax.f32 %v3530_v37, 0.0  ;;  %v3460_v53 = vadd.f32 %v8521_v55, %v8449_v28 }
 0x491   : > { %v3451_v60 = vpop.f32.mrf.mxu1 }
 0x492   : > { %v3592_v13 = vmax.f32 %v3528_v63, 0.0  ;;  %v3452_v3 = vadd.f32 %v3451_v60, %v3042_v11  ;;  %v3628_v20 = vpack.c.bf16 %v3594_v2, %v3593_v5  ;;  %v3533_v36 = vadd.f32 %v10095_v8, %v3460_v53 }
 0x493   : > { %v8522_v21 = vpop.f32.mrf.mxu1 }
 0x494   : > { %v3627_v38 = vpack.c.bf16 %v3592_v13, %v3591_v4  ;;  %v3463_v12 = vadd.f32 %v8522_v21, %v8450_v25  ;;  %v3531_v1 = vadd.f32 %v10095_v8, %v3452_v3  ;;  %v3597_v59 = vmax.f32 %v3533_v36, 0.0 }
 0x495   : > { %v3454_v52 = vpop.f32.mrf.mxu1 }
 0x496   : > { %v3534_v46 = vadd.f32 %v10095_v8, %v3463_v12  ;;  %v3455_v9 = vadd.f32 %v3454_v52, %v3045_v54  ;;  %8587 = vmatprep.mubr.msk.bf16.mxu0 %vm1218_vm1, %v3627_v38  ;;  %v3595_v40 = vmax.f32 %v3531_v1, 0.0 }
 0x497   : > { %8588 = vmatmul.mubr.msk.bf16.gmra.mxu0 %vm1218_vm1, %v3628_v20 }
 0x498   : > { %v3532_v22 = vadd.f32 %v10095_v8, %v3455_v9  ;;  %v3598_v62 = vmax.f32 %v3534_v46, 0.0  ;;  %v9070_v8 = vld [vmem:[%s11538_s3 + $0xb0] sm:$0xff]  }
 0x499   : > { %8669 = vmatprep.subr.bf16.mxu0 %v9070_v8 }
 0x49a   : > { %v3596_v45 = vmax.f32 %v3532_v22, 0.0  ;;  %v3630_v61 = vpack.c.bf16 %v3598_v62, %v3597_v59  ;;  %8670 = vmatpush3.bf16.msra.mxu0 %v9070_v8 }
 0x49b   : > { %8671 = vmatprep.subr.bf16.mxu0 %v9071_v15 }
 0x49c   : > { %v3629_v0 = vpack.c.bf16 %v3596_v45, %v3595_v40 }
 0x49e   : > { %8591 = vmatprep.mubr.msk.bf16.mxu0 %vm1218_vm1, %v3629_v0  ;;  %8672 = vmatpush3.bf16.msra.mxu0 %v9071_v15 }
 0x49f   : > { %8592 = vmatmul.mubr.msk.bf16.gmra.mxu0 %vm1218_vm1, %v3630_v61  ;;  %8673 = vmatprep.subr.bf16.mxu0 %v9072_v49 }
 0x4a2   : > { %8674 = vmatpush3.bf16.msra.mxu0 %v9072_v49 }
 0x4e7   : > { %v8533_v10 = vpop.f32.mrf.mxu0 }
 0x4e8   : > { %v3807_v47 = vadd.f32 %v8533_v10, %v10299_v43 }
 0x4e9   : > { %v3798_v44 = vpop.f32.mrf.mxu0 }
 0x4ea   : > { %v3799_v14 = vadd.f32 %v10299_v43, %v3798_v44  ;;  %v4055_v18 = vmax.f32 %v3807_v47, 0.0 }
 0x4eb   : > { %v8534_v6 = vpop.f32.mrf.mxu0 }
 0x4ec   : > { %v3810_v39 = vadd.f32 %v8534_v6, %v10299_v43  ;;  %v4053_v29 = vmax.f32 %v3799_v14, 0.0 }
 0x4ed   : > { %v3801_v35 = vpop.f32.mrf.mxu0 }
 0x4ee   : > { %v3802_v32 = vadd.f32 %v10299_v43, %v3801_v35  ;;  %v4056_v57 = vmax.f32 %v3810_v39, 0.0 }
 0x4ef   : > { %v8537_v48 = vpop.f32.mrf.mxu0 }
 0x4f0   : > { %v4054_v27 = vmax.f32 %v3802_v32, 0.0  ;;  %v4118_v28 = vpack.c.bf16 %v4056_v57, %v4055_v18  ;;  %v3823_v41 = vadd.f32 %v8537_v48, %v10299_v43 }
 0x4f1   : > { %v3814_v56 = vpop.f32.mrf.mxu0 }
 0x4f2   : > { %v4117_v26 = vpack.c.bf16 %v4054_v27, %v4053_v29  ;;  %v3815_v34 = vadd.f32 %v10299_v43, %v3814_v56  ;;  %v4059_v11 = vmax.f32 %v3823_v41, 0.0 }
 0x4f3   : > { %v8538_v30 = vpop.f32.mrf.mxu0 }
 0x4f4   : > { %v3826_v19 = vadd.f32 %v8538_v30, %v10299_v43  ;;  %8603 = vmatprep.mubr.msk.bf16.mxu1 %vm1218_vm1, %v4117_v26  ;;  %v4057_v50 = vmax.f32 %v3815_v34, 0.0 }
 0x4f5   : > { %v3817_v23 = vpop.f32.mrf.mxu0  ;;  %8604 = vmatmul.mubr.msk.bf16.vlgmr.msra.gmra.mxu1 %vm1218_vm1, %v4118_v28 }
 0x4f6   : > { %v3818_v58 = vadd.f32 %v10299_v43, %v3817_v23  ;;  %v4060_v7 = vmax.f32 %v3826_v19, 0.0 }
 0x4f7   : > { %v8541_v24 = vpop.f32.mrf.mxu0 }
 0x4f8   : > { %v4058_v33 = vmax.f32 %v3818_v58, 0.0  ;;  %v4120_v37 = vpack.c.bf16 %v4060_v7, %v4059_v11  ;;  %v3839_v63 = vadd.f32 %v8541_v24, %v10299_v43 }
 0x4f9   : > { %v3830_v51 = vpop.f32.mrf.mxu0 }
 0x4fa   : > { %v4119_v42 = vpack.c.bf16 %v4058_v33, %v4057_v50  ;;  %v3831_v17 = vadd.f32 %v10299_v43, %v3830_v51  ;;  %v4063_v5 = vmax.f32 %v3839_v63, 0.0 }
 0x4fb   : > { %v8542_v16 = vpop.f32.mrf.mxu0 }
 0x4fc   : > { %v3842_v55 = vadd.f32 %v8542_v16, %v10299_v43  ;;  %8607 = vmatprep.mubr.msk.bf16.mxu1 %vm1218_vm1, %v4119_v42  ;;  %v4061_v13 = vmax.f32 %v3831_v17, 0.0 }
 0x4fd   : > { %v3833_v2 = vpop.f32.mrf.mxu0  ;;  %8608 = vmatmul.mubr.msk.bf16.gmra.mxu1 %vm1218_vm1, %v4120_v37 }
 0x4fe   : > { %v3834_v25 = vadd.f32 %v10299_v43, %v3833_v2  ;;  %v4064_v60 = vmax.f32 %v3842_v55, 0.0 }
 0x4ff   : > { %v8545_v4 = vpop.f32.mrf.mxu0 }
 0x500   : > { %v4062_v3 = vmax.f32 %v3834_v25, 0.0  ;;  %v4122_v38 = vpack.c.bf16 %v4064_v60, %v4063_v5  ;;  %v3855_v52 = vadd.f32 %v8545_v4, %v10299_v43 }
 0x501   : > { %v3846_v53 = vpop.f32.mrf.mxu0 }
 0x502   : > { %v4121_v21 = vpack.c.bf16 %v4062_v3, %v4061_v13  ;;  %v3847_v20 = vadd.f32 %v10299_v43, %v3846_v53  ;;  %v4067_v40 = vmax.f32 %v3855_v52, 0.0 }
 0x503   : > { %v8546_v12 = vpop.f32.mrf.mxu0 }
 0x504   : > { %v3858_v54 = vadd.f32 %v8546_v12, %v10299_v43  ;;  %8611 = vmatprep.mubr.msk.bf16.mxu1 %vm1218_vm1, %v4121_v21  ;;  %v4065_v22 = vmax.f32 %v3847_v20, 0.0 }
 0x505   : > { %v3849_v1 = vpop.f32.mrf.mxu0  ;;  %8612 = vmatmul.mubr.msk.bf16.gmra.mxu1 %vm1218_vm1, %v4122_v38 }
 0x506   : > { %v3850_v46 = vadd.f32 %v10299_v43, %v3849_v1  ;;  %v4068_v9 = vmax.f32 %v3858_v54, 0.0 }
 0x507   : > { %v8549_v36 = vpop.f32.mrf.mxu0 }
 0x508   : > { %v4066_v62 = vmax.f32 %v3850_v46, 0.0  ;;  %v4124_v0 = vpack.c.bf16 %v4068_v9, %v4067_v40  ;;  %v3871_v10 = vadd.f32 %v8549_v36, %v10299_v43 }
 0x509   : > { %v3862_v45 = vpop.f32.mrf.mxu0 }
 0x50a   : > { %v4123_v59 = vpack.c.bf16 %v4066_v62, %v4065_v22  ;;  %v3863_v31 = vadd.f32 %v10299_v43, %v3862_v45  ;;  %v4071_v15 = vmax.f32 %v3871_v10, 0.0 }
 0x50b   : > { %v8550_v61 = vpop.f32.mrf.mxu0 }
 0x50c   : > { %v3874_v8 = vadd.f32 %v8550_v61, %v10299_v43  ;;  %8615 = vmatprep.mubr.msk.bf16.mxu1 %vm1218_vm1, %v4123_v59  ;;  %v4069_v47 = vmax.f32 %v3863_v31, 0.0 }
 0x50d   : > { %v3865_v44 = vpop.f32.mrf.mxu0  ;;  %8616 = vmatmul.mubr.msk.bf16.gmra.mxu1 %vm1218_vm1, %v4124_v0 }
 0x50e   : > { %v3866_v6 = vadd.f32 %v10299_v43, %v3865_v44  ;;  %v4072_v14 = vmax.f32 %v3874_v8, 0.0 }
 0x50f   : > { %v8553_v39 = vpop.f32.mrf.mxu0 }
 0x510   : > { %v4070_v35 = vmax.f32 %v3866_v6, 0.0  ;;  %v4126_v57 = vpack.c.bf16 %v4072_v14, %v4071_v15  ;;  %v3887_v18 = vadd.f32 %v8553_v39, %v10299_v43 }
 0x511   : > { %v3878_v49 = vpop.f32.mrf.mxu0 }
 0x512   : > { %v4125_v32 = vpack.c.bf16 %v4070_v35, %v4069_v47  ;;  %v3879_v29 = vadd.f32 %v10299_v43, %v3878_v49  ;;  %v4075_v41 = vmax.f32 %v3887_v18, 0.0 }
 0x513   : > { %v8554_v48 = vpop.f32.mrf.mxu0 }
 0x514   : > { %v3890_v27 = vadd.f32 %v8554_v48, %v10299_v43  ;;  %8619 = vmatprep.mubr.msk.bf16.mxu1 %vm1218_vm1, %v4125_v32  ;;  %v4073_v34 = vmax.f32 %v3879_v29, 0.0 }
 0x515   : > { %v3881_v56 = vpop.f32.mrf.mxu0  ;;  %8620 = vmatmul.mubr.msk.bf16.gmra.mxu1 %vm1218_vm1, %v4126_v57 }
 0x516   : > { %v3882_v26 = vadd.f32 %v10299_v43, %v3881_v56  ;;  %v4076_v28 = vmax.f32 %v3890_v27, 0.0 }
 0x517   : > { %v8557_v30 = vpop.f32.mrf.mxu0 }
 0x518   : > { %v4074_v19 = vmax.f32 %v3882_v26, 0.0  ;;  %v4128_v7 = vpack.c.bf16 %v4076_v28, %v4075_v41  ;;  %v3903_v11 = vadd.f32 %v8557_v30, %v10299_v43 }
 0x519   : > { %v3894_v23 = vpop.f32.mrf.mxu0 }
 0x51a   : > { %v4127_v58 = vpack.c.bf16 %v4074_v19, %v4073_v34  ;;  %v3895_v50 = vadd.f32 %v10299_v43, %v3894_v23  ;;  %v4079_v63 = vmax.f32 %v3903_v11, 0.0 }
 0x51b   : > { %v8558_v24 = vpop.f32.mrf.mxu0 }
 0x51c   : > { %v3906_v33 = vadd.f32 %v8558_v24, %v10299_v43  ;;  %8623 = vmatprep.mubr.msk.bf16.mxu1 %vm1218_vm1, %v4127_v58  ;;  %v4077_v17 = vmax.f32 %v3895_v50, 0.0 }
 0x51d   : > { %v3897_v51 = vpop.f32.mrf.mxu0  ;;  %8624 = vmatmul.mubr.msk.bf16.gmra.mxu1 %vm1218_vm1, %v4128_v7 }
 0x51e   : > { %v3898_v42 = vadd.f32 %v10299_v43, %v3897_v51  ;;  %v4080_v37 = vmax.f32 %v3906_v33, 0.0 }
 0x51f   : > { %v8561_v16 = vpop.f32.mrf.mxu0 }
 0x520   : > { %v4078_v55 = vmax.f32 %v3898_v42, 0.0  ;;  %v4130_v60 = vpack.c.bf16 %v4080_v37, %v4079_v63  ;;  %v3919_v5 = vadd.f32 %v8561_v16, %v10299_v43 }
 0x521   : > { %v3910_v2 = vpop.f32.mrf.mxu0 }
 0x522   : > { %v4129_v25 = vpack.c.bf16 %v4078_v55, %v4077_v17  ;;  %v3911_v13 = vadd.f32 %v10299_v43, %v3910_v2  ;;  %v4083_v52 = vmax.f32 %v3919_v5, 0.0 }
 0x523   : > { %v8562_v4 = vpop.f32.mrf.mxu0 }
 0x524   : > { %v3922_v3 = vadd.f32 %v8562_v4, %v10299_v43  ;;  %8627 = vmatprep.mubr.msk.bf16.mxu1 %vm1218_vm1, %v4129_v25  ;;  %v4081_v20 = vmax.f32 %v3911_v13, 0.0 }
 0x525   : > { %v3913_v53 = vpop.f32.mrf.mxu0  ;;  %8628 = vmatmul.mubr.msk.bf16.gmra.mxu1 %vm1218_vm1, %v4130_v60 }
 0x526   : > { %v3914_v21 = vadd.f32 %v10299_v43, %v3913_v53  ;;  %v4084_v38 = vmax.f32 %v3922_v3, 0.0 }
 0x527   : > { %v8565_v12 = vpop.f32.mrf.mxu0 }
 0x528   : > { %v4082_v54 = vmax.f32 %v3914_v21, 0.0  ;;  %v4132_v9 = vpack.c.bf16 %v4084_v38, %v4083_v52  ;;  %v3935_v40 = vadd.f32 %v8565_v12, %v10299_v43 }
 0x529   : > { %v3926_v1 = vpop.f32.mrf.mxu0 }
 0x52a   : > { %v4131_v46 = vpack.c.bf16 %v4082_v54, %v4081_v20  ;;  %v3927_v22 = vadd.f32 %v10299_v43, %v3926_v1  ;;  %v4087_v10 = vmax.f32 %v3935_v40, 0.0 }
 0x52b   : > { %v8566_v36 = vpop.f32.mrf.mxu0 }
 0x52c   : > { %v3938_v62 = vadd.f32 %v8566_v36, %v10299_v43  ;;  %8631 = vmatprep.mubr.msk.bf16.mxu1 %vm1218_vm1, %v4131_v46  ;;  %v4085_v31 = vmax.f32 %v3927_v22, 0.0 }
 0x52d   : > { %v3929_v45 = vpop.f32.mrf.mxu0  ;;  %8632 = vmatmul.mubr.msk.bf16.gmra.mxu1 %vm1218_vm1, %v4132_v9 }
 0x52e   : > { %v3930_v59 = vadd.f32 %v10299_v43, %v3929_v45  ;;  %v4088_v0 = vmax.f32 %v3938_v62, 0.0 }
 0x52f   : > { %v8569_v61 = vpop.f32.mrf.mxu0 }
 0x530   : > { %v4086_v8 = vmax.f32 %v3930_v59, 0.0  ;;  %v4134_v14 = vpack.c.bf16 %v4088_v0, %v4087_v10  ;;  %v3951_v15 = vadd.f32 %v8569_v61, %v10299_v43 }
 0x531   : > { %v3942_v44 = vpop.f32.mrf.mxu0 }
 0x532   : > { %v4133_v6 = vpack.c.bf16 %v4086_v8, %v4085_v31  ;;  %v3943_v47 = vadd.f32 %v10299_v43, %v3942_v44  ;;  %v4091_v18 = vmax.f32 %v3951_v15, 0.0 }
 0x533   : > { %v8570_v39 = vpop.f32.mrf.mxu0 }
 0x534   : > { %v3954_v35 = vadd.f32 %v8570_v39, %v10299_v43  ;;  %8635 = vmatprep.mubr.msk.bf16.mxu1 %vm1218_vm1, %v4133_v6  ;;  %v4089_v29 = vmax.f32 %v3943_v47, 0.0 }
 0x535   : > { %v3945_v49 = vpop.f32.mrf.mxu0  ;;  %8636 = vmatmul.mubr.msk.bf16.gmra.mxu1 %vm1218_vm1, %v4134_v14 }
 0x536   : > { %v3946_v32 = vadd.f32 %v10299_v43, %v3945_v49  ;;  %v4092_v57 = vmax.f32 %v3954_v35, 0.0 }
 0x537   : > { %v8573_v48 = vpop.f32.mrf.mxu0 }
 0x538   : > { %v4090_v27 = vmax.f32 %v3946_v32, 0.0  ;;  %v4136_v28 = vpack.c.bf16 %v4092_v57, %v4091_v18  ;;  %v3967_v41 = vadd.f32 %v8573_v48, %v10299_v43 }
 0x539   : > { %v3958_v56 = vpop.f32.mrf.mxu0 }
 0x53a   : > { %v4135_v26 = vpack.c.bf16 %v4090_v27, %v4089_v29  ;;  %v3959_v34 = vadd.f32 %v10299_v43, %v3958_v56  ;;  %v4095_v11 = vmax.f32 %v3967_v41, 0.0 }
 0x53b   : > { %v8574_v30 = vpop.f32.mrf.mxu0 }
 0x53c   : > { %v3970_v19 = vadd.f32 %v8574_v30, %v10299_v43  ;;  %8639 = vmatprep.mubr.msk.bf16.mxu1 %vm1218_vm1, %v4135_v26  ;;  %v4093_v50 = vmax.f32 %v3959_v34, 0.0 }
 0x53d   : > { %v3961_v23 = vpop.f32.mrf.mxu0  ;;  %8640 = vmatmul.mubr.msk.bf16.gmra.mxu1 %vm1218_vm1, %v4136_v28 }
 0x53e   : > { %v3962_v58 = vadd.f32 %v10299_v43, %v3961_v23  ;;  %v4096_v7 = vmax.f32 %v3970_v19, 0.0 }
 0x53f   : > { %v8577_v24 = vpop.f32.mrf.mxu0 }
 0x540   : > { %v4094_v33 = vmax.f32 %v3962_v58, 0.0  ;;  %v4138_v37 = vpack.c.bf16 %v4096_v7, %v4095_v11  ;;  %v3983_v63 = vadd.f32 %v8577_v24, %v10299_v43 }
 0x541   : > { %v3974_v51 = vpop.f32.mrf.mxu0 }
 0x542   : > { %v4137_v42 = vpack.c.bf16 %v4094_v33, %v4093_v50  ;;  %v3975_v17 = vadd.f32 %v10299_v43, %v3974_v51  ;;  %v4099_v5 = vmax.f32 %v3983_v63, 0.0 }
 0x543   : > { %v8578_v16 = vpop.f32.mrf.mxu0 }
 0x544   : > { %v3986_v55 = vadd.f32 %v8578_v16, %v10299_v43  ;;  %8643 = vmatprep.mubr.msk.bf16.mxu1 %vm1218_vm1, %v4137_v42  ;;  %v4097_v13 = vmax.f32 %v3975_v17, 0.0 }
 0x545   : > { %v3977_v2 = vpop.f32.mrf.mxu0  ;;  %8644 = vmatmul.mubr.msk.bf16.gmra.mxu1 %vm1218_vm1, %v4138_v37 }
 0x546   : > { %v3978_v25 = vadd.f32 %v10299_v43, %v3977_v2  ;;  %v4100_v60 = vmax.f32 %v3986_v55, 0.0 }
 0x547   : > { %v8581_v4 = vpop.f32.mrf.mxu0 }
 0x548   : > { %v4098_v3 = vmax.f32 %v3978_v25, 0.0  ;;  %v4140_v38 = vpack.c.bf16 %v4100_v60, %v4099_v5  ;;  %v3999_v52 = vadd.f32 %v8581_v4, %v10299_v43  ;;  %v9073_v25 = vld [vmem:[%s11542_s7 + $0x8] ss:$0 sps:$4 sm:$0xff]   ;;  %v9074_v60 = vld [vmem:[%s11541_s6 + $0x18] sm:$0xff]  }
 0x549   : > { %v3990_v53 = vpop.f32.mrf.mxu0  ;;  %8949 = vmatprep.subr.msk.bf16.mxu1 %vm5302_vm2, %v9073_v25  ;;  %8807 = vmatprep.subr.bf16.mxu0 %v9074_v60 }
 0x54a   : > { %v4139_v21 = vpack.c.bf16 %v4098_v3, %v4097_v13  ;;  %v3991_v20 = vadd.f32 %v10299_v43, %v3990_v53  ;;  %v4103_v40 = vmax.f32 %v3999_v52, 0.0  ;;  %v10412_v3 = vld [vmem:[%s11543_s8 + $0x6] ss:$0 sm:$0xff] }
 0x54b   : > { %v8582_v12 = vpop.f32.mrf.mxu0 }
 0x54c   : > { %v4002_v54 = vadd.f32 %v8582_v12, %v10299_v43  ;;  %8647 = vmatprep.mubr.msk.bf16.mxu1 %vm1218_vm1, %v4139_v21  ;;  %v4101_v22 = vmax.f32 %v3991_v20, 0.0  ;;  %v9076_v20 = vld [vmem:[%s11542_s7] sm:$0xff]  }
 0x54d   : > { %v3993_v1 = vpop.f32.mrf.mxu0  ;;  %8648 = vmatmul.mubr.msk.bf16.gmra.mxu1 %vm1218_vm1, %v4140_v38 }
 0x54e   : > { %v3994_v46 = vadd.f32 %v10299_v43, %v3993_v1  ;;  %v4104_v9 = vmax.f32 %v4002_v54, 0.0 }
 0x54f   : > { %v8585_v36 = vpop.f32.mrf.mxu0 }
 0x550   : > { %v4102_v62 = vmax.f32 %v3994_v46, 0.0  ;;  %v4142_v0 = vpack.c.bf16 %v4104_v9, %v4103_v40  ;;  %v4015_v10 = vadd.f32 %v8585_v36, %v10299_v43 }
 0x551   : > { %v4006_v45 = vpop.f32.mrf.mxu0 }
 0x552   : > { %v4141_v59 = vpack.c.bf16 %v4102_v62, %v4101_v22  ;;  %v4007_v31 = vadd.f32 %v10299_v43, %v4006_v45  ;;  %v4107_v15 = vmax.f32 %v4015_v10, 0.0 }
 0x553   : > { %v8586_v61 = vpop.f32.mrf.mxu0 }
 0x554   : > { %v4018_v8 = vadd.f32 %v8586_v61, %v10299_v43  ;;  %8651 = vmatprep.mubr.msk.bf16.mxu1 %vm1218_vm1, %v4141_v59  ;;  %v4105_v47 = vmax.f32 %v4007_v31, 0.0  ;;  %v9075_v59 = vld [vmem:[%s11541_s6 + $0x10] sm:$0xff]  }
 0x555   : > { %v4009_v44 = vpop.f32.mrf.mxu0  ;;  %8652 = vmatmul.mubr.msk.bf16.gmra.mxu1 %vm1218_vm1, %v4142_v0 }
 0x556   : > { %v4010_v6 = vadd.f32 %v10299_v43, %v4009_v44  ;;  %v4108_v14 = vmax.f32 %v4018_v8, 0.0 }
 0x557   : > { %v8589_v39 = vpop.f32.mrf.mxu0 }
 0x558   : > { %v4106_v35 = vmax.f32 %v4010_v6, 0.0  ;;  %v4144_v57 = vpack.c.bf16 %v4108_v14, %v4107_v15  ;;  %v4031_v18 = vadd.f32 %v8589_v39, %v10299_v43  ;;  %v9077_v14 = vld [vmem:[%s11541_s6 + $0x8] sm:$0xff]  }
 0x559   : > { %v4022_v49 = vpop.f32.mrf.mxu0 }
 0x55a   : > { %v4143_v32 = vpack.c.bf16 %v4106_v35, %v4105_v47  ;;  %v4023_v29 = vadd.f32 %v10299_v43, %v4022_v49  ;;  %v4111_v41 = vmax.f32 %v4031_v18, 0.0 }
 0x55b   : > { %v8590_v48 = vpop.f32.mrf.mxu0 }
 0x55c   : > { %v4034_v27 = vadd.f32 %v8590_v48, %v10299_v43  ;;  %8655 = vmatprep.mubr.msk.bf16.mxu1 %vm1218_vm1, %v4143_v32  ;;  %v4109_v34 = vmax.f32 %v4023_v29, 0.0  ;;  %v9078_v48 = vld [vmem:[%s11541_s6] sm:$0xff]  }
 0x55d   : > { %v4025_v56 = vpop.f32.mrf.mxu0  ;;  %8656 = vmatmul.mubr.msk.bf16.gmra.mxu1 %vm1218_vm1, %v4144_v57 }
 0x55e   : > { %v4026_v26 = vadd.f32 %v10299_v43, %v4025_v56  ;;  %v4112_v28 = vmax.f32 %v4034_v27, 0.0 }
 0x55f   : > { %v8593_v30 = vpop.f32.mrf.mxu0 }
 0x560   : > { %v4110_v19 = vmax.f32 %v4026_v26, 0.0  ;;  %v4146_v7 = vpack.c.bf16 %v4112_v28, %v4111_v41  ;;  %v4047_v11 = vadd.f32 %v8593_v30, %v10299_v43 }
 0x561   : > { %v4038_v23 = vpop.f32.mrf.mxu0 }
 0x562   : > { %v4145_v58 = vpack.c.bf16 %v4110_v19, %v4109_v34  ;;  %v4039_v50 = vadd.f32 %v10299_v43, %v4038_v23  ;;  %v4115_v55 = vmax.f32 %v4047_v11, 0.0 }
 0x563   : > { %v8594_v24 = vpop.f32.mrf.mxu0 }
 0x564   : > { %v4050_v33 = vadd.f32 %v8594_v24, %v10299_v43  ;;  %8659 = vmatprep.mubr.msk.bf16.mxu1 %vm1218_vm1, %v4145_v58  ;;  %v4113_v16 = vmax.f32 %v4039_v50, 0.0 }
 0x565   : > { %v4041_v51 = vpop.f32.mrf.mxu0  ;;  %8660 = vmatmul.mubr.msk.bf16.gmra.mxu1 %vm1218_vm1, %v4146_v7 }
 0x566   : > { %v4042_v42 = vadd.f32 %v10299_v43, %v4041_v51  ;;  %v4116_v37 = vmax.f32 %v4050_v33, 0.0  ;;  %v5304_v43 = vsel %vm5302_vm2, %v9073_v25, 0 }
 0x567   : > { %8740 = vmatpush3.bf16.msra.mxu1 %v5304_v43 }
 0x568   : > { %v4114_v17 = vmax.f32 %v4042_v42, 0.0  ;;  %v4148_v2 = vpack.c.bf16 %v4116_v37, %v4115_v55  ;;  %8741 = vmatprep.subr.bf16.mxu1 %v9076_v20 }
 0x56a   : > { %v4147_v63 = vpack.c.bf16 %v4114_v17, %v4113_v16 }
 0x56b   : > { %8742 = vmatpush3.bf16.msra.mxu1 %v9076_v20 }
 0x56c   : > { %8663 = vmatprep.mubr.msk.bf16.mxu1 %vm1218_vm1, %v4147_v63 }
 0x56d   : > { %8664 = vmatmul.mubr.msk.bf16.gmra.mxu1 %vm1218_vm1, %v4148_v2 }
 0x5b5   : > { %v8605_v4 = vpop.f32.mrf.mxu1 }
 0x5b6   : > { %v4325_v38 = vadd.f32 %v8605_v4, %v10412_v3 }
 0x5b7   : > { %v4316_v13 = vpop.f32.mrf.mxu1 }
 0x5b8   : > { %v4317_v53 = vadd.f32 %v10412_v3, %v4316_v13  ;;  %v4573_v36 = vmax.f32 %v4325_v38, 0.0 }
 0x5b9   : > { %v8606_v5 = vpop.f32.mrf.mxu1 }
 0x5ba   : > { %v4328_v21 = vadd.f32 %v8606_v5, %v10412_v3  ;;  %v4571_v46 = vmax.f32 %v4317_v53, 0.0 }
 0x5bb   : > { %v4319_v12 = vpop.f32.mrf.mxu1 }
 0x5bc   : > { %v4320_v54 = vadd.f32 %v10412_v3, %v4319_v12  ;;  %v4574_v52 = vmax.f32 %v4328_v21, 0.0 }
 0x5bd   : > { %v8609_v1 = vpop.f32.mrf.mxu1 }
 0x5be   : > { %v4572_v9 = vmax.f32 %v4320_v54, 0.0  ;;  %v4636_v40 = vpack.c.bf16 %v4574_v52, %v4573_v36  ;;  %v4341_v31 = vadd.f32 %v8609_v1, %v10412_v3 }
 0x5bf   : > { %v4332_v22 = vpop.f32.mrf.mxu1 }
 0x5c0   : > { %v4635_v62 = vpack.c.bf16 %v4572_v9, %v4571_v46  ;;  %v4333_v0 = vadd.f32 %v10412_v3, %v4332_v22  ;;  %v4577_v35 = vmax.f32 %v4341_v31, 0.0 }
 0x5c1   : > { %v8610_v45 = vpop.f32.mrf.mxu1 }
 0x5c2   : > { %v4344_v61 = vadd.f32 %v8610_v45, %v10412_v3  ;;  %8675 = vmatprep.mubr.msk.bf16.mxu0 %vm1218_vm1, %v4635_v62  ;;  %v4575_v39 = vmax.f32 %v4333_v0, 0.0 }
 0x5c3   : > { %v4335_v8 = vpop.f32.mrf.mxu1  ;;  %8676 = vmatmul.mubr.msk.bf16.vlgmr.msra.gmra.mxu0 %vm1218_vm1, %v4636_v40 }
 0x5c4   : > { %v4336_v10 = vadd.f32 %v10412_v3, %v4335_v8  ;;  %8808 = vmatpush3.bf16.msra.mxu0 %v9074_v60  ;;  %v4578_v44 = vmax.f32 %v4344_v61, 0.0 }
 0x5c5   : > { %v8613_v6 = vpop.f32.mrf.mxu1  ;;  %8809 = vmatprep.subr.bf16.mxu0 %v9075_v59 }
 0x5c6   : > { %v4576_v47 = vmax.f32 %v4336_v10, 0.0  ;;  %v4638_v32 = vpack.c.bf16 %v4578_v44, %v4577_v35  ;;  %v4357_v18 = vadd.f32 %v8613_v6, %v10412_v3 }
 0x5c7   : > { %v4348_v15 = vpop.f32.mrf.mxu1 }
 0x5c8   : > { %v4637_v49 = vpack.c.bf16 %v4576_v47, %v4575_v39  ;;  %8810 = vmatpush3.bf16.msra.mxu0 %v9075_v59  ;;  %v4349_v29 = vadd.f32 %v10412_v3, %v4348_v15  ;;  %v4581_v41 = vmax.f32 %v4357_v18, 0.0 }
 0x5c9   : > { %v8614_v57 = vpop.f32.mrf.mxu1  ;;  %8811 = vmatprep.subr.bf16.mxu0 %v9077_v14 }
 0x5ca   : > { %v4360_v27 = vadd.f32 %v8614_v57, %v10412_v3  ;;  %8679 = vmatprep.mubr.msk.bf16.mxu0 %vm1218_vm1, %v4637_v49  ;;  %v4579_v34 = vmax.f32 %v4349_v29, 0.0 }
 0x5cb   : > { %v4351_v56 = vpop.f32.mrf.mxu1  ;;  %8680 = vmatmul.mubr.msk.bf16.gmra.mxu0 %vm1218_vm1, %v4638_v32 }
 0x5cc   : > { %v4352_v26 = vadd.f32 %v10412_v3, %v4351_v56  ;;  %8812 = vmatpush3.bf16.msra.mxu0 %v9077_v14  ;;  %v4582_v28 = vmax.f32 %v4360_v27, 0.0 }
 0x5cd   : > { %v8617_v30 = vpop.f32.mrf.mxu1  ;;  %8813 = vmatprep.subr.bf16.mxu0 %v9078_v48 }
 0x5ce   : > { %v4580_v19 = vmax.f32 %v4352_v26, 0.0  ;;  %v4640_v7 = vpack.c.bf16 %v4582_v28, %v4581_v41  ;;  %v4373_v11 = vadd.f32 %v8617_v30, %v10412_v3 }
 0x5cf   : > { %v4364_v23 = vpop.f32.mrf.mxu1 }
 0x5d0   : > { %v4639_v58 = vpack.c.bf16 %v4580_v19, %v4579_v34  ;;  %8814 = vmatpush3.bf16.msra.mxu0 %v9078_v48  ;;  %v4365_v50 = vadd.f32 %v10412_v3, %v4364_v23  ;;  %v4585_v63 = vmax.f32 %v4373_v11, 0.0 }
 0x5d1   : > { %v8618_v24 = vpop.f32.mrf.mxu1 }
 0x5d2   : > { %v4376_v33 = vadd.f32 %v8618_v24, %v10412_v3  ;;  %8683 = vmatprep.mubr.msk.bf16.mxu0 %vm1218_vm1, %v4639_v58  ;;  %v4583_v17 = vmax.f32 %v4365_v50, 0.0 }
 0x5d3   : > { %v4367_v51 = vpop.f32.mrf.mxu1  ;;  %8684 = vmatmul.mubr.msk.bf16.gmra.mxu0 %vm1218_vm1, %v4640_v7 }
 0x5d4   : > { %v4368_v42 = vadd.f32 %v10412_v3, %v4367_v51  ;;  %v4586_v37 = vmax.f32 %v4376_v33, 0.0 }
 0x5d5   : > { %v8621_v16 = vpop.f32.mrf.mxu1 }
 0x5d6   : > { %v4584_v55 = vmax.f32 %v4368_v42, 0.0  ;;  %v4642_v60 = vpack.c.bf16 %v4586_v37, %v4585_v63  ;;  %v4389_v5 = vadd.f32 %v8621_v16, %v10412_v3 }
 0x5d7   : > { %v4380_v2 = vpop.f32.mrf.mxu1 }
 0x5d8   : > { %v4641_v25 = vpack.c.bf16 %v4584_v55, %v4583_v17  ;;  %v4381_v4 = vadd.f32 %v10412_v3, %v4380_v2  ;;  %v4589_v52 = vmax.f32 %v4389_v5, 0.0 }
 0x5d9   : > { %v8622_v43 = vpop.f32.mrf.mxu1 }
 0x5da   : > { %v4392_v13 = vadd.f32 %v8622_v43, %v10412_v3  ;;  %8687 = vmatprep.mubr.msk.bf16.mxu0 %vm1218_vm1, %v4641_v25  ;;  %v4587_v20 = vmax.f32 %v4381_v4, 0.0 }
 0x5db   : > { %v4383_v53 = vpop.f32.mrf.mxu1  ;;  %8688 = vmatmul.mubr.msk.bf16.gmra.mxu0 %vm1218_vm1, %v4642_v60 }
 0x5dc   : > { %v4384_v21 = vadd.f32 %v10412_v3, %v4383_v53  ;;  %v4590_v38 = vmax.f32 %v4392_v13, 0.0 }
 0x5dd   : > { %v8625_v12 = vpop.f32.mrf.mxu1 }
 0x5de   : > { %v4588_v54 = vmax.f32 %v4384_v21, 0.0  ;;  %v4644_v9 = vpack.c.bf16 %v4590_v38, %v4589_v52  ;;  %v4405_v40 = vadd.f32 %v8625_v12, %v10412_v3 }
 0x5df   : > { %v4396_v1 = vpop.f32.mrf.mxu1 }
 0x5e0   : > { %v4643_v46 = vpack.c.bf16 %v4588_v54, %v4587_v20  ;;  %v4397_v22 = vadd.f32 %v10412_v3, %v4396_v1  ;;  %v4593_v10 = vmax.f32 %v4405_v40, 0.0 }
 0x5e1   : > { %v8626_v36 = vpop.f32.mrf.mxu1 }
 0x5e2   : > { %v4408_v62 = vadd.f32 %v8626_v36, %v10412_v3  ;;  %8691 = vmatprep.mubr.msk.bf16.mxu0 %vm1218_vm1, %v4643_v46  ;;  %v4591_v31 = vmax.f32 %v4397_v22, 0.0 }
 0x5e3   : > { %v4399_v45 = vpop.f32.mrf.mxu1  ;;  %8692 = vmatmul.mubr.msk.bf16.gmra.mxu0 %vm1218_vm1, %v4644_v9 }
 0x5e4   : > { %v4400_v59 = vadd.f32 %v10412_v3, %v4399_v45  ;;  %v4594_v0 = vmax.f32 %v4408_v62, 0.0 }
 0x5e5   : > { %v8629_v61 = vpop.f32.mrf.mxu1 }
 0x5e6   : > { %v4592_v8 = vmax.f32 %v4400_v59, 0.0  ;;  %v4646_v14 = vpack.c.bf16 %v4594_v0, %v4593_v10  ;;  %v4421_v15 = vadd.f32 %v8629_v61, %v10412_v3  ;;  %v574_v59 = vld [vmem:[%s10488_s13] sm:$0xff]  ;;  %v575_v0 = vld [vmem:[%s10488_s13 + $0x8] sm:$0xff]  ;;  %v577_v10 = vld [vmem:[%s10488_s13 + $0x18] sm:$0xff] }
 0x5e7   : > { %v4412_v44 = vpop.f32.mrf.mxu1 }
 0x5e8   : > { %v4645_v6 = vpack.c.bf16 %v4592_v8, %v4591_v31  ;;  %v4413_v47 = vadd.f32 %v10412_v3, %v4412_v44  ;;  %v4597_v18 = vmax.f32 %v4421_v15, 0.0  ;;  %v638_v31 = vpack.c.bf16 %v575_v0, %v574_v59  ;;  %v576_v8 = vld [vmem:[%s10488_s13 + $0x10] sm:$0xff] }
 0x5e9   : > { %v8630_v39 = vpop.f32.mrf.mxu1  ;;  %v588_v0 = vld [vmem:[%s10488_s13 + $0x70] sm:$0xff] }
 0x5ea   : > { %v4424_v35 = vadd.f32 %v8630_v39, %v10412_v3  ;;  %8695 = vmatprep.mubr.msk.bf16.mxu0 %vm1218_vm1, %v4645_v6  ;;  %v4595_v29 = vmax.f32 %v4413_v47, 0.0  ;;  %8743 = vmatprep.mubr.msk.bf16.mxu1 %vm5205_vm3, %v638_v31 }
 0x5eb   : > { %v4415_v49 = vpop.f32.mrf.mxu1  ;;  %8696 = vmatmul.mubr.msk.bf16.gmra.mxu0 %vm1218_vm1, %v4646_v14  ;;  %v639_v14 = vpack.c.bf16 %v577_v10, %v576_v8 }
 0x5ec   : > { %v4416_v32 = vadd.f32 %v10412_v3, %v4415_v49  ;;  %v4598_v57 = vmax.f32 %v4424_v35, 0.0 }
 0x5ed   : > { %v8633_v48 = vpop.f32.mrf.mxu1  ;;  %8744 = vmatmul.mubr.msk.bf16.vlgmr.msra.gmra.mxu1 %vm5205_vm3, %v639_v14 }
 0x5ee   : > { %v4596_v27 = vmax.f32 %v4416_v32, 0.0  ;;  %v4648_v28 = vpack.c.bf16 %v4598_v57, %v4597_v18  ;;  %v4437_v41 = vadd.f32 %v8633_v48, %v10412_v3 }
 0x5ef   : > { %v4428_v56 = vpop.f32.mrf.mxu1 }
 0x5f0   : > { %v4647_v26 = vpack.c.bf16 %v4596_v27, %v4595_v29  ;;  %v4429_v34 = vadd.f32 %v10412_v3, %v4428_v56  ;;  %v4601_v11 = vmax.f32 %v4437_v41, 0.0  ;;  %v578_v56 = vld [vmem:[%s10488_s13 + $0x20] sm:$0xff] }
 0x5f1   : > { %v8634_v30 = vpop.f32.mrf.mxu1 }
 0x5f2   : > { %v4440_v19 = vadd.f32 %v8634_v30, %v10412_v3  ;;  %8699 = vmatprep.mubr.msk.bf16.mxu0 %vm1218_vm1, %v4647_v26  ;;  %v4599_v50 = vmax.f32 %v4429_v34, 0.0  ;;  %v579_v26 = vld [vmem:[%s10488_s13 + $0x28] sm:$0xff]  ;;  %v580_v34 = vld [vmem:[%s10488_s13 + $0x30] sm:$0xff] }
 0x5f3   : > { %v4431_v23 = vpop.f32.mrf.mxu1  ;;  %8700 = vmatmul.mubr.msk.bf16.gmra.mxu0 %vm1218_vm1, %v4648_v28  ;;  %v640_v30 = vpack.c.bf16 %v579_v26, %v578_v56  ;;  %v592_v26 = vld [vmem:[%s10488_s13 + $0x90] sm:$0xff] }
 0x5f4   : > { %v4432_v58 = vadd.f32 %v10412_v3, %v4431_v23  ;;  %v4602_v7 = vmax.f32 %v4440_v19, 0.0  ;;  %v581_v19 = vld [vmem:[%s10488_s13 + $0x38] sm:$0xff] }
 0x5f5   : > { %v8637_v24 = vpop.f32.mrf.mxu1  ;;  %8747 = vmatprep.mubr.msk.bf16.mxu1 %vm5205_vm3, %v640_v30 }
 0x5f6   : > { %v4600_v33 = vmax.f32 %v4432_v58, 0.0  ;;  %v4650_v37 = vpack.c.bf16 %v4602_v7, %v4601_v11  ;;  %v4453_v63 = vadd.f32 %v8637_v24, %v10412_v3  ;;  %v641_v58 = vpack.c.bf16 %v581_v19, %v580_v34 }
 0x5f7   : > { %v4444_v51 = vpop.f32.mrf.mxu1 }
 0x5f8   : > { %v4649_v42 = vpack.c.bf16 %v4600_v33, %v4599_v50  ;;  %v4445_v17 = vadd.f32 %v10412_v3, %v4444_v51  ;;  %v4605_v5 = vmax.f32 %v4453_v63, 0.0  ;;  %8748 = vmatmul.mubr.msk.bf16.gmra.mxu1 %vm5205_vm3, %v641_v58  ;;  %v582_v63 = vld [vmem:[%s10488_s13 + $0x40] sm:$0xff] }
 0x5f9   : > { %v8638_v16 = vpop.f32.mrf.mxu1 }
 0x5fa   : > { %v4456_v55 = vadd.f32 %v8638_v16, %v10412_v3  ;;  %8703 = vmatprep.mubr.msk.bf16.mxu0 %vm1218_vm1, %v4649_v42  ;;  %v4603_v4 = vmax.f32 %v4445_v17, 0.0 }
 0x5fb   : > { %v4447_v2 = vpop.f32.mrf.mxu1  ;;  %8704 = vmatmul.mubr.msk.bf16.gmra.mxu0 %vm1218_vm1, %v4650_v37 }
 0x5fc   : > { %v4448_v25 = vadd.f32 %v10412_v3, %v4447_v2  ;;  %v4606_v60 = vmax.f32 %v4456_v55, 0.0  ;;  %v583_v2 = vld [vmem:[%s10488_s13 + $0x48] sm:$0xff] }
 0x5fd   : > { %v8641_v43 = vpop.f32.mrf.mxu1 }
 0x5fe   : > { %v4604_v13 = vmax.f32 %v4448_v25, 0.0  ;;  %v4652_v38 = vpack.c.bf16 %v4606_v60, %v4605_v5  ;;  %v4469_v52 = vadd.f32 %v8641_v43, %v10412_v3  ;;  %v642_v60 = vpack.c.bf16 %v583_v2, %v582_v63  ;;  %v584_v43 = vld [vmem:[%s10488_s13 + $0x50] sm:$0xff] }
 0x5ff   : > { %v4460_v53 = vpop.f32.mrf.mxu1  ;;  %v596_v2 = vld [vmem:[%s10488_s13 + $0xb0] sm:$0xff] }
 0x600   : > { %v4651_v21 = vpack.c.bf16 %v4604_v13, %v4603_v4  ;;  %v4461_v20 = vadd.f32 %v10412_v3, %v4460_v53  ;;  %v4609_v40 = vmax.f32 %v4469_v52, 0.0  ;;  %v585_v4 = vld [vmem:[%s10488_s13 + $0x58] sm:$0xff]  ;;  %8751 = vmatprep.mubr.msk.bf16.mxu1 %vm5205_vm3, %v642_v60 }
 0x601   : > { %v8642_v12 = vpop.f32.mrf.mxu1  ;;  %v643_v53 = vpack.c.bf16 %v585_v4, %v584_v43 }
 0x602   : > { %v4472_v54 = vadd.f32 %v8642_v12, %v10412_v3  ;;  %8707 = vmatprep.mubr.msk.bf16.mxu0 %vm1218_vm1, %v4651_v21  ;;  %v4607_v22 = vmax.f32 %v4461_v20, 0.0 }
 0x603   : > { %v4463_v1 = vpop.f32.mrf.mxu1  ;;  %8708 = vmatmul.mubr.msk.bf16.gmra.mxu0 %vm1218_vm1, %v4652_v38  ;;  %8752 = vmatmul.mubr.msk.bf16.gmra.mxu1 %vm5205_vm3, %v643_v53 }
 0x604   : > { %v4464_v46 = vadd.f32 %v10412_v3, %v4463_v1  ;;  %v4610_v9 = vmax.f32 %v4472_v54, 0.0 }
 0x605   : > { %v8645_v36 = vpop.f32.mrf.mxu1 }
 0x606   : > { %v4608_v62 = vmax.f32 %v4464_v46, 0.0  ;;  %v4654_v44 = vpack.c.bf16 %v4610_v9, %v4609_v40  ;;  %v4485_v35 = vadd.f32 %v8645_v36, %v10412_v3  ;;  %v587_v40 = vld [vmem:[%s10488_s13 + $0x68] sm:$0xff] }
 0x607   : > { %v4476_v45 = vpop.f32.mrf.mxu1 }
 0x608   : > { %v4653_v61 = vpack.c.bf16 %v4608_v62, %v4607_v22  ;;  %v4477_v39 = vadd.f32 %v10412_v3, %v4476_v45  ;;  %v4613_v27 = vmax.f32 %v4485_v35, 0.0  ;;  %v586_v62 = vld [vmem:[%s10488_s13 + $0x60] sm:$0xff] }
 0x609   : > { %v8646_v6 = vpop.f32.mrf.mxu1  ;;  %v644_v59 = vpack.c.bf16 %v587_v40, %v586_v62  ;;  %v601_v62 = vld [vmem:[%s10488_s13 + $0xd8] sm:$0xff] }
 0x60a   : > { %v4488_v47 = vadd.f32 %v8646_v6, %v10412_v3  ;;  %8711 = vmatprep.mubr.msk.bf16.mxu0 %vm1218_vm1, %v4653_v61  ;;  %v4611_v48 = vmax.f32 %v4477_v39, 0.0  ;;  %v589_v61 = vld [vmem:[%s10488_s13 + $0x78] sm:$0xff] }
 0x60b   : > { %v4479_v15 = vpop.f32.mrf.mxu1  ;;  %8712 = vmatmul.mubr.msk.bf16.gmra.mxu0 %vm1218_vm1, %v4654_v44  ;;  %v645_v10 = vpack.c.bf16 %v589_v61, %v588_v0  ;;  %8755 = vmatprep.mubr.msk.bf16.mxu1 %vm5205_vm3, %v644_v59  ;;  %v603_v59 = vld [vmem:[%s10488_s13 + $0xe8] sm:$0xff]  ;;  %v604_v61 = vld [vmem:[%s10488_s13 + $0xf0] sm:$0xff] }
 0x60c   : > { %v4480_v49 = vadd.f32 %v10412_v3, %v4479_v15  ;;  %v4614_v32 = vmax.f32 %v4488_v47, 0.0 }
 0x60d   : > { %v8649_v57 = vpop.f32.mrf.mxu1  ;;  %8756 = vmatmul.mubr.msk.bf16.gmra.mxu1 %vm5205_vm3, %v645_v10  ;;  %v606_v10 = vld [vmem:[%s10488_s13 + $0x100] sm:$0xff] }
 0x60e   : > { %v4612_v29 = vmax.f32 %v4480_v49, 0.0  ;;  %v4656_v41 = vpack.c.bf16 %v4614_v32, %v4613_v27  ;;  %v4501_v50 = vadd.f32 %v8649_v57, %v10412_v3  ;;  %v591_v27 = vld [vmem:[%s10488_s13 + $0x88] sm:$0xff] }
 0x60f   : > { %v4492_v18 = vpop.f32.mrf.mxu1 }
 0x610   : > { %v4655_v28 = vpack.c.bf16 %v4612_v29, %v4611_v48  ;;  %v4493_v7 = vadd.f32 %v10412_v3, %v4492_v18  ;;  %v4617_v17 = vmax.f32 %v4501_v50, 0.0  ;;  %v590_v29 = vld [vmem:[%s10488_s13 + $0x80] sm:$0xff] }
 0x611   : > { %v8650_v23 = vpop.f32.mrf.mxu1  ;;  %v646_v56 = vpack.c.bf16 %v591_v27, %v590_v29  ;;  %v614_v29 = vld [vmem:[%s10488_s13 + $0x140] sm:$0xff]  ;;  %v615_v27 = vld [vmem:[%s10488_s13 + $0x148] sm:$0xff] }
 0x612   : > { %v4504_v24 = vadd.f32 %v8650_v23, %v10412_v3  ;;  %8715 = vmatprep.mubr.msk.bf16.mxu0 %vm1218_vm1, %v4655_v28  ;;  %v4615_v37 = vmax.f32 %v4493_v7, 0.0  ;;  %v593_v28 = vld [vmem:[%s10488_s13 + $0x98] sm:$0xff] }
 0x613   : > { %v4495_v33 = vpop.f32.mrf.mxu1  ;;  %8716 = vmatmul.mubr.msk.bf16.gmra.mxu0 %vm1218_vm1, %v4656_v41  ;;  %v647_v19 = vpack.c.bf16 %v593_v28, %v592_v26  ;;  %8759 = vmatprep.mubr.msk.bf16.mxu1 %vm5205_vm3, %v646_v56  ;;  %v616_v56 = vld [vmem:[%s10488_s13 + $0x150] sm:$0xff]  ;;  %v617_v26 = vld [vmem:[%s10488_s13 + $0x158] sm:$0xff] }
 0x614   : > { %v4496_v11 = vadd.f32 %v10412_v3, %v4495_v33  ;;  %v4618_v51 = vmax.f32 %v4504_v24, 0.0  ;;  %v659_v28 = vpack.c.bf16 %v617_v26, %v616_v56 }
 0x615   : > { %v8653_v42 = vpop.f32.mrf.mxu1  ;;  %8760 = vmatmul.mubr.msk.bf16.gmra.mxu1 %vm5205_vm3, %v647_v19 }
 0x616   : > { %v4616_v16 = vmax.f32 %v4496_v11, 0.0  ;;  %v4658_v13 = vpack.c.bf16 %v4618_v51, %v4617_v17  ;;  %v4517_v12 = vadd.f32 %v8653_v42, %v10412_v3  ;;  %v595_v17 = vld [vmem:[%s10488_s13 + $0xa8] sm:$0xff] }
 0x617   : > { %v4508_v55 = vpop.f32.mrf.mxu1 }
 0x618   : > { %v4657_v25 = vpack.c.bf16 %v4616_v16, %v4615_v37  ;;  %v4509_v21 = vadd.f32 %v10412_v3, %v4508_v55  ;;  %v4621_v36 = vmax.f32 %v4517_v12, 0.0  ;;  %v594_v16 = vld [vmem:[%s10488_s13 + $0xa0] sm:$0xff] }
 0x619   : > { %v8654_v5 = vpop.f32.mrf.mxu1  ;;  %v648_v63 = vpack.c.bf16 %v595_v17, %v594_v16  ;;  %v625_v16 = vld [vmem:[%s10488_s13 + $0x198] sm:$0xff] }
 0x61a   : > { %v4520_v38 = vadd.f32 %v8654_v5, %v10412_v3  ;;  %8719 = vmatprep.mubr.msk.bf16.mxu0 %vm1218_vm1, %v4657_v25  ;;  %v4619_v46 = vmax.f32 %v4509_v21, 0.0  ;;  %v597_v25 = vld [vmem:[%s10488_s13 + $0xb8] sm:$0xff] }
 0x61b   : > { %v4511_v20 = vpop.f32.mrf.mxu1  ;;  %8720 = vmatmul.mubr.msk.bf16.gmra.mxu0 %vm1218_vm1, %v4658_v13  ;;  %v649_v4 = vpack.c.bf16 %v597_v25, %v596_v2  ;;  %8763 = vmatprep.mubr.msk.bf16.mxu1 %vm5205_vm3, %v648_v63  ;;  %v627_v63 = vld [vmem:[%s10488_s13 + $0x1a8] sm:$0xff]  ;;  %v628_v25 = vld [vmem:[%s10488_s13 + $0x1b0] sm:$0xff] }
 0x61c   : > { %v4512_v54 = vadd.f32 %v10412_v3, %v4511_v20  ;;  %v4622_v52 = vmax.f32 %v4520_v38, 0.0 }
 0x61d   : > { %v8657_v1 = vpop.f32.mrf.mxu1  ;;  %8764 = vmatmul.mubr.msk.bf16.gmra.mxu1 %vm5205_vm3, %v649_v4  ;;  %v630_v4 = vld [vmem:[%s10488_s13 + $0x1c0] sm:$0xff] }
 0x61e   : > { %v4620_v9 = vmax.f32 %v4512_v54, 0.0  ;;  %v4660_v31 = vpack.c.bf16 %v4622_v52, %v4621_v36  ;;  %v4533_v14 = vadd.f32 %v8657_v1, %v10412_v3  ;;  %v598_v1 = vld [vmem:[%s10488_s13 + $0xc0] sm:$0xff] }
 0x61f   : > { %v4524_v22 = vpop.f32.mrf.mxu1 }
 0x620   : > { %v4659_v45 = vpack.c.bf16 %v4620_v9, %v4619_v46  ;;  %v4525_v44 = vadd.f32 %v10412_v3, %v4524_v22  ;;  %v4625_v57 = vmax.f32 %v4533_v14, 0.0  ;;  %v599_v46 = vld [vmem:[%s10488_s13 + $0xc8] sm:$0xff]  ;;  %v600_v22 = vld [vmem:[%s10488_s13 + $0xd0] sm:$0xff] }
 0x621   : > { %v8658_v8 = vpop.f32.mrf.mxu1  ;;  %v650_v36 = vpack.c.bf16 %v599_v46, %v598_v1  ;;  %v608_v14 = vld [vmem:[%s10488_s13 + $0x110] sm:$0xff]  ;;  %v637_v1 = vld [vmem:[%s10488_s13 + $0x1f8] sm:$0xff] }
 0x622   : > { %v4536_v6 = vadd.f32 %v8658_v8, %v10412_v3  ;;  %8723 = vmatprep.mubr.msk.bf16.mxu0 %vm1218_vm1, %v4659_v45  ;;  %v4623_v49 = vmax.f32 %v4525_v44, 0.0  ;;  %v651_v45 = vpack.c.bf16 %v601_v62, %v600_v22  ;;  %v607_v44 = vld [vmem:[%s10488_s13 + $0x108] sm:$0xff]  ;;  %v10631_v22 = vld [vmem:[%s11543_s8 + $0x7] ss:$0 sm:$0xff] }
 0x623   : > { %v4527_v39 = vpop.f32.mrf.mxu1  ;;  %8724 = vmatmul.mubr.msk.bf16.gmra.mxu0 %vm1218_vm1, %v4660_v31  ;;  %8767 = vmatprep.mubr.msk.bf16.mxu1 %vm5205_vm3, %v650_v36  ;;  %v605_v31 = vld [vmem:[%s10488_s13 + $0xf8] sm:$0xff] }
 0x624   : > { %v4528_v47 = vadd.f32 %v10412_v3, %v4527_v39  ;;  %v4626_v35 = vmax.f32 %v4536_v6, 0.0  ;;  %v653_v8 = vpack.c.bf16 %v605_v31, %v604_v61  ;;  %v654_v6 = vpack.c.bf16 %v607_v44, %v606_v10  ;;  %v609_v39 = vld [vmem:[%s10488_s13 + $0x118] sm:$0xff]  ;;  %v9081_v61 = vld [vmem:[%s11545_s10] sm:$0xff]  }
 0x625   : > { %v8661_v15 = vpop.f32.mrf.mxu1  ;;  %8768 = vmatmul.mubr.msk.bf16.gmra.mxu1 %vm5205_vm3, %v651_v45 }
 0x626   : > { %v4624_v32 = vmax.f32 %v4528_v47, 0.0  ;;  %v4662_v30 = vpack.c.bf16 %v4626_v35, %v4625_v57  ;;  %v4549_v58 = vadd.f32 %v8661_v15, %v10412_v3  ;;  %v655_v47 = vpack.c.bf16 %v609_v39, %v608_v14  ;;  %v610_v35 = vld [vmem:[%s10488_s13 + $0x120] sm:$0xff]  ;;  %v611_v15 = vld [vmem:[%s10488_s13 + $0x128] sm:$0xff]  ;;  %v613_v57 = vld [vmem:[%s10488_s13 + $0x138] sm:$0xff] }
 0x627   : > { %v4540_v48 = vpop.f32.mrf.mxu1 }
 0x628   : > { %v4661_v18 = vpack.c.bf16 %v4624_v32, %v4623_v49  ;;  %v4541_v41 = vadd.f32 %v10412_v3, %v4540_v48  ;;  %v4629_v42 = vmax.f32 %v4549_v58, 0.0  ;;  %v656_v49 = vpack.c.bf16 %v611_v15, %v610_v35  ;;  %v612_v32 = vld [vmem:[%s10488_s13 + $0x130] sm:$0xff] }
 0x629   : > { %v8662_v34 = vpop.f32.mrf.mxu1  ;;  %v657_v48 = vpack.c.bf16 %v613_v57, %v612_v32 }
 0x62a   : > { %v4552_v23 = vadd.f32 %v8662_v34, %v10412_v3  ;;  %8727 = vmatprep.mubr.msk.bf16.mxu0 %vm1218_vm1, %v4661_v18  ;;  %v4627_v11 = vmax.f32 %v4541_v41, 0.0  ;;  %v658_v18 = vpack.c.bf16 %v615_v27, %v614_v29  ;;  %v619_v34 = vld [vmem:[%s10488_s13 + $0x168] sm:$0xff]  ;;  %v620_v41 = vld [vmem:[%s10488_s13 + $0x170] sm:$0xff] }
 0x62b   : > { %v4543_v7 = vpop.f32.mrf.mxu1  ;;  %8728 = vmatmul.mubr.msk.bf16.gmra.mxu0 %vm1218_vm1, %v4662_v30  ;;  %v618_v30 = vld [vmem:[%s10488_s13 + $0x160] sm:$0xff] }
 0x62c   : > { %v4544_v24 = vadd.f32 %v10412_v3, %v4543_v7  ;;  %v4630_v50 = vmax.f32 %v4552_v23, 0.0  ;;  %v660_v19 = vpack.c.bf16 %v619_v34, %v618_v30  ;;  %v621_v23 = vld [vmem:[%s10488_s13 + $0x178] sm:$0xff]  ;;  %v9079_v7 = vld [vmem:[%s11545_s10 + $0x10] ss:$0 sps:$4 sm:$0x11]  }
 0x62d   : > { %v8665_v33 = vpop.f32.mrf.mxu1  ;;  %v661_v58 = vpack.c.bf16 %v621_v23, %v620_v41 }
 0x62e   : > { %v4628_v51 = vmax.f32 %v4544_v24, 0.0  ;;  %v4664_v60 = vpack.c.bf16 %v4630_v50, %v4629_v42  ;;  %v4565_v53 = vadd.f32 %v8665_v33, %v10412_v3  ;;  %v9170_v24 = vmov 0   ;;  %v622_v33 = vld [vmem:[%s10488_s13 + $0x180] sm:$0xff] }
 0x62f   : > { %v4556_v37 = vpop.f32.mrf.mxu1  ;;  %v6364_v50 = vsel %vm6362_vm4, 65535, %v9170_v24 }
 0x630   : > { %v4663_v55 = vpack.c.bf16 %v4628_v51, %v4627_v11  ;;  %v4557_v13 = vadd.f32 %v10412_v3, %v4556_v37  ;;  %v4633_v52 = vmax.f32 %v4565_v53, 0.0  ;;  %v623_v11 = vld [vmem:[%s10488_s13 + $0x188] sm:$0xff]  ;;  %v6366_v51 = vand.u32 %v9079_v7, %v6364_v50  ;;  %v624_v37 = vld [vmem:[%s10488_s13 + $0x190] sm:$0xff] }
 0x631   : > { %v8666_v43 = vpop.f32.mrf.mxu1  ;;  %v662_v42 = vpack.c.bf16 %v623_v11, %v622_v33  ;;  %v663_v17 = vpack.c.bf16 %v625_v16, %v624_v37  ;;  %v632_v53 = vld [vmem:[%s10488_s13 + $0x1d0] sm:$0xff] }
 0x632   : > { %v4568_v5 = vadd.f32 %v8666_v43, %v10412_v3  ;;  %8731 = vmatprep.mubr.msk.bf16.mxu0 %vm1218_vm1, %v4663_v55  ;;  %v4631_v20 = vmax.f32 %v4557_v13, 0.0  ;;  %8879 = vmatprep.subr.bf16.mxu1 %v6366_v51  ;;  %v626_v55 = vld [vmem:[%s10488_s13 + $0x1a0] sm:$0xff]  ;;  %v631_v13 = vld [vmem:[%s10488_s13 + $0x1c8] sm:$0xff] }
 0x633   : > { %v4559_v21 = vpop.f32.mrf.mxu1  ;;  %8732 = vmatmul.mubr.msk.bf16.gmra.mxu0 %vm1218_vm1, %v4664_v60  ;;  %8880 = vmatpush3.bf16.msra.mxu1 %v6366_v51  ;;  %v664_v2 = vpack.c.bf16 %v627_v63, %v626_v55  ;;  %v629_v60 = vld [vmem:[%s10488_s13 + $0x1b8] sm:$0xff] }
 0x634   : > { %v4560_v38 = vadd.f32 %v10412_v3, %v4559_v21  ;;  %v4634_v12 = vmax.f32 %v4568_v5, 0.0  ;;  %v602_v3 = vld [vmem:[%s10488_s13 + $0xe0] sm:$0xff]  ;;  %v665_v43 = vpack.c.bf16 %v629_v60, %v628_v25  ;;  %v666_v5 = vpack.c.bf16 %v631_v13, %v630_v4  ;;  %v633_v21 = vld [vmem:[%s10488_s13 + $0x1d8] sm:$0xff] }
 0x635   : > { %v652_v0 = vpack.c.bf16 %v603_v59, %v602_v3 }
 0x636   : > { %v4632_v54 = vmax.f32 %v4560_v38, 0.0  ;;  %v4666_v40 = vpack.c.bf16 %v4634_v12, %v4633_v52  ;;  %v667_v38 = vpack.c.bf16 %v633_v21, %v632_v53  ;;  %v634_v12 = vld [vmem:[%s10488_s13 + $0x1e0] sm:$0xff]  ;;  %v636_v52 = vld [vmem:[%s10488_s13 + $0x1f0] sm:$0xff] }
 0x637   : > { %8771 = vmatprep.mubr.msk.bf16.mxu1 %vm5205_vm3, %v652_v0  ;;  %v669_v46 = vpack.c.bf16 %v637_v1, %v636_v52  ;;  %v9080_v0 = vld [vmem:[%s11545_s10 + $0x8] sm:$0xff]  }
 0x638   : > { %v4665_v9 = vpack.c.bf16 %v4632_v54, %v4631_v20  ;;  %8772 = vmatmul.mubr.msk.bf16.gmra.mxu1 %vm5205_vm3, %v653_v8  ;;  %v635_v20 = vld [vmem:[%s10488_s13 + $0x1e8] sm:$0xff]  ;;  %8881 = vmatprep.subr.bf16.mxu1 %v9080_v0  ;;  %s441_s13 = sand.u32 1, %s9128_s21   ;;  %s6730_s21 = ssub.s32 (%p9261_p4), 125, %s9269_s14 }
 0x639   : > { %8775 = vmatprep.mubr.msk.bf16.mxu1 %vm5205_vm3, %v654_v6  ;;  %v668_v54 = vpack.c.bf16 %v635_v20, %v634_v12  ;;  %8882 = vmatpush3.bf16.msra.mxu1 %v9080_v0  ;;  %s7206_s19 = sshll.u32 %s441_s13, 9  ;;  %p6731_p8 = scmp.lt.s32.totalorder (%p9261_p4), %s6730_s21, 64 }
 0x63a   : > { %8735 = vmatprep.mubr.msk.bf16.mxu0 %vm1218_vm1, %v4665_v9  ;;  %8883 = vmatprep.subr.bf16.mxu1 %v9081_v61  ;;  %s11136_s16 = scalar_lea.vmem [#allocation2], %s7206_s19  }
 0x63b   : > { %8736 = vmatmul.mubr.msk.bf16.gmra.mxu0 %vm1218_vm1, %v4666_v40 }
 0x63d   : > { %8884 = vmatpush3.bf16.msra.mxu1 %v9081_v61 }
 0x640   : > { %8776 = vmatmul.mubr.msk.bf16.gmra.mxu1 %vm5205_vm3, %v655_v47 }
 0x641   : > { %8779 = vmatprep.mubr.msk.bf16.mxu1 %vm5205_vm3, %v656_v49 }
 0x648   : > { %8780 = vmatmul.mubr.msk.bf16.gmra.mxu1 %vm5205_vm3, %v657_v48 }
 0x649   : > { %8783 = vmatprep.mubr.msk.bf16.mxu1 %vm5205_vm3, %v658_v18 }
 0x650   : > { %8784 = vmatmul.mubr.msk.bf16.gmra.mxu1 %vm5205_vm3, %v659_v28 }
 0x651   : > { %8787 = vmatprep.mubr.msk.bf16.mxu1 %vm5205_vm3, %v660_v19 }
 0x658   : > { %8788 = vmatmul.mubr.msk.bf16.gmra.mxu1 %vm5205_vm3, %v661_v58 }
 0x659   : > { %8791 = vmatprep.mubr.msk.bf16.mxu1 %vm5205_vm3, %v662_v42 }
 0x660   : > { %8792 = vmatmul.mubr.msk.bf16.gmra.mxu1 %vm5205_vm3, %v663_v17 }
 0x661   : > { %8795 = vmatprep.mubr.msk.bf16.mxu1 %vm5205_vm3, %v664_v2 }
 0x668   : > { %8796 = vmatmul.mubr.msk.bf16.gmra.mxu1 %vm5205_vm3, %v665_v43 }
 0x669   : > { %8799 = vmatprep.mubr.msk.bf16.mxu1 %vm5205_vm3, %v666_v5 }
 0x670   : > { %8800 = vmatmul.mubr.msk.bf16.gmra.mxu1 %vm5205_vm3, %v667_v38 }
 0x671   : > { %8803 = vmatprep.mubr.msk.bf16.mxu1 %vm5205_vm3, %v668_v54 }
 0x678   : > { %8804 = vmatmul.mubr.msk.bf16.gmra.mxu1 %vm5205_vm3, %v669_v46 }
 0x683   : > { %v8677_v9 = vpop.f32.mrf.mxu0 }
 0x684   : > { %v4843_v3 = vadd.f32 %v8677_v9, %v10631_v22 }
 0x685   : > { %v4834_v36 = vpop.f32.mrf.mxu0 }
 0x686   : > { %v4835_v40 = vadd.f32 %v10631_v22, %v4834_v36  ;;  %v5091_v14 = vmax.f32 %v4843_v3, 0.0 }
 0x687   : > { %v8678_v62 = vpop.f32.mrf.mxu0 }
 0x688   : > { %v4846_v45 = vadd.f32 %v8678_v62, %v10631_v22  ;;  %v5089_v44 = vmax.f32 %v4835_v40, 0.0 }
 0x689   : > { %v4837_v59 = vpop.f32.mrf.mxu0 }
 0x68a   : > { %v4838_v31 = vadd.f32 %v10631_v22, %v4837_v59  ;;  %v5092_v8 = vmax.f32 %v4846_v45, 0.0 }
 0x68b   : > { %v8681_v10 = vpop.f32.mrf.mxu0 }
 0x68c   : > { %v5090_v6 = vmax.f32 %v4838_v31, 0.0  ;;  %v5154_v35 = vpack.c.bf16 %v5092_v8, %v5091_v14  ;;  %v4859_v57 = vadd.f32 %v8681_v10, %v10631_v22 }
 0x68d   : > { %v4850_v39 = vpop.f32.mrf.mxu0 }
 0x68e   : > { %v5153_v47 = vpack.c.bf16 %v5090_v6, %v5089_v44  ;;  %v4851_v49 = vadd.f32 %v10631_v22, %v4850_v39  ;;  %v5095_v28 = vmax.f32 %v4859_v57, 0.0 }
 0x68f   : > { %v8682_v15 = vpop.f32.mrf.mxu0 }
 0x690   : > { %v4862_v32 = vadd.f32 %v8682_v15, %v10631_v22  ;;  %8815 = vmatprep.mubr.msk.bf16.mxu0 %vm1218_vm1, %v5153_v47  ;;  %v5093_v56 = vmax.f32 %v4851_v49, 0.0 }
 0x691   : > { %v4853_v48 = vpop.f32.mrf.mxu0  ;;  %8816 = vmatmul.mubr.msk.bf16.vlgmr.msra.gmra.mxu0 %vm1218_vm1, %v5154_v35 }
 0x692   : > { %v4854_v29 = vadd.f32 %v10631_v22, %v4853_v48  ;;  %v5096_v27 = vmax.f32 %v4862_v32, 0.0 }
 0x693   : > { %v8685_v18 = vpop.f32.mrf.mxu0 }
 0x694   : > { %v5094_v26 = vmax.f32 %v4854_v29, 0.0  ;;  %v5156_v19 = vpack.c.bf16 %v5096_v27, %v5095_v28  ;;  %v4875_v7 = vadd.f32 %v8685_v18, %v10631_v22 }
 0x695   : > { %v4866_v30 = vpop.f32.mrf.mxu0 }
 0x696   : > { %v5155_v34 = vpack.c.bf16 %v5094_v26, %v5093_v56  ;;  %v4867_v23 = vadd.f32 %v10631_v22, %v4866_v30  ;;  %v5099_v37 = vmax.f32 %v4875_v7, 0.0 }
 0x697   : > { %v8686_v41 = vpop.f32.mrf.mxu0 }
 0x698   : > { %v4878_v58 = vadd.f32 %v8686_v41, %v10631_v22  ;;  %8819 = vmatprep.mubr.msk.bf16.mxu0 %vm1218_vm1, %v5155_v34  ;;  %v5097_v51 = vmax.f32 %v4867_v23, 0.0 }
 0x699   : > { %v4869_v24 = vpop.f32.mrf.mxu0  ;;  %8820 = vmatmul.mubr.msk.bf16.gmra.mxu0 %vm1218_vm1, %v5156_v19 }
 0x69a   : > { %v4870_v50 = vadd.f32 %v10631_v22, %v4869_v24  ;;  %v5100_v33 = vmax.f32 %v4878_v58, 0.0 }
 0x69b   : > { %v8689_v11 = vpop.f32.mrf.mxu0 }
 0x69c   : > { %v5098_v42 = vmax.f32 %v4870_v50, 0.0  ;;  %v5158_v55 = vpack.c.bf16 %v5100_v33, %v5099_v37  ;;  %v4891_v60 = vadd.f32 %v8689_v11, %v10631_v22 }
 0x69d   : > { %v4882_v16 = vpop.f32.mrf.mxu0 }
 0x69e   : > { %v5157_v17 = vpack.c.bf16 %v5098_v42, %v5097_v51  ;;  %v4883_v2 = vadd.f32 %v10631_v22, %v4882_v16  ;;  %v5103_v38 = vmax.f32 %v4891_v60, 0.0 }
 0x69f   : > { %v8690_v63 = vpop.f32.mrf.mxu0 }
 0x6a0   : > { %v4894_v25 = vadd.f32 %v8690_v63, %v10631_v22  ;;  %8823 = vmatprep.mubr.msk.bf16.mxu0 %vm1218_vm1, %v5157_v17  ;;  %v5101_v53 = vmax.f32 %v4883_v2, 0.0 }
 0x6a1   : > { %v4885_v43 = vpop.f32.mrf.mxu0  ;;  %8824 = vmatmul.mubr.msk.bf16.gmra.mxu0 %vm1218_vm1, %v5158_v55 }
 0x6a2   : > { %v4886_v4 = vadd.f32 %v10631_v22, %v4885_v43  ;;  %v5104_v13 = vmax.f32 %v4894_v25, 0.0 }
 0x6a3   : > { %v8693_v5 = vpop.f32.mrf.mxu0 }
 0x6a4   : > { %v5102_v21 = vmax.f32 %v4886_v4, 0.0  ;;  %v5160_v54 = vpack.c.bf16 %v5104_v13, %v5103_v38  ;;  %v4907_v9 = vadd.f32 %v8693_v5, %v10631_v22 }
 0x6a5   : > { %v4898_v12 = vpop.f32.mrf.mxu0 }
 0x6a6   : > { %v5159_v20 = vpack.c.bf16 %v5102_v21, %v5101_v53  ;;  %v4899_v1 = vadd.f32 %v10631_v22, %v4898_v12  ;;  %v5107_v0 = vmax.f32 %v4907_v9, 0.0 }
 0x6a7   : > { %v8694_v52 = vpop.f32.mrf.mxu0 }
 0x6a8   : > { %v4910_v46 = vadd.f32 %v8694_v52, %v10631_v22  ;;  %8827 = vmatprep.mubr.msk.bf16.mxu0 %vm1218_vm1, %v5159_v20  ;;  %v5105_v3 = vmax.f32 %v4899_v1, 0.0 }
 0x6a9   : > { %v4901_v36 = vpop.f32.mrf.mxu0  ;;  %8828 = vmatmul.mubr.msk.bf16.gmra.mxu0 %vm1218_vm1, %v5160_v54 }
 0x6aa   : > { %v4902_v62 = vadd.f32 %v10631_v22, %v4901_v36  ;;  %v5108_v40 = vmax.f32 %v4910_v46, 0.0 }
 0x6ab   : > { %v8697_v45 = vpop.f32.mrf.mxu0 }
 0x6ac   : > { %v5106_v59 = vmax.f32 %v4902_v62, 0.0  ;;  %v5162_v8 = vpack.c.bf16 %v5108_v40, %v5107_v0  ;;  %v4923_v14 = vadd.f32 %v8697_v45, %v10631_v22 }
 0x6ad   : > { %v4914_v61 = vpop.f32.mrf.mxu0 }
 0x6ae   : > { %v5161_v31 = vpack.c.bf16 %v5106_v59, %v5105_v3  ;;  %v4915_v44 = vadd.f32 %v10631_v22, %v4914_v61  ;;  %v5111_v57 = vmax.f32 %v4923_v14, 0.0 }
 0x6af   : > { %v8698_v10 = vpop.f32.mrf.mxu0 }
 0x6b0   : > { %v4926_v6 = vadd.f32 %v8698_v10, %v10631_v22  ;;  %8831 = vmatprep.mubr.msk.bf16.mxu0 %vm1218_vm1, %v5161_v31  ;;  %v5109_v49 = vmax.f32 %v4915_v44, 0.0  ;;  %v10697_v44 = vpop.f32.mrf.mxu1 }
 0x6b1   : > { %v4917_v39 = vpop.f32.mrf.mxu0  ;;  %8832 = vmatmul.mubr.msk.bf16.gmra.mxu0 %vm1218_vm1, %v5162_v8 }
 0x6b2   : > { %v4918_v47 = vadd.f32 %v10631_v22, %v4917_v39  ;;  %v5112_v35 = vmax.f32 %v4926_v6, 0.0 }
 0x6b3   : > { %v8701_v15 = vpop.f32.mrf.mxu0 }
 0x6b4   : > { %v5110_v32 = vmax.f32 %v4918_v47, 0.0  ;;  %v5164_v27 = vpack.c.bf16 %v5112_v35, %v5111_v57  ;;  %v4939_v28 = vadd.f32 %v8701_v15, %v10631_v22 }
 0x6b5   : > { %v4930_v48 = vpop.f32.mrf.mxu0 }
 0x6b6   : > { %v5163_v29 = vpack.c.bf16 %v5110_v32, %v5109_v49  ;;  %v4931_v56 = vadd.f32 %v10631_v22, %v4930_v48  ;;  %v5115_v7 = vmax.f32 %v4939_v28, 0.0  ;;  %v10699_v32 = vpop.f32.mrf.mxu1 }
 0x6b7   : > { %v8702_v18 = vpop.f32.mrf.mxu0 }
 0x6b8   : > { %v4942_v26 = vadd.f32 %v8702_v18, %v10631_v22  ;;  %8835 = vmatprep.mubr.msk.bf16.mxu0 %vm1218_vm1, %v5163_v29  ;;  %v5113_v23 = vmax.f32 %v4931_v56, 0.0  ;;  %v10707_v28 = vpop.f32.mrf.mxu1 }
 0x6b9   : > { %v4933_v30 = vpop.f32.mrf.mxu0  ;;  %8836 = vmatmul.mubr.msk.bf16.gmra.mxu0 %vm1218_vm1, %v5164_v27 }
 0x6ba   : > { %v4934_v34 = vadd.f32 %v10631_v22, %v4933_v30  ;;  %v5116_v19 = vmax.f32 %v4942_v26, 0.0 }
 0x6bb   : > { %v8705_v41 = vpop.f32.mrf.mxu0 }
 0x6bc   : > { %v5114_v58 = vmax.f32 %v4934_v34, 0.0  ;;  %v5166_v33 = vpack.c.bf16 %v5116_v19, %v5115_v7  ;;  %v4955_v37 = vadd.f32 %v8705_v41, %v10631_v22 }
 0x6bd   : > { %v4946_v24 = vpop.f32.mrf.mxu0 }
 0x6be   : > { %v5165_v50 = vpack.c.bf16 %v5114_v58, %v5113_v23  ;;  %v4947_v51 = vadd.f32 %v10631_v22, %v4946_v24  ;;  %v5119_v60 = vmax.f32 %v4955_v37, 0.0  ;;  %v10709_v24 = vpop.f32.mrf.mxu1 }
 0x6bf   : > { %v8706_v11 = vpop.f32.mrf.mxu0 }
 0x6c0   : > { %v4958_v42 = vadd.f32 %v8706_v11, %v10631_v22  ;;  %8839 = vmatprep.mubr.msk.bf16.mxu0 %vm1218_vm1, %v5165_v50  ;;  %v5117_v2 = vmax.f32 %v4947_v51, 0.0 }
 0x6c1   : > { %v4949_v16 = vpop.f32.mrf.mxu0  ;;  %8840 = vmatmul.mubr.msk.bf16.gmra.mxu0 %vm1218_vm1, %v5166_v33 }
 0x6c2   : > { %v4950_v17 = vadd.f32 %v10631_v22, %v4949_v16  ;;  %v5120_v55 = vmax.f32 %v4958_v42, 0.0 }
 0x6c3   : > { %v8709_v63 = vpop.f32.mrf.mxu0 }
 0x6c4   : > { %v5118_v25 = vmax.f32 %v4950_v17, 0.0  ;;  %v5168_v13 = vpack.c.bf16 %v5120_v55, %v5119_v60  ;;  %v4971_v38 = vadd.f32 %v8709_v63, %v10631_v22  ;;  %v10717_v17 = vpop.f32.mrf.mxu1 }
 0x6c5   : > { %v4962_v43 = vpop.f32.mrf.mxu0 }
 0x6c6   : > { %v5167_v4 = vpack.c.bf16 %v5118_v25, %v5117_v2  ;;  %v4963_v53 = vadd.f32 %v10631_v22, %v4962_v43  ;;  %v5123_v9 = vmax.f32 %v4971_v38, 0.0 }
 0x6c7   : > { %v8710_v5 = vpop.f32.mrf.mxu0 }
 0x6c8   : > { %v4974_v21 = vadd.f32 %v8710_v5, %v10631_v22  ;;  %8843 = vmatprep.mubr.msk.bf16.mxu0 %vm1218_vm1, %v5167_v4  ;;  %v5121_v1 = vmax.f32 %v4963_v53, 0.0 }
 0x6c9   : > { %v4965_v12 = vpop.f32.mrf.mxu0  ;;  %8844 = vmatmul.mubr.msk.bf16.gmra.mxu0 %vm1218_vm1, %v5168_v13  ;;  %v10719_v13 = vpop.f32.mrf.mxu1 }
 0x6ca   : > { %v4966_v20 = vadd.f32 %v10631_v22, %v4965_v12  ;;  %v5124_v54 = vmax.f32 %v4974_v21, 0.0 }
 0x6cb   : > { %v8713_v52 = vpop.f32.mrf.mxu0 }
 0x6cc   : > { %v5122_v46 = vmax.f32 %v4966_v20, 0.0  ;;  %v5170_v40 = vpack.c.bf16 %v5124_v54, %v5123_v9  ;;  %v4987_v0 = vadd.f32 %v8713_v52, %v10631_v22  ;;  %v10727_v52 = vpop.f32.mrf.mxu1 }
 0x6cd   : > { %v4978_v36 = vpop.f32.mrf.mxu0 }
 0x6ce   : > { %v5169_v62 = vpack.c.bf16 %v5122_v46, %v5121_v1  ;;  %v4979_v3 = vadd.f32 %v10631_v22, %v4978_v36  ;;  %v5127_v39 = vmax.f32 %v4987_v0, 0.0 }
 0x6cf   : > { %v8714_v45 = vpop.f32.mrf.mxu0 }
 0x6d0   : > { %v4990_v59 = vadd.f32 %v8714_v45, %v10631_v22  ;;  %8847 = vmatprep.mubr.msk.bf16.mxu0 %vm1218_vm1, %v5169_v62  ;;  %v5125_v6 = vmax.f32 %v4979_v3, 0.0  ;;  %v10729_v3 = vpop.f32.mrf.mxu1 }
 0x6d1   : > { %v4981_v61 = vpop.f32.mrf.mxu0  ;;  %8848 = vmatmul.mubr.msk.bf16.gmra.mxu0 %vm1218_vm1, %v5170_v40 }
 0x6d2   : > { %v4982_v31 = vadd.f32 %v10631_v22, %v4981_v61  ;;  %v5128_v8 = vmax.f32 %v4990_v59, 0.0 }
 0x6d3   : > { %v8717_v10 = vpop.f32.mrf.mxu0 }
 0x6d4   : > { %v5126_v14 = vmax.f32 %v4982_v31, 0.0  ;;  %v5172_v15 = vpack.c.bf16 %v5128_v8, %v5127_v39  ;;  %v5003_v29 = vadd.f32 %v8717_v10, %v10631_v22 }
 0x6d5   : > { %v4994_v47 = vpop.f32.mrf.mxu0 }
 0x6d6   : > { %v5171_v35 = vpack.c.bf16 %v5126_v14, %v5125_v6  ;;  %v4995_v57 = vadd.f32 %v10631_v22, %v4994_v47  ;;  %v5131_v19 = vmax.f32 %v5003_v29, 0.0  ;;  %v10737_v14 = vpop.f32.mrf.mxu1 }
 0x6d7   : > { %v8718_v49 = vpop.f32.mrf.mxu0 }
 0x6d8   : > { %v5006_v48 = vadd.f32 %v8718_v49, %v10631_v22  ;;  %8851 = vmatprep.mubr.msk.bf16.mxu0 %vm1218_vm1, %v5171_v35  ;;  %v5129_v30 = vmax.f32 %v4995_v57, 0.0  ;;  %v10739_v29 = vpop.f32.mrf.mxu1 }
 0x6d9   : > { %v4997_v27 = vpop.f32.mrf.mxu0  ;;  %8852 = vmatmul.mubr.msk.bf16.gmra.mxu0 %vm1218_vm1, %v5172_v15 }
 0x6da   : > { %v4998_v18 = vadd.f32 %v10631_v22, %v4997_v27  ;;  %v5132_v56 = vmax.f32 %v5006_v48, 0.0 }
 0x6db   : > { %v8721_v26 = vpop.f32.mrf.mxu0 }
 0x6dc   : > { %v5130_v34 = vmax.f32 %v4998_v18, 0.0  ;;  %v5174_v58 = vpack.c.bf16 %v5132_v56, %v5131_v19  ;;  %v5019_v11 = vadd.f32 %v8721_v26, %v10631_v22 }
 0x6dd   : > { %v5010_v41 = vpop.f32.mrf.mxu0 }
 0x6de   : > { %v5173_v23 = vpack.c.bf16 %v5130_v34, %v5129_v30  ;;  %v5011_v50 = vadd.f32 %v10631_v22, %v5010_v41  ;;  %v5135_v2 = vmax.f32 %v5019_v11, 0.0  ;;  %v10747_v41 = vpop.f32.mrf.mxu1 }
 0x6df   : > { %v8722_v7 = vpop.f32.mrf.mxu0 }
 0x6e0   : > { %v5022_v33 = vadd.f32 %v8722_v7, %v10631_v22  ;;  %8855 = vmatprep.mubr.msk.bf16.mxu0 %vm1218_vm1, %v5173_v23  ;;  %v5133_v55 = vmax.f32 %v5011_v50, 0.0 }
 0x6e1   : > { %v5013_v51 = vpop.f32.mrf.mxu0  ;;  %8856 = vmatmul.mubr.msk.bf16.gmra.mxu0 %vm1218_vm1, %v5174_v58 }
 0x6e2   : > { %v5014_v42 = vadd.f32 %v10631_v22, %v5013_v51  ;;  %v5136_v37 = vmax.f32 %v5022_v33, 0.0 }
 0x6e3   : > { %v8725_v16 = vpop.f32.mrf.mxu0 }
 0x6e4   : > { %v5134_v63 = vmax.f32 %v5014_v42, 0.0  ;;  %v5176_v43 = vpack.c.bf16 %v5136_v37, %v5135_v2  ;;  %v5035_v21 = vadd.f32 %v8725_v16, %v10631_v22  ;;  %v10749_v42 = vpop.f32.mrf.mxu1 }
 0x6e5   : > { %v5026_v25 = vpop.f32.mrf.mxu0 }
 0x6e6   : > { %v5175_v60 = vpack.c.bf16 %v5134_v63, %v5133_v55  ;;  %v5027_v5 = vadd.f32 %v10631_v22, %v5026_v25  ;;  %v5139_v9 = vmax.f32 %v5035_v21, 0.0 }
 0x6e7   : > { %v8726_v4 = vpop.f32.mrf.mxu0 }
 0x6e8   : > { %v5038_v53 = vadd.f32 %v8726_v4, %v10631_v22  ;;  %8859 = vmatprep.mubr.msk.bf16.mxu0 %vm1218_vm1, %v5175_v60  ;;  %v5137_v1 = vmax.f32 %v5027_v5, 0.0  ;;  %v10757_v60 = vpop.f32.mrf.mxu1 }
 0x6e9   : > { %v5029_v38 = vpop.f32.mrf.mxu0  ;;  %8860 = vmatmul.mubr.msk.bf16.gmra.mxu0 %vm1218_vm1, %v5176_v43 }
 0x6ea   : > { %v5030_v12 = vadd.f32 %v10631_v22, %v5029_v38  ;;  %v5140_v20 = vmax.f32 %v5038_v53, 0.0  ;;  %v10759_v38 = vpop.f32.mrf.mxu1 }
 0x6eb   : > { %v8729_v54 = vpop.f32.mrf.mxu0 }
 0x6ec   : > { %v5138_v46 = vmax.f32 %v5030_v12, 0.0  ;;  %v5178_v40 = vpack.c.bf16 %v5140_v20, %v5139_v9  ;;  %v5051_v61 = vadd.f32 %v8729_v54, %v10631_v22  ;;  %v10763_v12 = vpop.f32.mrf.mxu1 }
 0x6ed   : > { %v5042_v36 = vpop.f32.mrf.mxu0 }
 0x6ee   : > { %v5177_v62 = vpack.c.bf16 %v5138_v46, %v5137_v1  ;;  %v5043_v59 = vadd.f32 %v10631_v22, %v5042_v36  ;;  %v5143_v35 = vmax.f32 %v5051_v61, 0.0  ;;  %v10765_v20 = vpop.f32.mrf.mxu1 }
 0x6ef   : > { %v8730_v45 = vpop.f32.mrf.mxu0 }
 0x6f0   : > { %v5054_v0 = vadd.f32 %v8730_v45, %v10631_v22  ;;  %8863 = vmatprep.mubr.msk.bf16.mxu0 %vm1218_vm1, %v5177_v62  ;;  %v5141_v39 = vmax.f32 %v5043_v59, 0.0  ;;  %v10767_v54 = vpop.f32.mrf.mxu1 }
 0x6f1   : > { %v5045_v31 = vpop.f32.mrf.mxu0  ;;  %8864 = vmatmul.mubr.msk.bf16.gmra.mxu0 %vm1218_vm1, %v5178_v40 }
 0x6f2   : > { %v5046_v8 = vadd.f32 %v10631_v22, %v5045_v31  ;;  %v5144_v10 = vmax.f32 %v5054_v0, 0.0 }
 0x6f3   : > { %v8733_v6 = vpop.f32.mrf.mxu0 }
 0x6f4   : > { %v5142_v47 = vmax.f32 %v5046_v8, 0.0  ;;  %v5180_v57 = vpack.c.bf16 %v5144_v10, %v5143_v35  ;;  %v5067_v56 = vadd.f32 %v8733_v6, %v10631_v22 }
 0x6f5   : > { %v5058_v15 = vpop.f32.mrf.mxu0 }
 0x6f6   : > { %v5179_v49 = vpack.c.bf16 %v5142_v47, %v5141_v39  ;;  %v5059_v27 = vadd.f32 %v10631_v22, %v5058_v15  ;;  %v5147_v7 = vmax.f32 %v5067_v56, 0.0 }
 0x6f7   : > { %v8734_v48 = vpop.f32.mrf.mxu0 }
 0x6f8   : > { %v5070_v18 = vadd.f32 %v8734_v48, %v10631_v22  ;;  %8867 = vmatprep.mubr.msk.bf16.mxu0 %vm1218_vm1, %v5179_v49  ;;  %v5145_v23 = vmax.f32 %v5059_v27, 0.0  ;;  %v10805_v49 = vld [vmem:[%s11544_s9] ss:$0 sm:$0xff] }
 0x6f9   : > { %v5061_v26 = vpop.f32.mrf.mxu0  ;;  %8868 = vmatmul.mubr.msk.bf16.gmra.mxu0 %vm1218_vm1, %v5180_v57  ;;  %v6075_v57 = vlaneseq }
 0x6fa   : > { %v5062_v30 = vadd.f32 %v10631_v22, %v5061_v26  ;;  %v5148_v34 = vmax.f32 %v5070_v18, 0.0 }
 0x6fb   : > { %v8737_v19 = vpop.f32.mrf.mxu0 }
 0x6fc   : > { %v5146_v58 = vmax.f32 %v5062_v30, 0.0  ;;  %v5182_v11 = vpack.c.bf16 %v5148_v34, %v5147_v7  ;;  %v5083_v55 = vadd.f32 %v8737_v19, %v10631_v22  ;;  %v10813_v34 = vand.u32 127, %v6075_v57 }
 0x6fd   : > { %v5074_v50 = vpop.f32.mrf.mxu0 }
 0x6fe   : > { %v5181_v33 = vpack.c.bf16 %v5146_v58, %v5145_v23  ;;  %v5075_v37 = vadd.f32 %v10631_v22, %v5074_v50  ;;  %v5151_v5 = vmax.f32 %v5083_v55, 0.0  ;;  %vm6077_vm5 = vcmp.lt.s32.totalorder %v10813_v34, 32 }
 0x6ff   : > { %v8738_v51 = vpop.f32.mrf.mxu0 }
 0x700   : > { %v5086_v16 = vadd.f32 %v8738_v51, %v10631_v22  ;;  %8871 = vmatprep.mubr.msk.bf16.mxu0 %vm1218_vm1, %v5181_v33  ;;  %v5149_v43 = vmax.f32 %v5075_v37, 0.0 }
 0x701   : > { %v5077_v63 = vpop.f32.mrf.mxu0  ;;  %8872 = vmatmul.mubr.msk.bf16.gmra.mxu0 %vm1218_vm1, %v5182_v11 }
 0x702   : > { %v5078_v2 = vadd.f32 %v10631_v22, %v5077_v63  ;;  %v5152_v25 = vmax.f32 %v5086_v16, 0.0  ;;  %v10769_v22 = vpop.f32.mrf.mxu1 }
 0x704   : > { %v5150_v4 = vmax.f32 %v5078_v2, 0.0  ;;  %v5184_v21 = vpack.c.bf16 %v5152_v25, %v5151_v5  ;;  %v10771_v1 = vpop.f32.mrf.mxu1 }
 0x706   : > { %v5183_v53 = vpack.c.bf16 %v5150_v4, %v5149_v43  ;;  %v10773_v46 = vpop.f32.mrf.mxu1 }
 0x708   : > { %8875 = vmatprep.mubr.msk.bf16.mxu0 %vm1218_vm1, %v5183_v53  ;;  %v10775_v9 = vpop.f32.mrf.mxu1 }
 0x709   : > { %8876 = vmatmul.mubr.msk.bf16.gmra.mxu0 %vm1218_vm1, %v5184_v21 }
 0x70a   : > { %v10777_v36 = vpop.f32.mrf.mxu1 }
 0x70c   : > { %v10779_v62 = vpop.f32.mrf.mxu1 }
 0x70e   : > { %v10781_v40 = vpop.f32.mrf.mxu1 }
 0x710   : > { %v10783_v45 = vpop.f32.mrf.mxu1 }
 0x712   : > { %v10785_v59 = vpop.f32.mrf.mxu1 }
 0x714   : > { %v10787_v0 = vpop.f32.mrf.mxu1 }
 0x716   : > { %v10789_v61 = vpop.f32.mrf.mxu1 }
 0x718   : > { %v10791_v31 = vpop.f32.mrf.mxu1 }
 0x71a   : > { %v10793_v8 = vpop.f32.mrf.mxu1 }
 0x71c   : > { %v10795_v10 = vpop.f32.mrf.mxu1 }
 0x71e   : > { %v10797_v6 = vpop.f32.mrf.mxu1 }
 0x720   : > { %v10800_v15 = vpop.f32.mrf.mxu1 }
 0x751   : > { %v8817_v39 = vpop.f32.mrf.mxu0 }
 0x752   : > { %v5758_v47 = vadd.f32 %v8817_v39, %v10697_v44  ;;  %v10811_v44 = vpop.f32.mrf.mxu1 }
 0x753   : > { %v5749_v35 = vpop.f32.mrf.mxu0 }
 0x754   : > { %v5750_v48 = vadd.f32 %v5749_v35, %v10699_v32  ;;  %v6013_v26 = vadd.f32 %v10805_v49, %v5758_v47  ;;  %v10819_v51 = vpop.f32.mrf.mxu1 }
 0x755   : > { %v8818_v27 = vpop.f32.mrf.mxu0 }
 0x756   : > { %v6011_v18 = vadd.f32 %v10805_v49, %v5750_v48  ;;  %v5761_v56 = vadd.f32 %v8818_v27, %v10707_v28  ;;  %v6080_v33 = vmax.f32 %v6013_v26, 0.0  ;;  %v10834_v53 = vpop.f32.mrf.mxu1 }
 0x757   : > { %v5752_v30 = vpop.f32.mrf.mxu0 }
 0x758   : > { %v6014_v19 = vadd.f32 %v10805_v49, %v5761_v56  ;;  %v5753_v23 = vadd.f32 %v5752_v30, %v10709_v24  ;;  %v6078_v7 = vmax.f32 %v6011_v18, 0.0  ;;  %v6144_v43 = vsel %vm6077_vm5, %v6080_v33, %v6013_v26  ;;  %v10842_v26 = vpop.f32.mrf.mxu1 }
 0x759   : > { %v8821_v58 = vpop.f32.mrf.mxu0 }
 0x75a   : > { %v6081_v50 = vmax.f32 %v6014_v19, 0.0  ;;  %v6012_v32 = vadd.f32 %v10805_v49, %v5753_v23  ;;  %v5774_v11 = vadd.f32 %v8821_v58, %v10717_v17  ;;  %v6142_v63 = vsel %vm6077_vm5, %v6078_v7, %v6011_v18 }
 0x75b   : > { %v5765_v28 = vpop.f32.mrf.mxu0 }
 0x75c   : > { %v6079_v37 = vmax.f32 %v6012_v32, 0.0  ;;  %v5766_v16 = vadd.f32 %v5765_v28, %v10719_v13  ;;  %v6145_v55 = vsel %vm6077_vm5, %v6081_v50, %v6014_v19  ;;  %v6017_v13 = vadd.f32 %v10805_v49, %v5774_v11  ;;  %v10856_v28 = vpop.f32.mrf.mxu1 }
 0x75d   : > { %v8822_v24 = vpop.f32.mrf.mxu0  ;;  %v6207_v21 = vpack.c.bf16 %v6145_v55, %v6144_v43 }
 0x75e   : > { %v6143_v2 = vsel %vm6077_vm5, %v6079_v37, %v6012_v32  ;;  %v6015_v17 = vadd.f32 %v10805_v49, %v5766_v16  ;;  %v5777_v25 = vadd.f32 %v8822_v24, %v10727_v52  ;;  %v6084_v27 = vmax.f32 %v6017_v13, 0.0 }
 0x75f   : > { %v5768_v4 = vpop.f32.mrf.mxu0  ;;  %v6206_v5 = vpack.c.bf16 %v6143_v2, %v6142_v63 }
 0x760   : > { %v6018_v39 = vadd.f32 %v10805_v49, %v5777_v25  ;;  %v5769_v47 = vadd.f32 %v5768_v4, %v10729_v3  ;;  %v6082_v57 = vmax.f32 %v6015_v17, 0.0  ;;  %v6148_v32 = vsel %vm6077_vm5, %v6084_v27, %v6017_v13  ;;  %v10864_v13 = vpop.f32.mrf.mxu1 }
 0x761   : > { %v8825_v35 = vpop.f32.mrf.mxu0  ;;  %8885 = vmatprep.mubr.msk.bf16.mxu1 %vm6265_vm6, %v6206_v5 }
 0x762   : > { %v6085_v48 = vmax.f32 %v6018_v39, 0.0  ;;  %v6016_v52 = vadd.f32 %v10805_v49, %v5769_v47  ;;  %8886 = vmatmul.mubr.msk.bf16.vlgmr.msra.gmra.mxu1 %vm6265_vm6, %v6207_v21  ;;  %v5790_v18 = vadd.f32 %v8825_v35, %v10737_v14  ;;  %v6146_v58 = vsel %vm6077_vm5, %v6082_v57, %v6015_v17  ;;  %v10878_v27 = vpop.f32.mrf.mxu1 }
 0x763   : > { %v5781_v56 = vpop.f32.mrf.mxu0 }
 0x764   : > { %v6083_v30 = vmax.f32 %v6016_v52, 0.0  ;;  %v5782_v19 = vadd.f32 %v5781_v56, %v10739_v29  ;;  %v6149_v3 = vsel %vm6077_vm5, %v6085_v48, %v6018_v39  ;;  %v6021_v33 = vadd.f32 %v10805_v49, %v5790_v18 }
 0x765   : > { %v8826_v23 = vpop.f32.mrf.mxu0  ;;  %v6209_v37 = vpack.c.bf16 %v6149_v3, %v6148_v32 }
 0x766   : > { %v6147_v7 = vsel %vm6077_vm5, %v6083_v30, %v6016_v52  ;;  %v6019_v50 = vadd.f32 %v10805_v49, %v5782_v19  ;;  %v5793_v14 = vadd.f32 %v8826_v23, %v10747_v41  ;;  %v6088_v17 = vmax.f32 %v6021_v33, 0.0 }
 0x767   : > { %v5784_v29 = vpop.f32.mrf.mxu0  ;;  %v6208_v11 = vpack.c.bf16 %v6147_v7, %v6146_v58 }
 0x768   : > { %v6022_v16 = vadd.f32 %v10805_v49, %v5793_v14  ;;  %v5785_v55 = vadd.f32 %v5784_v29, %v10749_v42  ;;  %v6086_v63 = vmax.f32 %v6019_v50, 0.0  ;;  %v6152_v57 = vsel %vm6077_vm5, %v6088_v17, %v6021_v33  ;;  %v10886_v14 = vpop.f32.mrf.mxu1 }
 0x769   : > { %v8829_v24 = vpop.f32.mrf.mxu0  ;;  %8889 = vmatprep.mubr.msk.bf16.mxu1 %vm6265_vm6, %v6208_v11 }
 0x76a   : > { %v6089_v2 = vmax.f32 %v6022_v16, 0.0  ;;  %v6020_v41 = vadd.f32 %v10805_v49, %v5785_v55  ;;  %8890 = vmatmul.mubr.msk.bf16.gmra.mxu1 %vm6265_vm6, %v6209_v37  ;;  %v5806_v25 = vadd.f32 %v8829_v24, %v10757_v60  ;;  %v6150_v39 = vsel %vm6077_vm5, %v6086_v63, %v6019_v50 }
 0x76b   : > { %v5797_v43 = vpop.f32.mrf.mxu0 }
 0x76c   : > { %v6087_v4 = vmax.f32 %v6020_v41, 0.0  ;;  %v5798_v5 = vadd.f32 %v5797_v43, %v10759_v38  ;;  %v6153_v42 = vsel %vm6077_vm5, %v6089_v2, %v6022_v16  ;;  %v6025_v48 = vadd.f32 %v10805_v49, %v5806_v25  ;;  %v10900_v2 = vpop.f32.mrf.mxu1 }
 0x76d   : > { %v8830_v21 = vpop.f32.mrf.mxu0  ;;  %v6211_v18 = vpack.c.bf16 %v6153_v42, %v6152_v57 }
 0x76e   : > { %v6151_v47 = vsel %vm6077_vm5, %v6087_v4, %v6020_v41  ;;  %v6023_v35 = vadd.f32 %v10805_v49, %v5798_v5  ;;  %v5809_v60 = vadd.f32 %v8830_v21, %v10763_v12  ;;  %v6092_v58 = vmax.f32 %v6025_v48, 0.0 }
 0x76f   : > { %v5800_v38 = vpop.f32.mrf.mxu0  ;;  %v6210_v52 = vpack.c.bf16 %v6151_v47, %v6150_v39  ;;  %v10908_v47 = vpop.f32.mrf.mxu1 }
 0x770   : > { %v6026_v56 = vadd.f32 %v10805_v49, %v5809_v60  ;;  %v5801_v30 = vadd.f32 %v5800_v38, %v10765_v20  ;;  %v6090_v3 = vmax.f32 %v6023_v35, 0.0  ;;  %v6156_v55 = vsel %vm6077_vm5, %v6092_v58, %v6025_v48 }
 0x771   : > { %v8833_v19 = vpop.f32.mrf.mxu0  ;;  %8893 = vmatprep.mubr.msk.bf16.mxu1 %vm6265_vm6, %v6210_v52 }
 0x772   : > { %v6093_v23 = vmax.f32 %v6026_v56, 0.0  ;;  %v6024_v12 = vadd.f32 %v10805_v49, %v5801_v30  ;;  %8894 = vmatmul.mubr.msk.bf16.gmra.mxu1 %vm6265_vm6, %v6211_v18  ;;  %v5822_v7 = vadd.f32 %v8833_v19, %v10767_v54  ;;  %v6154_v11 = vsel %vm6077_vm5, %v6090_v3, %v6023_v35  ;;  %v10922_v19 = vpop.f32.mrf.mxu1 }
 0x773   : > { %v5813_v50 = vpop.f32.mrf.mxu0 }
 0x774   : > { %v6091_v32 = vmax.f32 %v6024_v12, 0.0  ;;  %v5814_v33 = vadd.f32 %v5813_v50, %v10769_v22  ;;  %v6157_v20 = vsel %vm6077_vm5, %v6093_v23, %v6026_v56  ;;  %v6029_v24 = vadd.f32 %v10805_v49, %v5822_v7 }
 0x775   : > { %v8834_v29 = vpop.f32.mrf.mxu0  ;;  %v6213_v41 = vpack.c.bf16 %v6157_v20, %v6156_v55 }
 0x776   : > { %v6155_v37 = vsel %vm6077_vm5, %v6091_v32, %v6024_v12  ;;  %v6027_v16 = vadd.f32 %v10805_v49, %v5814_v33  ;;  %v5825_v54 = vadd.f32 %v8834_v29, %v10771_v1  ;;  %v6096_v42 = vmax.f32 %v6029_v24, 0.0  ;;  %v10930_v29 = vpop.f32.mrf.mxu1 }
 0x777   : > { %v5816_v22 = vpop.f32.mrf.mxu0  ;;  %v6212_v63 = vpack.c.bf16 %v6155_v37, %v6154_v11 }
 0x778   : > { %v6030_v17 = vadd.f32 %v10805_v49, %v5825_v54  ;;  %v5817_v25 = vadd.f32 %v5816_v22, %v10773_v46  ;;  %v6094_v4 = vmax.f32 %v6027_v16, 0.0  ;;  %v6160_v18 = vsel %vm6077_vm5, %v6096_v42, %v6029_v24 }
 0x779   : > { %v8837_v43 = vpop.f32.mrf.mxu0  ;;  %8897 = vmatprep.mubr.msk.bf16.mxu1 %vm6265_vm6, %v6212_v63 }
 0x77a   : > { %v6097_v5 = vmax.f32 %v6030_v17, 0.0  ;;  %v6028_v1 = vadd.f32 %v10805_v49, %v5817_v25  ;;  %8898 = vmatmul.mubr.msk.bf16.gmra.mxu1 %vm6265_vm6, %v6213_v41  ;;  %v5838_v21 = vadd.f32 %v8837_v43, %v10775_v9  ;;  %v6158_v48 = vsel %vm6077_vm5, %v6094_v4, %v6027_v16 }
 0x77b   : > { %v5829_v39 = vpop.f32.mrf.mxu0 }
 0x77c   : > { %v6095_v35 = vmax.f32 %v6028_v1, 0.0  ;;  %v5830_v60 = vadd.f32 %v5829_v39, %v10777_v36  ;;  %v6161_v46 = vsel %vm6077_vm5, %v6097_v5, %v6030_v17  ;;  %v6033_v56 = vadd.f32 %v10805_v49, %v5838_v21  ;;  %v10944_v17 = vpop.f32.mrf.mxu1 }
 0x77d   : > { %v8838_v57 = vpop.f32.mrf.mxu0  ;;  %v6215_v3 = vpack.c.bf16 %v6161_v46, %v6160_v18 }
 0x77e   : > { %v6159_v38 = vsel %vm6077_vm5, %v6095_v35, %v6028_v1  ;;  %v6031_v52 = vadd.f32 %v10805_v49, %v5830_v60  ;;  %v5841_v9 = vadd.f32 %v8838_v57, %v10779_v62  ;;  %v6100_v32 = vmax.f32 %v6033_v56, 0.0  ;;  %v10952_v60 = vpop.f32.mrf.mxu1 }
 0x77f   : > { %v5832_v36 = vpop.f32.mrf.mxu0  ;;  %v6214_v30 = vpack.c.bf16 %v6159_v38, %v6158_v48 }
 0x780   : > { %v6034_v23 = vadd.f32 %v10805_v49, %v5841_v9  ;;  %v5833_v12 = vadd.f32 %v5832_v36, %v10781_v40  ;;  %v6098_v7 = vmax.f32 %v6031_v52, 0.0  ;;  %v6164_v22 = vsel %vm6077_vm5, %v6100_v32, %v6033_v56 }
 0x781   : > { %v8841_v58 = vpop.f32.mrf.mxu0  ;;  %8901 = vmatprep.mubr.msk.bf16.mxu1 %vm6265_vm6, %v6214_v30  ;;  %v10966_v30 = vpop.f32.mrf.mxu1 }
 0x782   : > { %v6101_v50 = vmax.f32 %v6034_v23, 0.0  ;;  %v6032_v62 = vadd.f32 %v10805_v49, %v5833_v12  ;;  %8902 = vmatmul.mubr.msk.bf16.gmra.mxu1 %vm6265_vm6, %v6215_v3  ;;  %v5854_v33 = vadd.f32 %v8841_v58, %v10783_v45  ;;  %v6162_v54 = vsel %vm6077_vm5, %v6098_v7, %v6031_v52 }
 0x783   : > { %v5845_v20 = vpop.f32.mrf.mxu0 }
 0x784   : > { %v6099_v11 = vmax.f32 %v6032_v62, 0.0  ;;  %v5846_v37 = vadd.f32 %v5845_v20, %v10785_v59  ;;  %v6165_v40 = vsel %vm6077_vm5, %v6101_v50, %v6034_v23  ;;  %v6037_v63 = vadd.f32 %v10805_v49, %v5854_v33  ;;  %v10974_v20 = vpop.f32.mrf.mxu1 }
 0x785   : > { %v8842_v16 = vpop.f32.mrf.mxu0  ;;  %v6217_v25 = vpack.c.bf16 %v6165_v40, %v6164_v22 }
 0x786   : > { %v6163_v55 = vsel %vm6077_vm5, %v6099_v11, %v6032_v62  ;;  %v6035_v24 = vadd.f32 %v10805_v49, %v5846_v37  ;;  %v5857_v45 = vadd.f32 %v8842_v16, %v10787_v0  ;;  %v6104_v21 = vmax.f32 %v6037_v63, 0.0 }
 0x787   : > { %v5848_v59 = vpop.f32.mrf.mxu0  ;;  %v6216_v41 = vpack.c.bf16 %v6163_v55, %v6162_v54 }
 0x788   : > { %v6038_v43 = vadd.f32 %v10805_v49, %v5857_v45  ;;  %v5849_v4 = vadd.f32 %v5848_v59, %v10789_v61  ;;  %v6102_v1 = vmax.f32 %v6035_v24, 0.0  ;;  %v6168_v18 = vsel %vm6077_vm5, %v6104_v21, %v6037_v63  ;;  %v10988_v63 = vpop.f32.mrf.mxu1 }
 0x789   : > { %v8845_v5 = vpop.f32.mrf.mxu0  ;;  %8905 = vmatprep.mubr.msk.bf16.mxu1 %vm6265_vm6, %v6216_v41 }
 0x78a   : > { %v6105_v42 = vmax.f32 %v6038_v43, 0.0  ;;  %v6036_v0 = vadd.f32 %v10805_v49, %v5849_v4  ;;  %8906 = vmatmul.mubr.msk.bf16.gmra.mxu1 %vm6265_vm6, %v6217_v25  ;;  %v5870_v39 = vadd.f32 %v8845_v5, %v10791_v31  ;;  %v6166_v38 = vsel %vm6077_vm5, %v6102_v1, %v6035_v24  ;;  %v10996_v21 = vpop.f32.mrf.mxu1 }
 0x78b   : > { %v5861_v35 = vpop.f32.mrf.mxu0 }
 0x78c   : > { %v6103_v46 = vmax.f32 %v6036_v0, 0.0  ;;  %v5862_v57 = vadd.f32 %v5861_v35, %v10793_v8  ;;  %v6169_v61 = vsel %vm6077_vm5, %v6105_v42, %v6038_v43  ;;  %v6041_v56 = vadd.f32 %v10805_v49, %v5870_v39 }
 0x78d   : > { %v8846_v48 = vpop.f32.mrf.mxu0  ;;  %v6219_v3 = vpack.c.bf16 %v6169_v61, %v6168_v18 }
 0x78e   : > { %v6167_v52 = vsel %vm6077_vm5, %v6103_v46, %v6036_v0  ;;  %v6039_v9 = vadd.f32 %v10805_v49, %v5862_v57  ;;  %v5873_v31 = vadd.f32 %v8846_v48, %v10795_v10  ;;  %v6108_v62 = vmax.f32 %v6041_v56, 0.0 }
 0x78f   : > { %v5864_v8 = vpop.f32.mrf.mxu0  ;;  %v6218_v36 = vpack.c.bf16 %v6167_v52, %v6166_v38 }
 0x790   : > { %v6042_v23 = vadd.f32 %v10805_v49, %v5873_v31  ;;  %v5865_v12 = vadd.f32 %v5864_v8, %v10797_v6  ;;  %v6106_v7 = vmax.f32 %v6039_v9, 0.0  ;;  %v6172_v24 = vsel %vm6077_vm5, %v6108_v62, %v6041_v56  ;;  %v11010_v31 = vpop.f32.mrf.mxu1 }
 0x791   : > { %v8849_v58 = vpop.f32.mrf.mxu0  ;;  %8909 = vmatprep.mubr.msk.bf16.mxu1 %vm6265_vm6, %v6218_v36 }
 0x792   : > { %v6109_v50 = vmax.f32 %v6042_v23, 0.0  ;;  %v6040_v10 = vadd.f32 %v10805_v49, %v5865_v12  ;;  %8910 = vmatmul.mubr.msk.bf16.gmra.mxu1 %vm6265_vm6, %v6219_v3  ;;  %v5886_v32 = vadd.f32 %v8849_v58, %v10800_v15  ;;  %v6170_v16 = vsel %vm6077_vm5, %v6106_v7, %v6039_v9 }
 0x793   : > { %v5877_v33 = vpop.f32.mrf.mxu0 }
 0x794   : > { %v6107_v11 = vmax.f32 %v6040_v10, 0.0  ;;  %v5878_v37 = vadd.f32 %v5877_v33, %v10811_v44  ;;  %v6173_v6 = vsel %vm6077_vm5, %v6109_v50, %v6042_v23  ;;  %v6045_v45 = vadd.f32 %v10805_v49, %v5886_v32  ;;  %v11018_v50 = vpop.f32.mrf.mxu1 }
 0x795   : > { %v8850_v40 = vpop.f32.mrf.mxu0  ;;  %v6221_v59 = vpack.c.bf16 %v6173_v6, %v6172_v24 }
 0x796   : > { %v6171_v54 = vsel %vm6077_vm5, %v6107_v11, %v6040_v10  ;;  %v6043_v55 = vadd.f32 %v10805_v49, %v5878_v37  ;;  %v5889_v15 = vadd.f32 %v8850_v40, %v10819_v51  ;;  %v6112_v1 = vmax.f32 %v6045_v45, 0.0 }
 0x797   : > { %v5880_v44 = vpop.f32.mrf.mxu0  ;;  %v6220_v22 = vpack.c.bf16 %v6171_v54, %v6170_v16  ;;  %v11032_v54 = vpop.f32.mrf.mxu1 }
 0x798   : > { %v6046_v41 = vadd.f32 %v10805_v49, %v5889_v15  ;;  %v5881_v25 = vadd.f32 %v5880_v44, %v10834_v53  ;;  %v6110_v4 = vmax.f32 %v6043_v55, 0.0  ;;  %v6176_v38 = vsel %vm6077_vm5, %v6112_v1, %v6045_v45 }
 0x799   : > { %v8853_v43 = vpop.f32.mrf.mxu0  ;;  %8913 = vmatprep.mubr.msk.bf16.mxu1 %vm6265_vm6, %v6220_v22 }
 0x79a   : > { %v6113_v5 = vmax.f32 %v6046_v41, 0.0  ;;  %v6044_v51 = vadd.f32 %v10805_v49, %v5881_v25  ;;  %8914 = vmatmul.mubr.msk.bf16.gmra.mxu1 %vm6265_vm6, %v6221_v59  ;;  %v5902_v42 = vadd.f32 %v8853_v43, %v10842_v26  ;;  %v6174_v57 = vsel %vm6077_vm5, %v6110_v4, %v6043_v55  ;;  %v8798_v43 = vpop.f32.mrf.mxu1 }
 0x79b   : > { %v5893_v0 = vpop.f32.mrf.mxu0 }
 0x79c   : > { %v6111_v39 = vmax.f32 %v6044_v51, 0.0  ;;  %v5894_v35 = vadd.f32 %v5893_v0, %v10856_v28  ;;  %v6177_v53 = vsel %vm6077_vm5, %v6113_v5, %v6046_v41  ;;  %v6049_v52 = vadd.f32 %v10805_v49, %v5902_v42 }
 0x79d   : > { %v8854_v46 = vpop.f32.mrf.mxu0  ;;  %v6223_v18 = vpack.c.bf16 %v6177_v53, %v6176_v38 }
 0x79e   : > { %v6175_v61 = vsel %vm6077_vm5, %v6111_v39, %v6044_v51  ;;  %v6047_v48 = vadd.f32 %v10805_v49, %v5894_v35  ;;  %v5905_v26 = vadd.f32 %v8854_v46, %v10864_v13  ;;  %v6116_v12 = vmax.f32 %v6049_v52, 0.0  ;;  %v5551_v46 = vpop.f32.mrf.mxu1 }
 0x79f   : > { %v5896_v28 = vpop.f32.mrf.mxu0  ;;  %v6222_v9 = vpack.c.bf16 %v6175_v61, %v6174_v57 }
 0x7a0   : > { %v6050_v56 = vadd.f32 %v10805_v49, %v5905_v26  ;;  %v5897_v8 = vadd.f32 %v5896_v28, %v10878_v27  ;;  %v6114_v3 = vmax.f32 %v6047_v48, 0.0  ;;  %v6180_v6 = vsel %vm6077_vm5, %v6116_v12, %v6049_v52 }
 0x7a1   : > { %v8857_v36 = vpop.f32.mrf.mxu0  ;;  %8917 = vmatprep.mubr.msk.bf16.mxu1 %vm6265_vm6, %v6222_v9 }
 0x7a2   : > { %v6117_v23 = vmax.f32 %v6050_v56, 0.0  ;;  %v6048_v13 = vadd.f32 %v10805_v49, %v5897_v8  ;;  %8918 = vmatmul.mubr.msk.bf16.gmra.mxu1 %vm6265_vm6, %v6223_v18  ;;  %v5918_v58 = vadd.f32 %v8857_v36, %v10886_v14  ;;  %v6178_v33 = vsel %vm6077_vm5, %v6114_v3, %v6047_v48 }
 0x7a3   : > { %v5909_v7 = vpop.f32.mrf.mxu0 }
 0x7a4   : > { %v6115_v10 = vmax.f32 %v6048_v13, 0.0  ;;  %v5910_v62 = vadd.f32 %v5909_v7, %v10900_v2  ;;  %v6181_v27 = vsel %vm6077_vm5, %v6117_v23, %v6050_v56  ;;  %v6053_v40 = vadd.f32 %v10805_v49, %v5918_v58  ;;  %v8801_v56 = vpop.f32.mrf.mxu1 }
 0x7a5   : > { %v8858_v32 = vpop.f32.mrf.mxu0  ;;  %v6225_v55 = vpack.c.bf16 %v6181_v27, %v6180_v6 }
 0x7a6   : > { %v6179_v11 = vsel %vm6077_vm5, %v6115_v10, %v6048_v13  ;;  %v6051_v37 = vadd.f32 %v10805_v49, %v5910_v62  ;;  %v5921_v14 = vadd.f32 %v8858_v32, %v10908_v47  ;;  %v6120_v59 = vmax.f32 %v6053_v40, 0.0  ;;  %v5564_v62 = vpop.f32.mrf.mxu1 }
 0x7a7   : > { %v5912_v2 = vpop.f32.mrf.mxu0  ;;  %v6224_v16 = vpack.c.bf16 %v6179_v11, %v6178_v33 }
 0x7a8   : > { %v6054_v15 = vadd.f32 %v10805_v49, %v5921_v14  ;;  %v5913_v24 = vadd.f32 %v5912_v2, %v10922_v19  ;;  %v6118_v44 = vmax.f32 %v6051_v37, 0.0 }
 0x7a9   : > { %v8861_v45 = vpop.f32.mrf.mxu0  ;;  %8921 = vmatprep.mubr.msk.bf16.mxu1 %vm6265_vm6, %v6224_v16  ;;  %v8802_v16 = vpop.f32.mrf.mxu1 }
 0x7aa   : > { %v6121_v22 = vmax.f32 %v6054_v15, 0.0  ;;  %v6052_v47 = vadd.f32 %v10805_v49, %v5913_v24  ;;  %8922 = vmatmul.mubr.msk.bf16.gmra.mxu1 %vm6265_vm6, %v6225_v55  ;;  %v5934_v41 = vadd.f32 %v8861_v45, %v10930_v29  ;;  %v6182_v1 = vsel %vm6077_vm5, %v6118_v44, %v6051_v37 }
 0x7ab   : > { %v5925_v25 = vpop.f32.mrf.mxu0  ;;  %v6184_v29 = vsel %vm6077_vm5, %v6120_v59, %v6053_v40 }
 0x7ac   : > { %v6119_v4 = vmax.f32 %v6052_v47, 0.0  ;;  %v5926_v5 = vadd.f32 %v5925_v25, %v10944_v17  ;;  %v6185_v19 = vsel %vm6077_vm5, %v6121_v22, %v6054_v15  ;;  %v6057_v35 = vadd.f32 %v10805_v49, %v5934_v41 }
 0x7ad   : > { %v8862_v51 = vpop.f32.mrf.mxu0  ;;  %v6227_v57 = vpack.c.bf16 %v6185_v19, %v6184_v29 }
 0x7ae   : > { %v6183_v42 = vsel %vm6077_vm5, %v6119_v4, %v6052_v47  ;;  %v6055_v0 = vadd.f32 %v10805_v49, %v5926_v5  ;;  %v5937_v39 = vadd.f32 %v8862_v51, %v10952_v60  ;;  %v6124_v28 = vmax.f32 %v6057_v35, 0.0 }
 0x7af   : > { %v5928_v17 = vpop.f32.mrf.mxu0  ;;  %v6226_v53 = vpack.c.bf16 %v6183_v42, %v6182_v1 }
 0x7b0   : > { %v6058_v61 = vadd.f32 %v10805_v49, %v5937_v39  ;;  %v5929_v48 = vadd.f32 %v5928_v17, %v10966_v30  ;;  %v6122_v38 = vmax.f32 %v6055_v0, 0.0 }
 0x7b1   : > { %v8865_v26 = vpop.f32.mrf.mxu0  ;;  %8925 = vmatprep.mubr.msk.bf16.mxu1 %vm6265_vm6, %v6226_v53 }
 0x7b2   : > { %v6125_v52 = vmax.f32 %v6058_v61, 0.0  ;;  %v6056_v60 = vadd.f32 %v10805_v49, %v5929_v48  ;;  %8926 = vmatmul.mubr.msk.bf16.gmra.mxu1 %vm6265_vm6, %v6227_v57  ;;  %v5950_v9 = vadd.f32 %v8865_v26, %v10974_v20  ;;  %v6186_v23 = vsel %vm6077_vm5, %v6122_v38, %v6055_v0 }
 0x7b3   : > { %v5941_v18 = vpop.f32.mrf.mxu0  ;;  %v6188_v20 = vsel %vm6077_vm5, %v6124_v28, %v6057_v35 }
 0x7b4   : > { %v6123_v8 = vmax.f32 %v6056_v60, 0.0  ;;  %v5942_v36 = vadd.f32 %v5941_v18, %v10988_v63  ;;  %v6189_v30 = vsel %vm6077_vm5, %v6125_v52, %v6058_v61  ;;  %v6061_v7 = vadd.f32 %v10805_v49, %v5950_v9 }
 0x7b5   : > { %v8866_v3 = vpop.f32.mrf.mxu0  ;;  %v6229_v27 = vpack.c.bf16 %v6189_v30, %v6188_v20 }
 0x7b6   : > { %v6187_v13 = vsel %vm6077_vm5, %v6123_v8, %v6056_v60  ;;  %v6059_v12 = vadd.f32 %v10805_v49, %v5942_v36  ;;  %v5953_v58 = vadd.f32 %v8866_v3, %v10996_v21  ;;  %v6128_v6 = vmax.f32 %v6061_v7, 0.0 }
 0x7b7   : > { %v5944_v63 = vpop.f32.mrf.mxu0  ;;  %v6228_v10 = vpack.c.bf16 %v6187_v13, %v6186_v23 }
 0x7b8   : > { %v6062_v32 = vadd.f32 %v10805_v49, %v5953_v58  ;;  %v5945_v33 = vadd.f32 %v5944_v63, %v11010_v31  ;;  %v6126_v37 = vmax.f32 %v6059_v12, 0.0 }
 0x7b9   : > { %v8869_v11 = vpop.f32.mrf.mxu0  ;;  %8929 = vmatprep.mubr.msk.bf16.mxu1 %vm6265_vm6, %v6228_v10 }
 0x7ba   : > { %v6129_v14 = vmax.f32 %v6062_v32, 0.0  ;;  %v6060_v21 = vadd.f32 %v10805_v49, %v5945_v33  ;;  %8930 = vmatmul.mubr.msk.bf16.gmra.mxu1 %vm6265_vm6, %v6229_v27  ;;  %v5966_v40 = vadd.f32 %v8869_v11, %v11018_v50  ;;  %v6190_v45 = vsel %vm6077_vm5, %v6126_v37, %v6059_v12 }
 0x7bb   : > { %v5957_v2 = vpop.f32.mrf.mxu0  ;;  %v6192_v50 = vsel %vm6077_vm5, %v6128_v6, %v6061_v7 }
 0x7bc   : > { %v6127_v55 = vmax.f32 %v6060_v21, 0.0  ;;  %v5958_v15 = vadd.f32 %v5957_v2, %v11032_v54  ;;  %v6193_v31 = vsel %vm6077_vm5, %v6129_v14, %v6062_v32  ;;  %v6065_v59 = vadd.f32 %v10805_v49, %v5966_v40  ;;  %v5567_v54 = vpop.f32.mrf.mxu1 }
 0x7bd   : > { %v8870_v24 = vpop.f32.mrf.mxu0  ;;  %v6231_v4 = vpack.c.bf16 %v6193_v31, %v6192_v50 }
 0x7be   : > { %v6191_v44 = vsel %vm6077_vm5, %v6127_v55, %v6060_v21  ;;  %v6063_v22 = vadd.f32 %v10805_v49, %v5958_v15  ;;  %v5969_v47 = vadd.f32 %v8870_v24, %v8798_v43  ;;  %v6132_v43 = vmax.f32 %v6065_v59, 0.0  ;;  %v8805_v29 = vpop.f32.mrf.mxu1 }
 0x7bf   : > { %v5960_v41 = vpop.f32.mrf.mxu0  ;;  %v6230_v25 = vpack.c.bf16 %v6191_v44, %v6190_v45 }
 0x7c0   : > { %v6066_v5 = vadd.f32 %v10805_v49, %v5969_v47  ;;  %v5961_v19 = vadd.f32 %v5960_v41, %v5551_v46  ;;  %v6130_v1 = vmax.f32 %v6063_v22, 0.0  ;;  %v6196_v52 = vsel %vm6077_vm5, %v6132_v43, %v6065_v59  ;;  %v5580_v28 = vpop.f32.mrf.mxu1 }
 0x7c1   : > { %v8873_v51 = vpop.f32.mrf.mxu0  ;;  %8933 = vmatprep.mubr.msk.bf16.mxu1 %vm6265_vm6, %v6230_v25 }
 0x7c2   : > { %v6133_v42 = vmax.f32 %v6066_v5, 0.0  ;;  %v6064_v0 = vadd.f32 %v10805_v49, %v5961_v19  ;;  %8934 = vmatmul.mubr.msk.bf16.gmra.mxu1 %vm6265_vm6, %v6231_v4  ;;  %v5982_v39 = vadd.f32 %v8873_v51, %v8801_v56  ;;  %v6194_v46 = vsel %vm6077_vm5, %v6130_v1, %v6063_v22  ;;  %v8806_v58 = vpop.f32.mrf.mxu1 }
 0x7c3   : > { %v5973_v35 = vpop.f32.mrf.mxu0 }
 0x7c4   : > { %v6131_v17 = vmax.f32 %v6064_v0, 0.0  ;;  %v5974_v53 = vadd.f32 %v5973_v35, %v5564_v62  ;;  %v6197_v57 = vsel %vm6077_vm5, %v6133_v42, %v6066_v5  ;;  %v6069_v60 = vadd.f32 %v10805_v49, %v5982_v39  ;;  %v5583_v21 = vpop.f32.mrf.mxu1 }
 0x7c5   : > { %v8874_v61 = vpop.f32.mrf.mxu0  ;;  %v6233_v56 = vpack.c.bf16 %v6197_v57, %v6196_v52 }
 0x7c6   : > { %v6195_v48 = vsel %vm6077_vm5, %v6131_v17, %v6064_v0  ;;  %v6067_v26 = vadd.f32 %v10805_v49, %v5974_v53  ;;  %v5985_v38 = vadd.f32 %v8874_v61, %v8802_v16  ;;  %v6136_v12 = vmax.f32 %v6069_v60, 0.0 }
 0x7c7   : > { %v5976_v9 = vpop.f32.mrf.mxu0  ;;  %v6232_v18 = vpack.c.bf16 %v6195_v48, %v6194_v46 }
 0x7c8   : > { %v6070_v8 = vadd.f32 %v10805_v49, %v5985_v38  ;;  %v5977_v36 = vadd.f32 %v5976_v9, %v5567_v54  ;;  %v6134_v3 = vmax.f32 %v6067_v26, 0.0  ;;  %v6200_v14 = vsel %vm6077_vm5, %v6136_v12, %v6069_v60 }
 0x7c9   : > { %v8877_v30 = vpop.f32.mrf.mxu0  ;;  %8937 = vmatprep.mubr.msk.bf16.mxu1 %vm6265_vm6, %v6232_v18 }
 0x7ca   : > { %v6137_v23 = vmax.f32 %v6070_v8, 0.0  ;;  %v6068_v13 = vadd.f32 %v10805_v49, %v5977_v36  ;;  %8938 = vmatmul.mubr.msk.bf16.gmra.mxu1 %vm6265_vm6, %v6233_v56  ;;  %v5998_v20 = vadd.f32 %v8877_v30, %v8805_v29  ;;  %v6198_v32 = vsel %vm6077_vm5, %v6134_v3, %v6067_v26 }
 0x7cb   : > { %v5989_v7 = vpop.f32.mrf.mxu0 }
 0x7cc   : > { %v6135_v63 = vmax.f32 %v6068_v13, 0.0  ;;  %v5990_v10 = vadd.f32 %v5989_v7, %v5580_v28  ;;  %v6201_v62 = vsel %vm6077_vm5, %v6137_v23, %v6070_v8  ;;  %v6073_v6 = vadd.f32 %v10805_v49, %v5998_v20 }
 0x7cd   : > { %v8878_v27 = vpop.f32.mrf.mxu0  ;;  %v6235_v16 = vpack.c.bf16 %v6201_v62, %v6200_v14 }
 0x7ce   : > { %v6199_v33 = vsel %vm6077_vm5, %v6135_v63, %v6068_v13  ;;  %v6071_v11 = vadd.f32 %v10805_v49, %v5990_v10  ;;  %v6001_v37 = vadd.f32 %v8878_v27, %v8806_v58  ;;  %v6140_v44 = vmax.f32 %v6073_v6, 0.0 }
 0x7cf   : > { %v5992_v40 = vpop.f32.mrf.mxu0  ;;  %v6234_v2 = vpack.c.bf16 %v6199_v33, %v6198_v32 }
 0x7d0   : > { %v6074_v55 = vadd.f32 %v10805_v49, %v6001_v37  ;;  %v5993_v15 = vadd.f32 %v5992_v40, %v5583_v21  ;;  %v6138_v31 = vmax.f32 %v6071_v11, 0.0  ;;  %v6204_v41 = vsel %vm6077_vm5, %v6140_v44, %v6073_v6 }
 0x7d1   : > { %8941 = vmatprep.mubr.msk.bf16.mxu1 %vm6265_vm6, %v6234_v2 }
 0x7d2   : > { %v6141_v24 = vmax.f32 %v6074_v55, 0.0  ;;  %v6072_v45 = vadd.f32 %v10805_v49, %v5993_v15  ;;  %8942 = vmatmul.mubr.msk.bf16.gmra.mxu1 %vm6265_vm6, %v6235_v16  ;;  %v6202_v50 = vsel %vm6077_vm5, %v6138_v31, %v6071_v11  ;;  %v11133_v49 = vld [vmem:[%s11546_s11] ss:$0 sm:$0xff] }
 0x7d4   : > { %v6139_v22 = vmax.f32 %v6072_v45, 0.0  ;;  %v6205_v47 = vsel %vm6077_vm5, %v6141_v24, %v6074_v55 }
 0x7d5   : > { %v6237_v25 = vpack.c.bf16 %v6205_v47, %v6204_v41 }
 0x7d6   : > { %v6203_v59 = vsel %vm6077_vm5, %v6139_v22, %v6072_v45 }
 0x7d7   : > { %v6236_v54 = vpack.c.bf16 %v6203_v59, %v6202_v50 }
 0x7d9   : > { %8945 = vmatprep.mubr.msk.bf16.mxu1 %vm6265_vm6, %v6236_v54 }
 0x7da   : > { %8946 = vmatmul.mubr.msk.bf16.gmra.mxu1 %vm6265_vm6, %v6237_v25 }
 0x822   : > { %v8887_v4 = vpop.f32.mrf.mxu1 }
 0x823   : > { %v6411_v5 = vadd.f32 %v8887_v4, %v11133_v49 }
 0x824   : > { %v6402_v19 = vpop.f32.mrf.mxu1 }
 0x825   : > { %6660 = vst.msk [vmem:[%s11136_s16 + $0x10] sm:$0xff] %vm6657_vm7, %v6411_v5  ;;  %v6403_v34 = vadd.f32 %v11133_v49, %v6402_v19 }
 0x826   : > { %v8888_v51 = vpop.f32.mrf.mxu1 }
 0x827   : > { %6658 = vst.msk [vmem:[%s11136_s16] sm:$0xff] %vm6657_vm7, %v6403_v34  ;;  %v6414_v1 = vadd.f32 %v8888_v51, %v11133_v49 }
 0x828   : > { %v6405_v42 = vpop.f32.mrf.mxu1 }
 0x829   : > { %6661 = vst.msk [vmem:[%s11136_s16 + $0x18] sm:$0xff] %vm6657_vm7, %v6414_v1  ;;  %v6406_v0 = vadd.f32 %v11133_v49, %v6405_v42 }
 0x82a   : > { %v8891_v43 = vpop.f32.mrf.mxu1 }
 0x82b   : > { %6659 = vst.msk [vmem:[%s11136_s16 + $0x8] sm:$0xff] %vm6657_vm7, %v6406_v0  ;;  %v6427_v39 = vadd.f32 %v8891_v43, %v11133_v49 }
 0x82c   : > { %v6418_v29 = vpop.f32.mrf.mxu1 }
 0x82d   : > { %6664 = vst.msk [vmem:[%s11136_s16 + $0x30] sm:$0xff] %vm6657_vm7, %v6427_v39  ;;  %v6419_v35 = vadd.f32 %v11133_v49, %v6418_v29 }
 0x82e   : > { %v8892_v17 = vpop.f32.mrf.mxu1 }
 0x82f   : > { %6662 = vst.msk [vmem:[%s11136_s16 + $0x20] sm:$0xff] %vm6657_vm7, %v6419_v35  ;;  %v6430_v53 = vadd.f32 %v8892_v17, %v11133_v49 }
 0x830   : > { %v6421_v57 = vpop.f32.mrf.mxu1 }
 0x831   : > { %6665 = vst.msk [vmem:[%s11136_s16 + $0x38] sm:$0xff] %vm6657_vm7, %v6430_v53  ;;  %v6422_v61 = vadd.f32 %v11133_v49, %v6421_v57 }
 0x832   : > { %v8895_v46 = vpop.f32.mrf.mxu1 }
 0x833   : > { %6663 = vst.msk [vmem:[%s11136_s16 + $0x28] sm:$0xff] %vm6657_vm7, %v6422_v61  ;;  %v6443_v48 = vadd.f32 %v8895_v46, %v11133_v49 }
 0x834   : > { %v6434_v26 = vpop.f32.mrf.mxu1 }
 0x835   : > { %6668 = vst.msk [vmem:[%s11136_s16 + $0x50] sm:$0xff] %vm6657_vm7, %v6443_v48  ;;  %v6435_v38 = vadd.f32 %v11133_v49, %v6434_v26 }
 0x836   : > { %v8896_v52 = vpop.f32.mrf.mxu1 }
 0x837   : > { %6666 = vst.msk [vmem:[%s11136_s16 + $0x40] sm:$0xff] %vm6657_vm7, %v6435_v38  ;;  %v6446_v60 = vadd.f32 %v8896_v52, %v11133_v49 }
 0x838   : > { %v6437_v28 = vpop.f32.mrf.mxu1 }
 0x839   : > { %6669 = vst.msk [vmem:[%s11136_s16 + $0x58] sm:$0xff] %vm6657_vm7, %v6446_v60  ;;  %v6438_v9 = vadd.f32 %v11133_v49, %v6437_v28 }
 0x83a   : > { %v8899_v18 = vpop.f32.mrf.mxu1 }
 0x83b   : > { %6667 = vst.msk [vmem:[%s11136_s16 + $0x48] sm:$0xff] %vm6657_vm7, %v6438_v9  ;;  %v6459_v56 = vadd.f32 %v8899_v18, %v11133_v49 }
 0x83c   : > { %v6450_v8 = vpop.f32.mrf.mxu1 }
 0x83d   : > { %6672 = vst.msk [vmem:[%s11136_s16 + $0x70] sm:$0xff] %vm6657_vm7, %v6459_v56  ;;  %v6451_v36 = vadd.f32 %v11133_v49, %v6450_v8 }
 0x83e   : > { %v8900_v30 = vpop.f32.mrf.mxu1 }
 0x83f   : > { %6670 = vst.msk [vmem:[%s11136_s16 + $0x60] sm:$0xff] %vm6657_vm7, %v6451_v36  ;;  %v6462_v3 = vadd.f32 %v8900_v30, %v11133_v49 }
 0x840   : > { %v6453_v23 = vpop.f32.mrf.mxu1 }
 0x841   : > { %6673 = vst.msk [vmem:[%s11136_s16 + $0x78] sm:$0xff] %vm6657_vm7, %v6462_v3  ;;  %v6454_v13 = vadd.f32 %v11133_v49, %v6453_v23 }
 0x842   : > { %v8903_v12 = vpop.f32.mrf.mxu1 }
 0x843   : > { %6671 = vst.msk [vmem:[%s11136_s16 + $0x68] sm:$0xff] %vm6657_vm7, %v6454_v13  ;;  %v6475_v58 = vadd.f32 %v8903_v12, %v11133_v49 }
 0x844   : > { %v6466_v20 = vpop.f32.mrf.mxu1 }
 0x845   : > { %6676 = vst.msk [vmem:[%s11136_s16 + $0x90] sm:$0xff] %vm6657_vm7, %v6475_v58  ;;  %v6467_v7 = vadd.f32 %v11133_v49, %v6466_v20 }
 0x846   : > { %v8904_v63 = vpop.f32.mrf.mxu1 }
 0x847   : > { %6674 = vst.msk [vmem:[%s11136_s16 + $0x80] sm:$0xff] %vm6657_vm7, %v6467_v7  ;;  %v6478_v10 = vadd.f32 %v8904_v63, %v11133_v49 }
 0x848   : > { %v6469_v62 = vpop.f32.mrf.mxu1 }
 0x849   : > { %6677 = vst.msk [vmem:[%s11136_s16 + $0x98] sm:$0xff] %vm6657_vm7, %v6478_v10  ;;  %v6470_v27 = vadd.f32 %v11133_v49, %v6469_v62 }
 0x84a   : > { %v8907_v32 = vpop.f32.mrf.mxu1 }
 0x84b   : > { %6675 = vst.msk [vmem:[%s11136_s16 + $0x88] sm:$0xff] %vm6657_vm7, %v6470_v27  ;;  %v6491_v33 = vadd.f32 %v8907_v32, %v11133_v49 }
 0x84c   : > { %v6482_v11 = vpop.f32.mrf.mxu1 }
 0x84d   : > { %6680 = vst.msk [vmem:[%s11136_s16 + $0xb0] sm:$0xff] %vm6657_vm7, %v6491_v33  ;;  %v6483_v37 = vadd.f32 %v11133_v49, %v6482_v11 }
 0x84e   : > { %v8908_v14 = vpop.f32.mrf.mxu1 }
 0x84f   : > { %6678 = vst.msk [vmem:[%s11136_s16 + $0xa0] sm:$0xff] %vm6657_vm7, %v6483_v37  ;;  %v6494_v21 = vadd.f32 %v8908_v14, %v11133_v49 }
 0x850   : > { %v6485_v6 = vpop.f32.mrf.mxu1 }
 0x851   : > { %6681 = vst.msk [vmem:[%s11136_s16 + $0xb8] sm:$0xff] %vm6657_vm7, %v6494_v21  ;;  %v6486_v40 = vadd.f32 %v11133_v49, %v6485_v6 }
 0x852   : > { %v8911_v2 = vpop.f32.mrf.mxu1 }
 0x853   : > { %6679 = vst.msk [vmem:[%s11136_s16 + $0xa8] sm:$0xff] %vm6657_vm7, %v6486_v40  ;;  %v6507_v16 = vadd.f32 %v8911_v2, %v11133_v49 }
 0x854   : > { %v6498_v55 = vpop.f32.mrf.mxu1 }
 0x855   : > { %6684 = vst.msk [vmem:[%s11136_s16 + $0xd0] sm:$0xff] %vm6657_vm7, %v6507_v16  ;;  %v6499_v15 = vadd.f32 %v11133_v49, %v6498_v55 }
 0x856   : > { %v8912_v31 = vpop.f32.mrf.mxu1 }
 0x857   : > { %6682 = vst.msk [vmem:[%s11136_s16 + $0xc0] sm:$0xff] %vm6657_vm7, %v6499_v15  ;;  %v6510_v24 = vadd.f32 %v8912_v31, %v11133_v49 }
 0x858   : > { %v6501_v45 = vpop.f32.mrf.mxu1 }
 0x859   : > { %6685 = vst.msk [vmem:[%s11136_s16 + $0xd8] sm:$0xff] %vm6657_vm7, %v6510_v24  ;;  %v6502_v44 = vadd.f32 %v11133_v49, %v6501_v45 }
 0x85a   : > { %v8915_v22 = vpop.f32.mrf.mxu1 }
 0x85b   : > { %6683 = vst.msk [vmem:[%s11136_s16 + $0xc8] sm:$0xff] %vm6657_vm7, %v6502_v44  ;;  %v6523_v47 = vadd.f32 %v8915_v22, %v11133_v49 }
 0x85c   : > { %v6514_v50 = vpop.f32.mrf.mxu1 }
 0x85d   : > { %6688 = vst.msk [vmem:[%s11136_s16 + $0xf0] sm:$0xff] %vm6657_vm7, %v6523_v47  ;;  %v6515_v59 = vadd.f32 %v11133_v49, %v6514_v50 }
 0x85e   : > { %v8916_v41 = vpop.f32.mrf.mxu1 }
 0x85f   : > { %6686 = vst.msk [vmem:[%s11136_s16 + $0xe0] sm:$0xff] %vm6657_vm7, %v6515_v59  ;;  %v6526_v54 = vadd.f32 %v8916_v41, %v11133_v49 }
 0x860   : > { %v6517_v25 = vpop.f32.mrf.mxu1 }
 0x861   : > { %6689 = vst.msk [vmem:[%s11136_s16 + $0xf8] sm:$0xff] %vm6657_vm7, %v6526_v54  ;;  %v6518_v4 = vadd.f32 %v11133_v49, %v6517_v25 }
 0x862   : > { %v8919_v5 = vpop.f32.mrf.mxu1 }
 0x863   : > { %6687 = vst.msk [vmem:[%s11136_s16 + $0xe8] sm:$0xff] %vm6657_vm7, %v6518_v4  ;;  %v6539_v19 = vadd.f32 %v8919_v5, %v11133_v49 }
 0x864   : > { %v6530_v34 = vpop.f32.mrf.mxu1 }
 0x865   : > { %6692 = vst.msk [vmem:[%s11136_s16 + $0x110] sm:$0xff] %vm6657_vm7, %v6539_v19  ;;  %v6531_v51 = vadd.f32 %v11133_v49, %v6530_v34 }
 0x866   : > { %v8920_v1 = vpop.f32.mrf.mxu1 }
 0x867   : > { %6690 = vst.msk [vmem:[%s11136_s16 + $0x100] sm:$0xff] %vm6657_vm7, %v6531_v51  ;;  %v6542_v42 = vadd.f32 %v8920_v1, %v11133_v49 }
 0x868   : > { %v6533_v0 = vpop.f32.mrf.mxu1 }
 0x869   : > { %6693 = vst.msk [vmem:[%s11136_s16 + $0x118] sm:$0xff] %vm6657_vm7, %v6542_v42  ;;  %v6534_v43 = vadd.f32 %v11133_v49, %v6533_v0 }
 0x86a   : > { %v8923_v39 = vpop.f32.mrf.mxu1 }
 0x86b   : > { %6691 = vst.msk [vmem:[%s11136_s16 + $0x108] sm:$0xff] %vm6657_vm7, %v6534_v43  ;;  %v6555_v29 = vadd.f32 %v8923_v39, %v11133_v49 }
 0x86c   : > { %v6546_v35 = vpop.f32.mrf.mxu1 }
 0x86d   : > { %6696 = vst.msk [vmem:[%s11136_s16 + $0x130] sm:$0xff] %vm6657_vm7, %v6555_v29  ;;  %v6547_v17 = vadd.f32 %v11133_v49, %v6546_v35 }
 0x86e   : > { %v8924_v53 = vpop.f32.mrf.mxu1 }
 0x86f   : > { %6694 = vst.msk [vmem:[%s11136_s16 + $0x120] sm:$0xff] %vm6657_vm7, %v6547_v17  ;;  %v6558_v57 = vadd.f32 %v8924_v53, %v11133_v49 }
 0x870   : > { %v6549_v61 = vpop.f32.mrf.mxu1 }
 0x871   : > { %6697 = vst.msk [vmem:[%s11136_s16 + $0x138] sm:$0xff] %vm6657_vm7, %v6558_v57  ;;  %v6550_v46 = vadd.f32 %v11133_v49, %v6549_v61 }
 0x872   : > { %v8927_v48 = vpop.f32.mrf.mxu1 }
 0x873   : > { %6695 = vst.msk [vmem:[%s11136_s16 + $0x128] sm:$0xff] %vm6657_vm7, %v6550_v46  ;;  %v6571_v26 = vadd.f32 %v8927_v48, %v11133_v49 }
 0x874   : > { %v6562_v38 = vpop.f32.mrf.mxu1 }
 0x875   : > { %6700 = vst.msk [vmem:[%s11136_s16 + $0x150] sm:$0xff] %vm6657_vm7, %v6571_v26  ;;  %v6563_v52 = vadd.f32 %v11133_v49, %v6562_v38 }
 0x876   : > { %v8928_v60 = vpop.f32.mrf.mxu1 }
 0x877   : > { %6698 = vst.msk [vmem:[%s11136_s16 + $0x140] sm:$0xff] %vm6657_vm7, %v6563_v52  ;;  %v6574_v28 = vadd.f32 %v8928_v60, %v11133_v49 }
 0x878   : > { %v6565_v9 = vpop.f32.mrf.mxu1 }
 0x879   : > { %6701 = vst.msk [vmem:[%s11136_s16 + $0x158] sm:$0xff] %vm6657_vm7, %v6574_v28  ;;  %v6566_v18 = vadd.f32 %v11133_v49, %v6565_v9 }
 0x87a   : > { %v8931_v56 = vpop.f32.mrf.mxu1 }
 0x87b   : > { %6699 = vst.msk [vmem:[%s11136_s16 + $0x148] sm:$0xff] %vm6657_vm7, %v6566_v18  ;;  %v6587_v8 = vadd.f32 %v8931_v56, %v11133_v49 }
 0x87c   : > { %v6578_v36 = vpop.f32.mrf.mxu1 }
 0x87d   : > { %6704 = vst.msk [vmem:[%s11136_s16 + $0x170] sm:$0xff] %vm6657_vm7, %v6587_v8  ;;  %v6579_v30 = vadd.f32 %v11133_v49, %v6578_v36 }
 0x87e   : > { %v8932_v3 = vpop.f32.mrf.mxu1 }
 0x87f   : > { %6702 = vst.msk [vmem:[%s11136_s16 + $0x160] sm:$0xff] %vm6657_vm7, %v6579_v30  ;;  %v6590_v23 = vadd.f32 %v8932_v3, %v11133_v49 }
 0x880   : > { %v6581_v13 = vpop.f32.mrf.mxu1 }
 0x881   : > { %6705 = vst.msk [vmem:[%s11136_s16 + $0x178] sm:$0xff] %vm6657_vm7, %v6590_v23  ;;  %v6582_v12 = vadd.f32 %v11133_v49, %v6581_v13 }
 0x882   : > { %v8935_v58 = vpop.f32.mrf.mxu1 }
 0x883   : > { %6703 = vst.msk [vmem:[%s11136_s16 + $0x168] sm:$0xff] %vm6657_vm7, %v6582_v12  ;;  %v6603_v20 = vadd.f32 %v8935_v58, %v11133_v49 }
 0x884   : > { %v6594_v7 = vpop.f32.mrf.mxu1 }
 0x885   : > { %6708 = vst.msk [vmem:[%s11136_s16 + $0x190] sm:$0xff] %vm6657_vm7, %v6603_v20  ;;  %v6595_v63 = vadd.f32 %v11133_v49, %v6594_v7 }
 0x886   : > { %v8936_v10 = vpop.f32.mrf.mxu1 }
 0x887   : > { %6706 = vst.msk [vmem:[%s11136_s16 + $0x180] sm:$0xff] %vm6657_vm7, %v6595_v63  ;;  %v6606_v62 = vadd.f32 %v8936_v10, %v11133_v49 }
 0x888   : > { %v6597_v27 = vpop.f32.mrf.mxu1 }
 0x889   : > { %6709 = vst.msk [vmem:[%s11136_s16 + $0x198] sm:$0xff] %vm6657_vm7, %v6606_v62  ;;  %v6598_v32 = vadd.f32 %v11133_v49, %v6597_v27 }
 0x88a   : > { %v8939_v33 = vpop.f32.mrf.mxu1 }
 0x88b   : > { %6707 = vst.msk [vmem:[%s11136_s16 + $0x188] sm:$0xff] %vm6657_vm7, %v6598_v32  ;;  %v6619_v11 = vadd.f32 %v8939_v33, %v11133_v49 }
 0x88c   : > { %v6610_v37 = vpop.f32.mrf.mxu1 }
 0x88d   : > { %6712 = vst.msk [vmem:[%s11136_s16 + $0x1b0] sm:$0xff] %vm6657_vm7, %v6619_v11  ;;  %v6611_v14 = vadd.f32 %v11133_v49, %v6610_v37 }
 0x88e   : > { %v8940_v21 = vpop.f32.mrf.mxu1 }
 0x88f   : > { %6710 = vst.msk [vmem:[%s11136_s16 + $0x1a0] sm:$0xff] %vm6657_vm7, %v6611_v14  ;;  %v6622_v6 = vadd.f32 %v8940_v21, %v11133_v49 }
 0x890   : > { %v6613_v40 = vpop.f32.mrf.mxu1 }
 0x891   : > { %6713 = vst.msk [vmem:[%s11136_s16 + $0x1b8] sm:$0xff] %vm6657_vm7, %v6622_v6  ;;  %v6614_v2 = vadd.f32 %v11133_v49, %v6613_v40 }
 0x892   : > { %v8943_v16 = vpop.f32.mrf.mxu1 }
 0x893   : > { %6711 = vst.msk [vmem:[%s11136_s16 + $0x1a8] sm:$0xff] %vm6657_vm7, %v6614_v2  ;;  %v6635_v55 = vadd.f32 %v8943_v16, %v11133_v49 }
 0x894   : > { %v6626_v15 = vpop.f32.mrf.mxu1 }
 0x895   : > { %6716 = vst.msk [vmem:[%s11136_s16 + $0x1d0] sm:$0xff] %vm6657_vm7, %v6635_v55  ;;  %v6627_v31 = vadd.f32 %v11133_v49, %v6626_v15 }
 0x896   : > { %v8944_v24 = vpop.f32.mrf.mxu1 }
 0x897   : > { %6714 = vst.msk [vmem:[%s11136_s16 + $0x1c0] sm:$0xff] %vm6657_vm7, %v6627_v31  ;;  %v6638_v45 = vadd.f32 %v8944_v24, %v11133_v49 }
 0x898   : > { %v6629_v44 = vpop.f32.mrf.mxu1 }
 0x899   : > { %6717 = vst.msk [vmem:[%s11136_s16 + $0x1d8] sm:$0xff] %vm6657_vm7, %v6638_v45  ;;  %v6630_v22 = vadd.f32 %v11133_v49, %v6629_v44 }
 0x89a   : > { %v8947_v47 = vpop.f32.mrf.mxu1 }
 0x89b   : > { %6715 = vst.msk [vmem:[%s11136_s16 + $0x1c8] sm:$0xff] %vm6657_vm7, %v6630_v22  ;;  %v6651_v50 = vadd.f32 %v8947_v47, %v11133_v49 }
 0x89c   : > { %v6642_v59 = vpop.f32.mrf.mxu1 }
 0x89d   : > { %6720 = vst.msk [vmem:[%s11136_s16 + $0x1f0] sm:$0xff] %vm6657_vm7, %v6651_v50  ;;  %v6643_v41 = vadd.f32 %v11133_v49, %v6642_v59 }
 0x89e   : > { %v8948_v54 = vpop.f32.mrf.mxu1 }
 0x89f   : > { %6718 = vst.msk [vmem:[%s11136_s16 + $0x1e0] sm:$0xff] %vm6657_vm7, %v6643_v41  ;;  %v6654_v25 = vadd.f32 %v8948_v54, %v11133_v49  ;;  %6728 = sbr.rel (!%p9261_p4) target bundleno = 2276 (0x8e4), region = 72 }
 0x8a0   : > { %v6645_v4 = vpop.f32.mrf.mxu1 }
 0x8a1   : > { %6721 = vst.msk [vmem:[%s11136_s16 + $0x1f8] sm:$0xff] %vm6657_vm7, %v6654_v25  ;;  %v6646_v5 = vadd.f32 %v11133_v49, %v6645_v4 }
 0x8a3   : > { %6719 = vst.msk [vmem:[%s11136_s16 + $0x1e8] sm:$0xff] %vm6657_vm7, %v6646_v5 }
 0x8a4   : > { %s11560_s21 = smov (!%p6731_p8, %s6730_s21), 64 }
 0x8a5   : > { %s7650_s26 = sshll.u32 %s11560_s21, 7 }
 0x8a6   : > { %p7653_p9 = scmp.eq.s32.totalorder %s7650_s26, 0 }
 0x8a7   : > { %s11342_s30 = sshrl.u32 (!%p7653_p9), %s11560_s21, 6 }
 0x8a8   : > { %6739 = sbr.rel (%p7653_p9) target bundleno = 2276 (0x8e4), region = 76  ;;  %p7654_p10 = scmp.le.s32.totalorder (!%p7653_p9), %s11342_s30, 0 }
 0x8ad   : > { %7152 = sbr.rel (%p7654_p10) target bundleno = 2259 (0x8d3), region = 155  ;;  %s11551_s24 = smov (!%p7654_p10), %s11336_s23 }
 0x8ae   : > { %s11552_s29 = smov (!%p7654_p10), %s11136_s16  ;;  %s11351_s14 = smov (!%p7654_p10), 0  }
 0x8af   : > { %s11353_s13 = smov (!%p7654_p10), 0  }
 0x8b2 LB: >> { %v6928_v49 = vld [vmem:[%s9144_s29] sm:$0xff]  ;;  %v6930_v19 = vld [vmem:[%s9144_s29 + $0x8] sm:$0xff]  ;;  %v6932_v34 = vld [vmem:[%s9144_s29 + $0x10] sm:$0xff]  ;;  %s7056_s19 = sadd.s32 1, %s9148_s14  ;;  %s6922_s13 = sadd.s32 1, %s9152_s13   ;;  %s9152_s13 = sphi %s11353_s13, %s6922_s13   ;;  %s9148_s14 = sphi %s11351_s14, %s11555_s14   ;;  %s9144_s29 = sphi %s11552_s29, %s11554_s29   ;;  %s9140_s24 = sphi %s11551_s24, %s11553_s24  }
 0x8b3   : >> { %6929 = vst [vmem:[%s9140_s24] sm:$0xff] %v6928_v49  ;;  %6931 = vst [vmem:[%s9140_s24 + $0x8] sm:$0xff] %v6930_v19  ;;  %v6934_v51 = vld [vmem:[%s9144_s29 + $0x18] sm:$0xff]  ;;  %v6936_v1 = vld [vmem:[%s9144_s29 + $0x20] sm:$0xff]  ;;  %p7057_p11 = scmp.ge.s32.totalorder %s7056_s19, %s11342_s30  ;;  %p6921_p12 = scmp.ge.s32.totalorder %s6922_s13, %s11342_s30 }
 0x8b4   : >> { %6933 = vst [vmem:[%s9140_s24 + $0x10] sm:$0xff] %v6932_v34  ;;  %v6938_v42 = vld [vmem:[%s9144_s29 + $0x28] sm:$0xff]  ;;  %6935 = vst [vmem:[%s9140_s24 + $0x18] sm:$0xff] %v6934_v51  ;;  %v6940_v0 = vld [vmem:[%s9144_s29 + $0x30] sm:$0xff] }
 0x8b5   : >> { %6937 = vst [vmem:[%s9140_s24 + $0x20] sm:$0xff] %v6936_v1  ;;  %6939 = vst [vmem:[%s9140_s24 + $0x28] sm:$0xff] %v6938_v42  ;;  %v6942_v43 = vld [vmem:[%s9144_s29 + $0x38] sm:$0xff]  ;;  %v6944_v39 = vld [vmem:[%s9144_s29 + $0x40] sm:$0xff]  ;;  %s11562_s19 = smov (%p7057_p11, %s7056_s19), 0 }
 0x8b6   : >> { %6941 = vst [vmem:[%s9140_s24 + $0x30] sm:$0xff] %v6940_v0  ;;  %6943 = vst [vmem:[%s9140_s24 + $0x38] sm:$0xff] %v6942_v43  ;;  %v6946_v29 = vld [vmem:[%s9144_s29 + $0x48] sm:$0xff]  ;;  %v6948_v35 = vld [vmem:[%s9144_s29 + $0x50] sm:$0xff]  ;;  %s7655_s20 = sshll.u32 %s11562_s19, 9  ;;  %s11555_s14 = smov %s11562_s19 }
 0x8b7   : >> { %6945 = vst [vmem:[%s9140_s24 + $0x40] sm:$0xff] %v6944_v39  ;;  %v6950_v17 = vld [vmem:[%s9144_s29 + $0x58] sm:$0xff]  ;;  %6947 = vst [vmem:[%s9140_s24 + $0x48] sm:$0xff] %v6946_v29  ;;  %v6952_v53 = vld [vmem:[%s9144_s29 + $0x60] sm:$0xff]  ;;  %s11409_s15 = scalar_lea.vmem %s11136_s16, %s7655_s20 [#allocation2]   ;;  %s11412_s27 = scalar_lea.vmem %s11336_s23, %s7655_s20  }
 0x8b8   : >> { %6949 = vst [vmem:[%s9140_s24 + $0x50] sm:$0xff] %v6948_v35  ;;  %6951 = vst [vmem:[%s9140_s24 + $0x58] sm:$0xff] %v6950_v17  ;;  %v6954_v57 = vld [vmem:[%s9144_s29 + $0x68] sm:$0xff]  ;;  %v6956_v61 = vld [vmem:[%s9144_s29 + $0x70] sm:$0xff] }
 0x8b9   : >> { %6953 = vst [vmem:[%s9140_s24 + $0x60] sm:$0xff] %v6952_v53  ;;  %6955 = vst [vmem:[%s9140_s24 + $0x68] sm:$0xff] %v6954_v57  ;;  %v6958_v46 = vld [vmem:[%s9144_s29 + $0x78] sm:$0xff]  ;;  %v6960_v48 = vld [vmem:[%s9144_s29 + $0x80] sm:$0xff] }
 0x8ba   : >> { %6957 = vst [vmem:[%s9140_s24 + $0x70] sm:$0xff] %v6956_v61  ;;  %v6962_v26 = vld [vmem:[%s9144_s29 + $0x88] sm:$0xff]  ;;  %6959 = vst [vmem:[%s9140_s24 + $0x78] sm:$0xff] %v6958_v46  ;;  %v6964_v38 = vld [vmem:[%s9144_s29 + $0x90] sm:$0xff] }
 0x8bb   : >> { %6961 = vst [vmem:[%s9140_s24 + $0x80] sm:$0xff] %v6960_v48  ;;  %6963 = vst [vmem:[%s9140_s24 + $0x88] sm:$0xff] %v6962_v26  ;;  %v6966_v52 = vld [vmem:[%s9144_s29 + $0x98] sm:$0xff]  ;;  %v6968_v60 = vld [vmem:[%s9144_s29 + $0xa0] sm:$0xff] }
 0x8bc   : >> { %6965 = vst [vmem:[%s9140_s24 + $0x90] sm:$0xff] %v6964_v38  ;;  %6967 = vst [vmem:[%s9140_s24 + $0x98] sm:$0xff] %v6966_v52  ;;  %v6970_v28 = vld [vmem:[%s9144_s29 + $0xa8] sm:$0xff]  ;;  %v6972_v9 = vld [vmem:[%s9144_s29 + $0xb0] sm:$0xff] }
 0x8bd   : >> { %6969 = vst [vmem:[%s9140_s24 + $0xa0] sm:$0xff] %v6968_v60  ;;  %v6974_v18 = vld [vmem:[%s9144_s29 + $0xb8] sm:$0xff]  ;;  %6971 = vst [vmem:[%s9140_s24 + $0xa8] sm:$0xff] %v6970_v28  ;;  %v6976_v56 = vld [vmem:[%s9144_s29 + $0xc0] sm:$0xff] }
 0x8be   : >> { %6973 = vst [vmem:[%s9140_s24 + $0xb0] sm:$0xff] %v6972_v9  ;;  %6975 = vst [vmem:[%s9140_s24 + $0xb8] sm:$0xff] %v6974_v18  ;;  %v6978_v8 = vld [vmem:[%s9144_s29 + $0xc8] sm:$0xff]  ;;  %v6980_v36 = vld [vmem:[%s9144_s29 + $0xd0] sm:$0xff] }
 0x8bf   : >> { %6977 = vst [vmem:[%s9140_s24 + $0xc0] sm:$0xff] %v6976_v56  ;;  %6979 = vst [vmem:[%s9140_s24 + $0xc8] sm:$0xff] %v6978_v8  ;;  %v6982_v30 = vld [vmem:[%s9144_s29 + $0xd8] sm:$0xff]  ;;  %v6984_v3 = vld [vmem:[%s9144_s29 + $0xe0] sm:$0xff] }
 0x8c0   : >> { %6981 = vst [vmem:[%s9140_s24 + $0xd0] sm:$0xff] %v6980_v36  ;;  %v6986_v23 = vld [vmem:[%s9144_s29 + $0xe8] sm:$0xff]  ;;  %6983 = vst [vmem:[%s9140_s24 + $0xd8] sm:$0xff] %v6982_v30  ;;  %v6988_v13 = vld [vmem:[%s9144_s29 + $0xf0] sm:$0xff] }
 0x8c1   : >> { %6985 = vst [vmem:[%s9140_s24 + $0xe0] sm:$0xff] %v6984_v3  ;;  %6987 = vst [vmem:[%s9140_s24 + $0xe8] sm:$0xff] %v6986_v23  ;;  %v6990_v12 = vld [vmem:[%s9144_s29 + $0xf8] sm:$0xff]  ;;  %v6992_v58 = vld [vmem:[%s9144_s29 + $0x100] sm:$0xff] }
 0x8c2   : >> { %6989 = vst [vmem:[%s9140_s24 + $0xf0] sm:$0xff] %v6988_v13  ;;  %6991 = vst [vmem:[%s9140_s24 + $0xf8] sm:$0xff] %v6990_v12  ;;  %v6994_v20 = vld [vmem:[%s9144_s29 + $0x108] sm:$0xff]  ;;  %v6996_v7 = vld [vmem:[%s9144_s29 + $0x110] sm:$0xff] }
 0x8c3   : >> { %6993 = vst [vmem:[%s9140_s24 + $0x100] sm:$0xff] %v6992_v58  ;;  %v6998_v63 = vld [vmem:[%s9144_s29 + $0x118] sm:$0xff]  ;;  %6995 = vst [vmem:[%s9140_s24 + $0x108] sm:$0xff] %v6994_v20  ;;  %v7000_v10 = vld [vmem:[%s9144_s29 + $0x120] sm:$0xff] }
 0x8c4   : >> { %6997 = vst [vmem:[%s9140_s24 + $0x110] sm:$0xff] %v6996_v7  ;;  %6999 = vst [vmem:[%s9140_s24 + $0x118] sm:$0xff] %v6998_v63  ;;  %v7002_v62 = vld [vmem:[%s9144_s29 + $0x128] sm:$0xff]  ;;  %v7004_v27 = vld [vmem:[%s9144_s29 + $0x130] sm:$0xff] }
 0x8c5   : >> { %7001 = vst [vmem:[%s9140_s24 + $0x120] sm:$0xff] %v7000_v10  ;;  %7003 = vst [vmem:[%s9140_s24 + $0x128] sm:$0xff] %v7002_v62  ;;  %v7006_v32 = vld [vmem:[%s9144_s29 + $0x138] sm:$0xff]  ;;  %v7008_v33 = vld [vmem:[%s9144_s29 + $0x140] sm:$0xff] }
 0x8c6   : >> { %7005 = vst [vmem:[%s9140_s24 + $0x130] sm:$0xff] %v7004_v27  ;;  %v7010_v11 = vld [vmem:[%s9144_s29 + $0x148] sm:$0xff]  ;;  %7007 = vst [vmem:[%s9140_s24 + $0x138] sm:$0xff] %v7006_v32  ;;  %v7012_v37 = vld [vmem:[%s9144_s29 + $0x150] sm:$0xff] }
 0x8c7   : >> { %7009 = vst [vmem:[%s9140_s24 + $0x140] sm:$0xff] %v7008_v33  ;;  %7011 = vst [vmem:[%s9140_s24 + $0x148] sm:$0xff] %v7010_v11  ;;  %v7014_v14 = vld [vmem:[%s9144_s29 + $0x158] sm:$0xff]  ;;  %v7016_v21 = vld [vmem:[%s9144_s29 + $0x160] sm:$0xff] }
 0x8c8   : >> { %7013 = vst [vmem:[%s9140_s24 + $0x150] sm:$0xff] %v7012_v37  ;;  %7015 = vst [vmem:[%s9140_s24 + $0x158] sm:$0xff] %v7014_v14  ;;  %v7018_v6 = vld [vmem:[%s9144_s29 + $0x168] sm:$0xff]  ;;  %v7020_v40 = vld [vmem:[%s9144_s29 + $0x170] sm:$0xff] }
 0x8c9   : >> { %7017 = vst [vmem:[%s9140_s24 + $0x160] sm:$0xff] %v7016_v21  ;;  %v7022_v2 = vld [vmem:[%s9144_s29 + $0x178] sm:$0xff]  ;;  %7019 = vst [vmem:[%s9140_s24 + $0x168] sm:$0xff] %v7018_v6  ;;  %v7024_v16 = vld [vmem:[%s9144_s29 + $0x180] sm:$0xff] }
 0x8ca   : >> { %7021 = vst [vmem:[%s9140_s24 + $0x170] sm:$0xff] %v7020_v40  ;;  %7023 = vst [vmem:[%s9140_s24 + $0x178] sm:$0xff] %v7022_v2  ;;  %v7026_v55 = vld [vmem:[%s9144_s29 + $0x188] sm:$0xff]  ;;  %v7028_v15 = vld [vmem:[%s9144_s29 + $0x190] sm:$0xff] }
 0x8cb   : >> { %7025 = vst [vmem:[%s9140_s24 + $0x180] sm:$0xff] %v7024_v16  ;;  %7027 = vst [vmem:[%s9140_s24 + $0x188] sm:$0xff] %v7026_v55  ;;  %v7030_v31 = vld [vmem:[%s9144_s29 + $0x198] sm:$0xff]  ;;  %v7032_v24 = vld [vmem:[%s9144_s29 + $0x1a0] sm:$0xff] }
 0x8cc   : >> { %7029 = vst [vmem:[%s9140_s24 + $0x190] sm:$0xff] %v7028_v15  ;;  %v7034_v45 = vld [vmem:[%s9144_s29 + $0x1a8] sm:$0xff]  ;;  %7031 = vst [vmem:[%s9140_s24 + $0x198] sm:$0xff] %v7030_v31  ;;  %v7036_v44 = vld [vmem:[%s9144_s29 + $0x1b0] sm:$0xff] }
 0x8cd   : >> { %7033 = vst [vmem:[%s9140_s24 + $0x1a0] sm:$0xff] %v7032_v24  ;;  %7035 = vst [vmem:[%s9140_s24 + $0x1a8] sm:$0xff] %v7034_v45  ;;  %v7038_v22 = vld [vmem:[%s9144_s29 + $0x1b8] sm:$0xff]  ;;  %v7040_v47 = vld [vmem:[%s9144_s29 + $0x1c0] sm:$0xff] }
 0x8ce   : >> { %7037 = vst [vmem:[%s9140_s24 + $0x1b0] sm:$0xff] %v7036_v44  ;;  %7039 = vst [vmem:[%s9140_s24 + $0x1b8] sm:$0xff] %v7038_v22  ;;  %v7042_v50 = vld [vmem:[%s9144_s29 + $0x1c8] sm:$0xff]  ;;  %v7044_v59 = vld [vmem:[%s9144_s29 + $0x1d0] sm:$0xff]  ;;  %6924 = sbr.rel (!%p6921_p12) target bundleno = 2226 (0x8b2), region = 161 }
 0x8cf   : >> { %7041 = vst [vmem:[%s9140_s24 + $0x1c0] sm:$0xff] %v7040_v47  ;;  %v7046_v41 = vld [vmem:[%s9144_s29 + $0x1d8] sm:$0xff]  ;;  %7043 = vst [vmem:[%s9140_s24 + $0x1c8] sm:$0xff] %v7042_v50  ;;  %v7048_v54 = vld [vmem:[%s9144_s29 + $0x1e0] sm:$0xff] }
 0x8d0   : >> { %7045 = vst [vmem:[%s9140_s24 + $0x1d0] sm:$0xff] %v7044_v59  ;;  %7047 = vst [vmem:[%s9140_s24 + $0x1d8] sm:$0xff] %v7046_v41  ;;  %v7050_v25 = vld [vmem:[%s9144_s29 + $0x1e8] sm:$0xff]  ;;  %v7052_v4 = vld [vmem:[%s9144_s29 + $0x1f0] sm:$0xff] }
 0x8d1   : >> { %7049 = vst [vmem:[%s9140_s24 + $0x1e0] sm:$0xff] %v7048_v54  ;;  %7051 = vst [vmem:[%s9140_s24 + $0x1e8] sm:$0xff] %v7050_v25  ;;  %v7054_v5 = vld [vmem:[%s9144_s29 + $0x1f8] sm:$0xff]  ;;  %s11554_s29 = smov %s11409_s15 }
 0x8d2   : >> { %7053 = vst [vmem:[%s9140_s24 + $0x1f0] sm:$0xff] %v7052_v4  ;;  %7055 = vst [vmem:[%s9140_s24 + $0x1f8] sm:$0xff] %v7054_v5  ;;  %s11553_s24 = smov %s11412_s27 }
 0x8d3 PF: > { %s11517_s17 = sand.u32 63, %s11560_s21   ;;  %s7666_s18 = sshll.u32 %s11342_s30, 9 }
 0x8d4   : > { %s7067_s26 = scalar_lea.vmem %s11136_s16, %s7666_s18 [#allocation2]   ;;  %s7069_s20 = scalar_lea.vmem %s11336_s23, %s7666_s18  }
 0x8d5   : > { %p7660_p13 = scmp.le.s32.totalorder %s11517_s17, 0 }
 0x8d6   : > { %s9154_s27 = smov (!%p7660_p13), %s7069_s20   ;;  %s9158_s15 = smov (!%p7660_p13), %s7067_s26  }
 0x8d7   : > { %7166 = sbr.rel (%p7660_p13) target bundleno = 2276 (0x8e4), region = 166  ;;  %s9162_s0 = smov (!%p7660_p13), 0  }
 0x8d8   : > { %s9166_s19 = smov (!%p7660_p13), 0  }
 0x8dc LB: >> { %v7079_v49 = vld [vmem:[%s9160_s15] sm:$0xff]  ;;  %s7081_s21 = sadd.s32 1, %s9164_s0  ;;  %s7073_s19 = sadd.s32 1, %s9168_s19   ;;  %s9168_s19 = sphi %s9166_s19, %s7073_s19   ;;  %s9164_s0 = sphi %s9162_s0, %s9163_s0   ;;  %s9160_s15 = sphi %s9158_s15, %s7086_s15   ;;  %s9156_s27 = sphi %s9154_s27, %s7087_s27  }
 0x8dd   : >> { %7080 = vst [vmem:[%s9156_s27] sm:$0xff] %v7079_v49  ;;  %p7082_p0 = scmp.ge.s32.totalorder %s7081_s21, %s11517_s17  ;;  %p7072_p1 = scmp.ge.s32.totalorder %s7073_s19, %s11517_s17 }
 0x8df   : >> { %s11564_s21 = smov (%p7082_p0, %s7081_s21), 0  ;;  %7075 = sbr.rel (!%p7072_p1) target bundleno = 2268 (0x8dc), region = 172 }
 0x8e0   : >> { %s7661_s16 = sshll.u32 %s11564_s21, 3  ;;  %s9163_s0 = smov %s11564_s21  }
 0x8e1   : >> { %s7086_s15 = scalar_lea.vmem %s7067_s26, %s7661_s16 [#allocation2]   ;;  %s7087_s27 = scalar_lea.vmem %s7069_s20, %s7661_s16  }
 0x8e4 PF: > { %p19_p2 = scmp.ge.s32.totalorder %s9251_s25, 4   ;;  %s11556_s21 = smov %s9132_s22 }
 0x8e5   : > { %s11557_s22 = smov %s9259_s28  ;;  %s11558_s23 = smov %s9251_s25 }
 0x8e6   :  { %21 = sbr.rel (!%p19_p2) target bundleno = 4 (0x4), region = 183 }

</bundles_post_ra>
